<compile_context>
chip_gen: v7x
topology: tpu7x:2x2x1
jax: 0.10.0
libtpu: 0.0.40
codegen_flags: <defaults>
</compile_context>

<pallas_src>
import numpy as np
import jax
import jax.numpy as jnp
from jax import lax
from jax.experimental import pallas as pl
from jax.experimental.pallas import tpu as pltpu  # noqa: F401  (TPU backend)

# ----------------------------------------------------------------------------
# Hyper-parameters (small, consistent with the module's forward)
# ----------------------------------------------------------------------------
VOCAB_SIZE = 50
D_MODEL = 32          # == embedding_size
N_LAYER = 2
N_HEAD = 4
D_K = 8
D_V = 8
D_FF = 64
PAD_IDX = 0
SCALE_EMB = True
LN_EPS = 1e-6

B = 2                 # batch
L_TRG = 8             # target sequence length
L_ENC = 16            # encoder output length

_INV_SCALE = 1.0 / (D_K ** 0.5)
_DQ = N_HEAD * D_K    # 32 (fused q/k width)
_DV = N_HEAD * D_V    # 32 (fused v width)

_PER_LAYER = 15       # number of parameter arrays per decoder layer
_N_FIXED = 5          # x, enc, bias, top ln_g, top ln_b
_N_INPUTS = _N_FIXED + N_LAYER * _PER_LAYER


# ----------------------------------------------------------------------------
# In-kernel helpers (operate on traced values, fully unrolled at trace time)
# ----------------------------------------------------------------------------
def _ln(y, g, b):
    mu = jnp.mean(y, axis=-1, keepdims=True)
    var = jnp.mean((y - mu) ** 2, axis=-1, keepdims=True)
    return (y - mu) * lax.rsqrt(var + LN_EPS) * g + b


def _softmax_rows(s):
    s = s - jnp.max(s, axis=-1, keepdims=True)
    e = jnp.exp(s)
    return e * pl.reciprocal(jnp.sum(e, axis=-1, keepdims=True), approx=True)


def _attention(q_all, k_all, v_all, nb, lq, lk, bias):
    """q_all: (nb*lq, H*Dk), k_all: (nb*lk, H*Dk), v_all: (nb*lk, H*Dv).
    Heads are sliced out of the lane dimension; loop is static (unrolled)."""
    out_rows = []
    for b in range(nb):
        qb = q_all[b * lq:(b + 1) * lq, :]
        kb = k_all[b * lk:(b + 1) * lk, :]
        vb = v_all[b * lk:(b + 1) * lk, :]
        head_outs = []
        for h in range(N_HEAD):
            qh = qb[:, h * D_K:(h + 1) * D_K]
            kh = kb[:, h * D_K:(h + 1) * D_K]
            vh = vb[:, h * D_V:(h + 1) * D_V]
            s = jnp.dot(qh, kh.T, preferred_element_type=jnp.float32) * _INV_SCALE
            if bias is not None:
                s = s + bias[b]          # additive mask bias (0 keep / -1e9 mask)
            p = _softmax_rows(s)
            head_outs.append(jnp.dot(p, vh, preferred_element_type=jnp.float32))
        out_rows.append(jnp.concatenate(head_outs, axis=1))   # (lq, H*Dv)
    return jnp.concatenate(out_rows, axis=0)                  # (nb*lq, H*Dv)


def _decoder_layer(y, enc, bias, nb, lq, lk, lrefs):
    (sa_wqkv, sa_wo, sa_g, sa_b,
     ca_wq, ca_wkv, ca_wo, ca_g, ca_b,
     w1, b1, w2, b2, f_g, f_b) = lrefs

    # ---- masked self-attention (fused qkv) + residual + LN ----
    residual = y
    qkv = jnp.dot(y, sa_wqkv[...], preferred_element_type=jnp.float32)   # (nb*lq, 3*DQ)
    attn = _attention(qkv[:, :_DQ], qkv[:, _DQ:2 * _DQ], qkv[:, 2 * _DQ:],
                      nb, lq, lq, bias)
    y = jnp.dot(attn, sa_wo[...], preferred_element_type=jnp.float32) + residual
    y = _ln(y, sa_g[...], sa_b[...])

    # ---- encoder-decoder attention (mask=None -> no masking) ----
    residual = y
    q = jnp.dot(y, ca_wq[...], preferred_element_type=jnp.float32)       # (nb*lq, DQ)
    kv = jnp.dot(enc, ca_wkv[...], preferred_element_type=jnp.float32)   # (nb*lk, DQ+DV)
    attn = _attention(q, kv[:, :_DQ], kv[:, _DQ:], nb, lq, lk, None)
    y = jnp.dot(attn, ca_wo[...], preferred_element_type=jnp.float32) + residual
    y = _ln(y, ca_g[...], ca_b[...])

    # ---- position-wise FFN + residual + LN ----
    residual = y
    h = jnp.dot(y, w1[...], preferred_element_type=jnp.float32) + b1[...]
    h = jnp.maximum(h, 0.0)
    y = jnp.dot(h, w2[...], preferred_element_type=jnp.float32) + b2[...] + residual
    y = _ln(y, f_g[...], f_b[...])
    return y


# ----------------------------------------------------------------------------
# Fused decoder kernel: one pallas_call for the whole forward pass
# ----------------------------------------------------------------------------
def _decoder_kernel(*refs):
    x_ref, enc_ref, bias_ref, g0_ref, b0_ref = refs[:_N_FIXED]
    o_ref = refs[_N_INPUTS]

    nb, lq, _ = bias_ref.shape
    lk = enc_ref.shape[0] // nb

    enc = enc_ref[...]
    bias = bias_ref[...]

    # top layer-norm (Decoder.layer_norm applied after embedding + PE)
    y = _ln(x_ref[...], g0_ref[...], b0_ref[...])

    for li in range(N_LAYER):
        lrefs = refs[_N_FIXED + li * _PER_LAYER: _N_FIXED + (li + 1) * _PER_LAYER]
        y = _decoder_layer(y, enc, bias, nb, lq, lk, lrefs)

    o_ref[...] = y


# ----------------------------------------------------------------------------
# JAX wrapper (embedding / PE glue + single pallas_call)
# ----------------------------------------------------------------------------
@jax.jit
def decoder_forward(trg_seq, trg_mask, enc_output, params):
    Bq, Lq = trg_seq.shape
    Lenc = enc_output.shape[1]

    # embedding lookup (glue) + scale + positional encoding + dropout (identity)
    emb = jnp.take(params["embedding"], trg_seq, axis=0)            # (B, L, D)
    if SCALE_EMB:
        emb = emb * (D_MODEL ** 0.5)
    emb = emb + params["pos_table"][None, :Lq, :]

    x2d = emb.reshape(Bq * Lq, D_MODEL)
    enc2d = enc_output.reshape(Bq * Lenc, D_MODEL)
    bias = (trg_mask - 1.0) * 1.0e9                                 # additive mask bias

    inputs = [x2d, enc2d, bias,
              params["ln_g"].reshape(1, D_MODEL),
              params["ln_b"].reshape(1, D_MODEL)]
    for lp in params["layers"]:
        sa, ca, ff = lp["self_attn"], lp["cross_attn"], lp["ffn"]
        inputs += [
            sa["w_qkv"], sa["wo"],
            sa["ln_g"].reshape(1, D_MODEL), sa["ln_b"].reshape(1, D_MODEL),
            ca["wq"], ca["w_kv"], ca["wo"],
            ca["ln_g"].reshape(1, D_MODEL), ca["ln_b"].reshape(1, D_MODEL),
            ff["w1"], ff["b1"].reshape(1, D_FF),
            ff["w2"], ff["b2"].reshape(1, D_MODEL),
            ff["ln_g"].reshape(1, D_MODEL), ff["ln_b"].reshape(1, D_MODEL),
        ]

    out2d = pl.pallas_call(
        _decoder_kernel,
        out_shape=jax.ShapeDtypeStruct((Bq * Lq, D_MODEL), jnp.float32),
    )(*inputs)
    return (out2d.reshape(Bq, Lq, D_MODEL),)


# ----------------------------------------------------------------------------
# Deterministic parameter initialization (q/k/v weights stored pre-fused)
# ----------------------------------------------------------------------------
def _pos_table(embedding_size, max_pos=100):
    pos = np.arange(max_pos)[:, np.newaxis]
    i = np.arange(embedding_size)[np.newaxis, :]
    angle = pos * (1.0 / np.power(10000, 2 * (i // 2) / np.float32(embedding_size)))
    angle[:, 0::2] = np.sin(angle[:, 0::2])
    angle[:, 1::2] = np.cos(angle[:, 1::2])
    return jnp.asarray(angle, dtype=jnp.float32)


def init_params(key):
    keys = iter(jax.random.split(key, 64))

    def nrm(shape, s=0.05):
        return (s * jax.random.normal(next(keys), shape)).astype(jnp.float32)

    def self_attn_params():
        return dict(
            w_qkv=nrm((D_MODEL, 3 * N_HEAD * D_K)),      # [wq | wk | wv] fused
            wo=nrm((N_HEAD * D_V, D_MODEL)),
            ln_g=jnp.ones((D_MODEL,), jnp.float32),
            ln_b=jnp.zeros((D_MODEL,), jnp.float32),
        )

    def cross_attn_params():
        return dict(
            wq=nrm((D_MODEL, N_HEAD * D_K)),
            w_kv=nrm((D_MODEL, N_HEAD * (D_K + D_V))),    # [wk | wv] fused
            wo=nrm((N_HEAD * D_V, D_MODEL)),
            ln_g=jnp.ones((D_MODEL,), jnp.float32),
            ln_b=jnp.zeros((D_MODEL,), jnp.float32),
        )

    emb = nrm((VOCAB_SIZE, D_MODEL), s=1.0)
    emb = emb.at[PAD_IDX].set(0.0)   # padding_idx row zeroed

    layers = []
    for _ in range(N_LAYER):
        layers.append(dict(
            self_attn=self_attn_params(),
            cross_attn=cross_attn_params(),
            ffn=dict(
                w1=nrm((D_MODEL, D_FF)),
                b1=jnp.zeros((D_FF,), jnp.float32),
                w2=nrm((D_FF, D_MODEL)),
                b2=jnp.zeros((D_MODEL,), jnp.float32),
                ln_g=jnp.ones((D_MODEL,), jnp.float32),
                ln_b=jnp.zeros((D_MODEL,), jnp.float32),
            ),
        ))

    return dict(
        embedding=emb,
        pos_table=_pos_table(D_MODEL),
        ln_g=jnp.ones((D_MODEL,), jnp.float32),
        ln_b=jnp.zeros((D_MODEL,), jnp.float32),
        layers=layers,
    )


# ----------------------------------------------------------------------------
# Main
# ----------------------------------------------------------------------------
if __name__ == "__main__":
    root = jax.random.PRNGKey(0)
    k_par, k_seq, k_enc = jax.random.split(root, 3)

    params = init_params(k_par)

    trg_seq = jax.random.randint(k_seq, (B, L_TRG), 1, VOCAB_SIZE).astype(jnp.int32)
    # introduce some padding in batch 0
    trg_seq = trg_seq.at[0, -2:].set(PAD_IDX)

    enc_output = jax.random.normal(k_enc, (B, L_ENC, D_MODEL), jnp.float32)

    # pad + subsequent (causal) mask: (B, L, L), 1 = keep, 0 = mask out
    pad_mask = (trg_seq != PAD_IDX).astype(jnp.float32)                 # (B, L)
    sub_mask = jnp.tril(jnp.ones((L_TRG, L_TRG), jnp.float32))          # (L, L)
    trg_mask = pad_mask[:, None, :] * sub_mask[None, :, :]              # (B, L, L)

    (out,) = decoder_forward(trg_seq, trg_mask, enc_output, params)
    out = jax.block_until_ready(out)

    assert out.shape == (B, L_TRG, D_MODEL)
    assert bool(jnp.all(jnp.isfinite(out)))
    print("KERNEL_OK")
</pallas_src>

<mosaic_0001>
module attributes {stable_mosaic.version = 11 : i64} {
  func.func @_decoder_kernel(%arg0: memref<16x32xf32, #tpu.memory_space<vmem>>, %arg1: memref<32x32xf32, #tpu.memory_space<vmem>>, %arg2: memref<2x8x8xf32, #tpu.memory_space<vmem>>, %arg3: memref<1x32xf32, #tpu.memory_space<vmem>>, %arg4: memref<1x32xf32, #tpu.memory_space<vmem>>, %arg5: memref<32x96xf32, #tpu.memory_space<vmem>>, %arg6: memref<32x32xf32, #tpu.memory_space<vmem>>, %arg7: memref<1x32xf32, #tpu.memory_space<vmem>>, %arg8: memref<1x32xf32, #tpu.memory_space<vmem>>, %arg9: memref<32x32xf32, #tpu.memory_space<vmem>>, %arg10: memref<32x64xf32, #tpu.memory_space<vmem>>, %arg11: memref<32x32xf32, #tpu.memory_space<vmem>>, %arg12: memref<1x32xf32, #tpu.memory_space<vmem>>, %arg13: memref<1x32xf32, #tpu.memory_space<vmem>>, %arg14: memref<32x64xf32, #tpu.memory_space<vmem>>, %arg15: memref<1x64xf32, #tpu.memory_space<vmem>>, %arg16: memref<64x32xf32, #tpu.memory_space<vmem>>, %arg17: memref<1x32xf32, #tpu.memory_space<vmem>>, %arg18: memref<1x32xf32, #tpu.memory_space<vmem>>, %arg19: memref<1x32xf32, #tpu.memory_space<vmem>>, %arg20: memref<32x96xf32, #tpu.memory_space<vmem>>, %arg21: memref<32x32xf32, #tpu.memory_space<vmem>>, %arg22: memref<1x32xf32, #tpu.memory_space<vmem>>, %arg23: memref<1x32xf32, #tpu.memory_space<vmem>>, %arg24: memref<32x32xf32, #tpu.memory_space<vmem>>, %arg25: memref<32x64xf32, #tpu.memory_space<vmem>>, %arg26: memref<32x32xf32, #tpu.memory_space<vmem>>, %arg27: memref<1x32xf32, #tpu.memory_space<vmem>>, %arg28: memref<1x32xf32, #tpu.memory_space<vmem>>, %arg29: memref<32x64xf32, #tpu.memory_space<vmem>>, %arg30: memref<1x64xf32, #tpu.memory_space<vmem>>, %arg31: memref<64x32xf32, #tpu.memory_space<vmem>>, %arg32: memref<1x32xf32, #tpu.memory_space<vmem>>, %arg33: memref<1x32xf32, #tpu.memory_space<vmem>>, %arg34: memref<1x32xf32, #tpu.memory_space<vmem>>, %arg35: memref<16x32xf32, #tpu.memory_space<vmem>>) attributes {dimension_semantics = [], scalar_prefetch = 0 : i64, scratch_operands = 0 : i64, tpu.core_type = #tpu.core_type<tc>} {
    %c0 = arith.constant 0 : index
    %c0_0 = arith.constant 0 : index
    %0 = vector.load %arg1[%c0, %c0_0] : memref<32x32xf32, #tpu.memory_space<vmem>>, vector<32x32xf32>
    %c0_1 = arith.constant 0 : index
    %c0_2 = arith.constant 0 : index
    %c0_3 = arith.constant 0 : index
    %1 = vector.load %arg2[%c0_1, %c0_2, %c0_3] : memref<2x8x8xf32, #tpu.memory_space<vmem>>, vector<2x8x8xf32>
    %c0_4 = arith.constant 0 : index
    %c0_5 = arith.constant 0 : index
    %2 = vector.load %arg0[%c0_4, %c0_5] : memref<16x32xf32, #tpu.memory_space<vmem>>, vector<16x32xf32>
    %c0_6 = arith.constant 0 : index
    %c0_7 = arith.constant 0 : index
    %3 = vector.load %arg3[%c0_6, %c0_7] : memref<1x32xf32, #tpu.memory_space<vmem>>, vector<1x32xf32>
    %c0_8 = arith.constant 0 : index
    %c0_9 = arith.constant 0 : index
    %4 = vector.load %arg4[%c0_8, %c0_9] : memref<1x32xf32, #tpu.memory_space<vmem>>, vector<1x32xf32>
    %cst = arith.constant dense<0.000000e+00> : vector<16xf32>
    %5 = vector.multi_reduction <add>, %2, %cst [1] : vector<16x32xf32> to vector<16xf32>
    %6 = vector.shape_cast %5 : vector<16xf32> to vector<16x1xf32>
    %cst_10 = arith.constant 3.200000e+01 : f32
    %7 = vector.broadcast %cst_10 : f32 to vector<16x1xf32>
    %8 = arith.divf %6, %7 : vector<16x1xf32>
    %9 = vector.broadcast %8 : vector<16x1xf32> to vector<16x32xf32>
    %10 = arith.subf %2, %9 : vector<16x32xf32>
    %11 = arith.mulf %10, %10 : vector<16x32xf32>
    %cst_11 = arith.constant dense<0.000000e+00> : vector<16xf32>
    %12 = vector.multi_reduction <add>, %11, %cst_11 [1] : vector<16x32xf32> to vector<16xf32>
    %13 = vector.shape_cast %12 : vector<16xf32> to vector<16x1xf32>
    %cst_12 = arith.constant 3.200000e+01 : f32
    %14 = vector.broadcast %cst_12 : f32 to vector<16x1xf32>
    %15 = arith.divf %13, %14 : vector<16x1xf32>
    %16 = vector.broadcast %8 : vector<16x1xf32> to vector<16x32xf32>
    %17 = arith.subf %2, %16 : vector<16x32xf32>
    %cst_13 = arith.constant 9.99999997E-7 : f32
    %18 = vector.broadcast %cst_13 : f32 to vector<16x1xf32>
    %19 = arith.addf %15, %18 : vector<16x1xf32>
    %20 = math.rsqrt %19 : vector<16x1xf32>
    %21 = vector.broadcast %20 : vector<16x1xf32> to vector<16x32xf32>
    %22 = arith.mulf %17, %21 : vector<16x32xf32>
    %23 = vector.broadcast %3 : vector<1x32xf32> to vector<16x32xf32>
    %24 = arith.mulf %22, %23 : vector<16x32xf32>
    %25 = vector.broadcast %4 : vector<1x32xf32> to vector<16x32xf32>
    %26 = arith.addf %24, %25 : vector<16x32xf32>
    %c0_14 = arith.constant 0 : index
    %c0_15 = arith.constant 0 : index
    %27 = vector.load %arg5[%c0_14, %c0_15] : memref<32x96xf32, #tpu.memory_space<vmem>>, vector<32x96xf32>
    %cst_16 = arith.constant dense<0.000000e+00> : vector<16x96xf32>
    %28 = tpu.matmul %26, %27, %cst_16 {dimension_numbers = #tpu.dot_dimension_numbers<[1], [0], [0], [1], [0, 0, 1, 1], [], []>} : vector<16x32xf32>, vector<32x96xf32>, vector<16x96xf32> -> vector<16x96xf32>
    %29 = vector.extract_strided_slice %28 {offsets = [0, 0], sizes = [16, 32], strides = [1, 1]} : vector<16x96xf32> to vector<16x32xf32>
    %30 = vector.extract_strided_slice %28 {offsets = [0, 32], sizes = [16, 32], strides = [1, 1]} : vector<16x96xf32> to vector<16x32xf32>
    %31 = vector.extract_strided_slice %28 {offsets = [0, 64], sizes = [16, 32], strides = [1, 1]} : vector<16x96xf32> to vector<16x32xf32>
    %32 = vector.extract_strided_slice %29 {offsets = [0, 0], sizes = [8, 32], strides = [1, 1]} : vector<16x32xf32> to vector<8x32xf32>
    %33 = vector.extract_strided_slice %30 {offsets = [0, 0], sizes = [8, 32], strides = [1, 1]} : vector<16x32xf32> to vector<8x32xf32>
    %34 = vector.extract_strided_slice %31 {offsets = [0, 0], sizes = [8, 32], strides = [1, 1]} : vector<16x32xf32> to vector<8x32xf32>
    %35 = vector.extract_strided_slice %32 {offsets = [0, 0], sizes = [8, 8], strides = [1, 1]} : vector<8x32xf32> to vector<8x8xf32>
    %36 = vector.extract_strided_slice %33 {offsets = [0, 0], sizes = [8, 8], strides = [1, 1]} : vector<8x32xf32> to vector<8x8xf32>
    %37 = vector.extract_strided_slice %34 {offsets = [0, 0], sizes = [8, 8], strides = [1, 1]} : vector<8x32xf32> to vector<8x8xf32>
    %38 = tpu.transpose %36, [1, 0] : vector<8x8xf32> -> vector<8x8xf32>
    %cst_17 = arith.constant dense<0.000000e+00> : vector<8x8xf32>
    %39 = tpu.matmul %35, %38, %cst_17 {dimension_numbers = #tpu.dot_dimension_numbers<[1], [0], [0], [1], [0, 0, 1, 1], [], []>} : vector<8x8xf32>, vector<8x8xf32>, vector<8x8xf32> -> vector<8x8xf32>
    %cst_18 = arith.constant 0.353553385 : f32
    %40 = vector.broadcast %cst_18 : f32 to vector<8x8xf32>
    %41 = arith.mulf %39, %40 : vector<8x8xf32>
    %42 = vector.extract_strided_slice %1 {offsets = [0, 0, 0], sizes = [1, 8, 8], strides = [1, 1, 1]} : vector<2x8x8xf32> to vector<1x8x8xf32>
    %43 = vector.shape_cast %42 : vector<1x8x8xf32> to vector<8x8xf32>
    %44 = arith.addf %41, %43 : vector<8x8xf32>
    %cst_19 = arith.constant dense<0xFF800000> : vector<8xf32>
    %45 = vector.multi_reduction <maximumf>, %44, %cst_19 [1] : vector<8x8xf32> to vector<8xf32>
    %46 = vector.shape_cast %45 : vector<8xf32> to vector<8x1xf32>
    %47 = vector.broadcast %46 : vector<8x1xf32> to vector<8x8xf32>
    %48 = arith.subf %44, %47 : vector<8x8xf32>
    %49 = math.exp %48 : vector<8x8xf32>
    %cst_20 = arith.constant dense<0.000000e+00> : vector<8xf32>
    %50 = vector.multi_reduction <add>, %49, %cst_20 [1] : vector<8x8xf32> to vector<8xf32>
    %51 = vector.shape_cast %50 : vector<8xf32> to vector<8x1xf32>
    %52 = tpu.reciprocal %51 {approx = true} : vector<8x1xf32> -> vector<8x1xf32>
    %53 = vector.broadcast %52 : vector<8x1xf32> to vector<8x8xf32>
    %54 = arith.mulf %49, %53 : vector<8x8xf32>
    %cst_21 = arith.constant dense<0.000000e+00> : vector<8x8xf32>
    %55 = tpu.matmul %54, %37, %cst_21 {dimension_numbers = #tpu.dot_dimension_numbers<[1], [0], [0], [1], [0, 0, 1, 1], [], []>} : vector<8x8xf32>, vector<8x8xf32>, vector<8x8xf32> -> vector<8x8xf32>
    %56 = vector.extract_strided_slice %32 {offsets = [0, 8], sizes = [8, 8], strides = [1, 1]} : vector<8x32xf32> to vector<8x8xf32>
    %57 = vector.extract_strided_slice %33 {offsets = [0, 8], sizes = [8, 8], strides = [1, 1]} : vector<8x32xf32> to vector<8x8xf32>
    %58 = vector.extract_strided_slice %34 {offsets = [0, 8], sizes = [8, 8], strides = [1, 1]} : vector<8x32xf32> to vector<8x8xf32>
    %59 = tpu.transpose %57, [1, 0] : vector<8x8xf32> -> vector<8x8xf32>
    %cst_22 = arith.constant dense<0.000000e+00> : vector<8x8xf32>
    %60 = tpu.matmul %56, %59, %cst_22 {dimension_numbers = #tpu.dot_dimension_numbers<[1], [0], [0], [1], [0, 0, 1, 1], [], []>} : vector<8x8xf32>, vector<8x8xf32>, vector<8x8xf32> -> vector<8x8xf32>
    %cst_23 = arith.constant 0.353553385 : f32
    %61 = vector.broadcast %cst_23 : f32 to vector<8x8xf32>
    %62 = arith.mulf %60, %61 : vector<8x8xf32>
    %63 = vector.extract_strided_slice %1 {offsets = [0, 0, 0], sizes = [1, 8, 8], strides = [1, 1, 1]} : vector<2x8x8xf32> to vector<1x8x8xf32>
    %64 = vector.shape_cast %63 : vector<1x8x8xf32> to vector<8x8xf32>
    %65 = arith.addf %62, %64 : vector<8x8xf32>
    %cst_24 = arith.constant dense<0xFF800000> : vector<8xf32>
    %66 = vector.multi_reduction <maximumf>, %65, %cst_24 [1] : vector<8x8xf32> to vector<8xf32>
    %67 = vector.shape_cast %66 : vector<8xf32> to vector<8x1xf32>
    %68 = vector.broadcast %67 : vector<8x1xf32> to vector<8x8xf32>
    %69 = arith.subf %65, %68 : vector<8x8xf32>
    %70 = math.exp %69 : vector<8x8xf32>
    %cst_25 = arith.constant dense<0.000000e+00> : vector<8xf32>
    %71 = vector.multi_reduction <add>, %70, %cst_25 [1] : vector<8x8xf32> to vector<8xf32>
    %72 = vector.shape_cast %71 : vector<8xf32> to vector<8x1xf32>
    %73 = tpu.reciprocal %72 {approx = true} : vector<8x1xf32> -> vector<8x1xf32>
    %74 = vector.broadcast %73 : vector<8x1xf32> to vector<8x8xf32>
    %75 = arith.mulf %70, %74 : vector<8x8xf32>
    %cst_26 = arith.constant dense<0.000000e+00> : vector<8x8xf32>
    %76 = tpu.matmul %75, %58, %cst_26 {dimension_numbers = #tpu.dot_dimension_numbers<[1], [0], [0], [1], [0, 0, 1, 1], [], []>} : vector<8x8xf32>, vector<8x8xf32>, vector<8x8xf32> -> vector<8x8xf32>
    %77 = vector.extract_strided_slice %32 {offsets = [0, 16], sizes = [8, 8], strides = [1, 1]} : vector<8x32xf32> to vector<8x8xf32>
    %78 = vector.extract_strided_slice %33 {offsets = [0, 16], sizes = [8, 8], strides = [1, 1]} : vector<8x32xf32> to vector<8x8xf32>
    %79 = vector.extract_strided_slice %34 {offsets = [0, 16], sizes = [8, 8], strides = [1, 1]} : vector<8x32xf32> to vector<8x8xf32>
    %80 = tpu.transpose %78, [1, 0] : vector<8x8xf32> -> vector<8x8xf32>
    %cst_27 = arith.constant dense<0.000000e+00> : vector<8x8xf32>
    %81 = tpu.matmul %77, %80, %cst_27 {dimension_numbers = #tpu.dot_dimension_numbers<[1], [0], [0], [1], [0, 0, 1, 1], [], []>} : vector<8x8xf32>, vector<8x8xf32>, vector<8x8xf32> -> vector<8x8xf32>
    %cst_28 = arith.constant 0.353553385 : f32
    %82 = vector.broadcast %cst_28 : f32 to vector<8x8xf32>
    %83 = arith.mulf %81, %82 : vector<8x8xf32>
    %84 = vector.extract_strided_slice %1 {offsets = [0, 0, 0], sizes = [1, 8, 8], strides = [1, 1, 1]} : vector<2x8x8xf32> to vector<1x8x8xf32>
    %85 = vector.shape_cast %84 : vector<1x8x8xf32> to vector<8x8xf32>
    %86 = arith.addf %83, %85 : vector<8x8xf32>
    %cst_29 = arith.constant dense<0xFF800000> : vector<8xf32>
    %87 = vector.multi_reduction <maximumf>, %86, %cst_29 [1] : vector<8x8xf32> to vector<8xf32>
    %88 = vector.shape_cast %87 : vector<8xf32> to vector<8x1xf32>
    %89 = vector.broadcast %88 : vector<8x1xf32> to vector<8x8xf32>
    %90 = arith.subf %86, %89 : vector<8x8xf32>
    %91 = math.exp %90 : vector<8x8xf32>
    %cst_30 = arith.constant dense<0.000000e+00> : vector<8xf32>
    %92 = vector.multi_reduction <add>, %91, %cst_30 [1] : vector<8x8xf32> to vector<8xf32>
    %93 = vector.shape_cast %92 : vector<8xf32> to vector<8x1xf32>
    %94 = tpu.reciprocal %93 {approx = true} : vector<8x1xf32> -> vector<8x1xf32>
    %95 = vector.broadcast %94 : vector<8x1xf32> to vector<8x8xf32>
    %96 = arith.mulf %91, %95 : vector<8x8xf32>
    %cst_31 = arith.constant dense<0.000000e+00> : vector<8x8xf32>
    %97 = tpu.matmul %96, %79, %cst_31 {dimension_numbers = #tpu.dot_dimension_numbers<[1], [0], [0], [1], [0, 0, 1, 1], [], []>} : vector<8x8xf32>, vector<8x8xf32>, vector<8x8xf32> -> vector<8x8xf32>
    %98 = vector.extract_strided_slice %32 {offsets = [0, 24], sizes = [8, 8], strides = [1, 1]} : vector<8x32xf32> to vector<8x8xf32>
    %99 = vector.extract_strided_slice %33 {offsets = [0, 24], sizes = [8, 8], strides = [1, 1]} : vector<8x32xf32> to vector<8x8xf32>
    %100 = vector.extract_strided_slice %34 {offsets = [0, 24], sizes = [8, 8], strides = [1, 1]} : vector<8x32xf32> to vector<8x8xf32>
    %101 = tpu.transpose %99, [1, 0] : vector<8x8xf32> -> vector<8x8xf32>
    %cst_32 = arith.constant dense<0.000000e+00> : vector<8x8xf32>
    %102 = tpu.matmul %98, %101, %cst_32 {dimension_numbers = #tpu.dot_dimension_numbers<[1], [0], [0], [1], [0, 0, 1, 1], [], []>} : vector<8x8xf32>, vector<8x8xf32>, vector<8x8xf32> -> vector<8x8xf32>
    %cst_33 = arith.constant 0.353553385 : f32
    %103 = vector.broadcast %cst_33 : f32 to vector<8x8xf32>
    %104 = arith.mulf %102, %103 : vector<8x8xf32>
    %105 = vector.extract_strided_slice %1 {offsets = [0, 0, 0], sizes = [1, 8, 8], strides = [1, 1, 1]} : vector<2x8x8xf32> to vector<1x8x8xf32>
    %106 = vector.shape_cast %105 : vector<1x8x8xf32> to vector<8x8xf32>
    %107 = arith.addf %104, %106 : vector<8x8xf32>
    %cst_34 = arith.constant dense<0xFF800000> : vector<8xf32>
    %108 = vector.multi_reduction <maximumf>, %107, %cst_34 [1] : vector<8x8xf32> to vector<8xf32>
    %109 = vector.shape_cast %108 : vector<8xf32> to vector<8x1xf32>
    %110 = vector.broadcast %109 : vector<8x1xf32> to vector<8x8xf32>
    %111 = arith.subf %107, %110 : vector<8x8xf32>
    %112 = math.exp %111 : vector<8x8xf32>
    %cst_35 = arith.constant dense<0.000000e+00> : vector<8xf32>
    %113 = vector.multi_reduction <add>, %112, %cst_35 [1] : vector<8x8xf32> to vector<8xf32>
    %114 = vector.shape_cast %113 : vector<8xf32> to vector<8x1xf32>
    %115 = tpu.reciprocal %114 {approx = true} : vector<8x1xf32> -> vector<8x1xf32>
    %116 = vector.broadcast %115 : vector<8x1xf32> to vector<8x8xf32>
    %117 = arith.mulf %112, %116 : vector<8x8xf32>
    %cst_36 = arith.constant dense<0.000000e+00> : vector<8x8xf32>
    %118 = tpu.matmul %117, %100, %cst_36 {dimension_numbers = #tpu.dot_dimension_numbers<[1], [0], [0], [1], [0, 0, 1, 1], [], []>} : vector<8x8xf32>, vector<8x8xf32>, vector<8x8xf32> -> vector<8x8xf32>
    %119 = tpu.concatenate %55, %76, %97, %118 in 1 : vector<8x8xf32>, vector<8x8xf32>, vector<8x8xf32>, vector<8x8xf32> -> vector<8x32xf32>
    %120 = vector.extract_strided_slice %29 {offsets = [8, 0], sizes = [8, 32], strides = [1, 1]} : vector<16x32xf32> to vector<8x32xf32>
    %121 = vector.extract_strided_slice %30 {offsets = [8, 0], sizes = [8, 32], strides = [1, 1]} : vector<16x32xf32> to vector<8x32xf32>
    %122 = vector.extract_strided_slice %31 {offsets = [8, 0], sizes = [8, 32], strides = [1, 1]} : vector<16x32xf32> to vector<8x32xf32>
    %123 = vector.extract_strided_slice %120 {offsets = [0, 0], sizes = [8, 8], strides = [1, 1]} : vector<8x32xf32> to vector<8x8xf32>
    %124 = vector.extract_strided_slice %121 {offsets = [0, 0], sizes = [8, 8], strides = [1, 1]} : vector<8x32xf32> to vector<8x8xf32>
    %125 = vector.extract_strided_slice %122 {offsets = [0, 0], sizes = [8, 8], strides = [1, 1]} : vector<8x32xf32> to vector<8x8xf32>
    %126 = tpu.transpose %124, [1, 0] : vector<8x8xf32> -> vector<8x8xf32>
    %cst_37 = arith.constant dense<0.000000e+00> : vector<8x8xf32>
    %127 = tpu.matmul %123, %126, %cst_37 {dimension_numbers = #tpu.dot_dimension_numbers<[1], [0], [0], [1], [0, 0, 1, 1], [], []>} : vector<8x8xf32>, vector<8x8xf32>, vector<8x8xf32> -> vector<8x8xf32>
    %cst_38 = arith.constant 0.353553385 : f32
    %128 = vector.broadcast %cst_38 : f32 to vector<8x8xf32>
    %129 = arith.mulf %127, %128 : vector<8x8xf32>
    %130 = vector.extract_strided_slice %1 {offsets = [1, 0, 0], sizes = [1, 8, 8], strides = [1, 1, 1]} : vector<2x8x8xf32> to vector<1x8x8xf32>
    %131 = vector.shape_cast %130 : vector<1x8x8xf32> to vector<8x8xf32>
    %132 = arith.addf %129, %131 : vector<8x8xf32>
    %cst_39 = arith.constant dense<0xFF800000> : vector<8xf32>
    %133 = vector.multi_reduction <maximumf>, %132, %cst_39 [1] : vector<8x8xf32> to vector<8xf32>
    %134 = vector.shape_cast %133 : vector<8xf32> to vector<8x1xf32>
    %135 = vector.broadcast %134 : vector<8x1xf32> to vector<8x8xf32>
    %136 = arith.subf %132, %135 : vector<8x8xf32>
    %137 = math.exp %136 : vector<8x8xf32>
    %cst_40 = arith.constant dense<0.000000e+00> : vector<8xf32>
    %138 = vector.multi_reduction <add>, %137, %cst_40 [1] : vector<8x8xf32> to vector<8xf32>
    %139 = vector.shape_cast %138 : vector<8xf32> to vector<8x1xf32>
    %140 = tpu.reciprocal %139 {approx = true} : vector<8x1xf32> -> vector<8x1xf32>
    %141 = vector.broadcast %140 : vector<8x1xf32> to vector<8x8xf32>
    %142 = arith.mulf %137, %141 : vector<8x8xf32>
    %cst_41 = arith.constant dense<0.000000e+00> : vector<8x8xf32>
    %143 = tpu.matmul %142, %125, %cst_41 {dimension_numbers = #tpu.dot_dimension_numbers<[1], [0], [0], [1], [0, 0, 1, 1], [], []>} : vector<8x8xf32>, vector<8x8xf32>, vector<8x8xf32> -> vector<8x8xf32>
    %144 = vector.extract_strided_slice %120 {offsets = [0, 8], sizes = [8, 8], strides = [1, 1]} : vector<8x32xf32> to vector<8x8xf32>
    %145 = vector.extract_strided_slice %121 {offsets = [0, 8], sizes = [8, 8], strides = [1, 1]} : vector<8x32xf32> to vector<8x8xf32>
    %146 = vector.extract_strided_slice %122 {offsets = [0, 8], sizes = [8, 8], strides = [1, 1]} : vector<8x32xf32> to vector<8x8xf32>
    %147 = tpu.transpose %145, [1, 0] : vector<8x8xf32> -> vector<8x8xf32>
    %cst_42 = arith.constant dense<0.000000e+00> : vector<8x8xf32>
    %148 = tpu.matmul %144, %147, %cst_42 {dimension_numbers = #tpu.dot_dimension_numbers<[1], [0], [0], [1], [0, 0, 1, 1], [], []>} : vector<8x8xf32>, vector<8x8xf32>, vector<8x8xf32> -> vector<8x8xf32>
    %cst_43 = arith.constant 0.353553385 : f32
    %149 = vector.broadcast %cst_43 : f32 to vector<8x8xf32>
    %150 = arith.mulf %148, %149 : vector<8x8xf32>
    %151 = vector.extract_strided_slice %1 {offsets = [1, 0, 0], sizes = [1, 8, 8], strides = [1, 1, 1]} : vector<2x8x8xf32> to vector<1x8x8xf32>
    %152 = vector.shape_cast %151 : vector<1x8x8xf32> to vector<8x8xf32>
    %153 = arith.addf %150, %152 : vector<8x8xf32>
    %cst_44 = arith.constant dense<0xFF800000> : vector<8xf32>
    %154 = vector.multi_reduction <maximumf>, %153, %cst_44 [1] : vector<8x8xf32> to vector<8xf32>
    %155 = vector.shape_cast %154 : vector<8xf32> to vector<8x1xf32>
    %156 = vector.broadcast %155 : vector<8x1xf32> to vector<8x8xf32>
    %157 = arith.subf %153, %156 : vector<8x8xf32>
    %158 = math.exp %157 : vector<8x8xf32>
    %cst_45 = arith.constant dense<0.000000e+00> : vector<8xf32>
    %159 = vector.multi_reduction <add>, %158, %cst_45 [1] : vector<8x8xf32> to vector<8xf32>
    %160 = vector.shape_cast %159 : vector<8xf32> to vector<8x1xf32>
    %161 = tpu.reciprocal %160 {approx = true} : vector<8x1xf32> -> vector<8x1xf32>
    %162 = vector.broadcast %161 : vector<8x1xf32> to vector<8x8xf32>
    %163 = arith.mulf %158, %162 : vector<8x8xf32>
    %cst_46 = arith.constant dense<0.000000e+00> : vector<8x8xf32>
    %164 = tpu.matmul %163, %146, %cst_46 {dimension_numbers = #tpu.dot_dimension_numbers<[1], [0], [0], [1], [0, 0, 1, 1], [], []>} : vector<8x8xf32>, vector<8x8xf32>, vector<8x8xf32> -> vector<8x8xf32>
    %165 = vector.extract_strided_slice %120 {offsets = [0, 16], sizes = [8, 8], strides = [1, 1]} : vector<8x32xf32> to vector<8x8xf32>
    %166 = vector.extract_strided_slice %121 {offsets = [0, 16], sizes = [8, 8], strides = [1, 1]} : vector<8x32xf32> to vector<8x8xf32>
    %167 = vector.extract_strided_slice %122 {offsets = [0, 16], sizes = [8, 8], strides = [1, 1]} : vector<8x32xf32> to vector<8x8xf32>
    %168 = tpu.transpose %166, [1, 0] : vector<8x8xf32> -> vector<8x8xf32>
    %cst_47 = arith.constant dense<0.000000e+00> : vector<8x8xf32>
    %169 = tpu.matmul %165, %168, %cst_47 {dimension_numbers = #tpu.dot_dimension_numbers<[1], [0], [0], [1], [0, 0, 1, 1], [], []>} : vector<8x8xf32>, vector<8x8xf32>, vector<8x8xf32> -> vector<8x8xf32>
    %cst_48 = arith.constant 0.353553385 : f32
    %170 = vector.broadcast %cst_48 : f32 to vector<8x8xf32>
    %171 = arith.mulf %169, %170 : vector<8x8xf32>
    %172 = vector.extract_strided_slice %1 {offsets = [1, 0, 0], sizes = [1, 8, 8], strides = [1, 1, 1]} : vector<2x8x8xf32> to vector<1x8x8xf32>
    %173 = vector.shape_cast %172 : vector<1x8x8xf32> to vector<8x8xf32>
    %174 = arith.addf %171, %173 : vector<8x8xf32>
    %cst_49 = arith.constant dense<0xFF800000> : vector<8xf32>
    %175 = vector.multi_reduction <maximumf>, %174, %cst_49 [1] : vector<8x8xf32> to vector<8xf32>
    %176 = vector.shape_cast %175 : vector<8xf32> to vector<8x1xf32>
    %177 = vector.broadcast %176 : vector<8x1xf32> to vector<8x8xf32>
    %178 = arith.subf %174, %177 : vector<8x8xf32>
    %179 = math.exp %178 : vector<8x8xf32>
    %cst_50 = arith.constant dense<0.000000e+00> : vector<8xf32>
    %180 = vector.multi_reduction <add>, %179, %cst_50 [1] : vector<8x8xf32> to vector<8xf32>
    %181 = vector.shape_cast %180 : vector<8xf32> to vector<8x1xf32>
    %182 = tpu.reciprocal %181 {approx = true} : vector<8x1xf32> -> vector<8x1xf32>
    %183 = vector.broadcast %182 : vector<8x1xf32> to vector<8x8xf32>
    %184 = arith.mulf %179, %183 : vector<8x8xf32>
    %cst_51 = arith.constant dense<0.000000e+00> : vector<8x8xf32>
    %185 = tpu.matmul %184, %167, %cst_51 {dimension_numbers = #tpu.dot_dimension_numbers<[1], [0], [0], [1], [0, 0, 1, 1], [], []>} : vector<8x8xf32>, vector<8x8xf32>, vector<8x8xf32> -> vector<8x8xf32>
    %186 = vector.extract_strided_slice %120 {offsets = [0, 24], sizes = [8, 8], strides = [1, 1]} : vector<8x32xf32> to vector<8x8xf32>
    %187 = vector.extract_strided_slice %121 {offsets = [0, 24], sizes = [8, 8], strides = [1, 1]} : vector<8x32xf32> to vector<8x8xf32>
    %188 = vector.extract_strided_slice %122 {offsets = [0, 24], sizes = [8, 8], strides = [1, 1]} : vector<8x32xf32> to vector<8x8xf32>
    %189 = tpu.transpose %187, [1, 0] : vector<8x8xf32> -> vector<8x8xf32>
    %cst_52 = arith.constant dense<0.000000e+00> : vector<8x8xf32>
    %190 = tpu.matmul %186, %189, %cst_52 {dimension_numbers = #tpu.dot_dimension_numbers<[1], [0], [0], [1], [0, 0, 1, 1], [], []>} : vector<8x8xf32>, vector<8x8xf32>, vector<8x8xf32> -> vector<8x8xf32>
    %cst_53 = arith.constant 0.353553385 : f32
    %191 = vector.broadcast %cst_53 : f32 to vector<8x8xf32>
    %192 = arith.mulf %190, %191 : vector<8x8xf32>
    %193 = vector.extract_strided_slice %1 {offsets = [1, 0, 0], sizes = [1, 8, 8], strides = [1, 1, 1]} : vector<2x8x8xf32> to vector<1x8x8xf32>
    %194 = vector.shape_cast %193 : vector<1x8x8xf32> to vector<8x8xf32>
    %195 = arith.addf %192, %194 : vector<8x8xf32>
    %cst_54 = arith.constant dense<0xFF800000> : vector<8xf32>
    %196 = vector.multi_reduction <maximumf>, %195, %cst_54 [1] : vector<8x8xf32> to vector<8xf32>
    %197 = vector.shape_cast %196 : vector<8xf32> to vector<8x1xf32>
    %198 = vector.broadcast %197 : vector<8x1xf32> to vector<8x8xf32>
    %199 = arith.subf %195, %198 : vector<8x8xf32>
    %200 = math.exp %199 : vector<8x8xf32>
    %cst_55 = arith.constant dense<0.000000e+00> : vector<8xf32>
    %201 = vector.multi_reduction <add>, %200, %cst_55 [1] : vector<8x8xf32> to vector<8xf32>
    %202 = vector.shape_cast %201 : vector<8xf32> to vector<8x1xf32>
    %203 = tpu.reciprocal %202 {approx = true} : vector<8x1xf32> -> vector<8x1xf32>
    %204 = vector.broadcast %203 : vector<8x1xf32> to vector<8x8xf32>
    %205 = arith.mulf %200, %204 : vector<8x8xf32>
    %cst_56 = arith.constant dense<0.000000e+00> : vector<8x8xf32>
    %206 = tpu.matmul %205, %188, %cst_56 {dimension_numbers = #tpu.dot_dimension_numbers<[1], [0], [0], [1], [0, 0, 1, 1], [], []>} : vector<8x8xf32>, vector<8x8xf32>, vector<8x8xf32> -> vector<8x8xf32>
    %207 = tpu.concatenate %143, %164, %185, %206 in 1 : vector<8x8xf32>, vector<8x8xf32>, vector<8x8xf32>, vector<8x8xf32> -> vector<8x32xf32>
    %208 = tpu.concatenate %119, %207 in 0 : vector<8x32xf32>, vector<8x32xf32> -> vector<16x32xf32>
    %c0_57 = arith.constant 0 : index
    %c0_58 = arith.constant 0 : index
    %209 = vector.load %arg6[%c0_57, %c0_58] : memref<32x32xf32, #tpu.memory_space<vmem>>, vector<32x32xf32>
    %cst_59 = arith.constant dense<0.000000e+00> : vector<16x32xf32>
    %210 = tpu.matmul %208, %209, %cst_59 {dimension_numbers = #tpu.dot_dimension_numbers<[1], [0], [0], [1], [0, 0, 1, 1], [], []>} : vector<16x32xf32>, vector<32x32xf32>, vector<16x32xf32> -> vector<16x32xf32>
    %211 = arith.addf %210, %26 : vector<16x32xf32>
    %c0_60 = arith.constant 0 : index
    %c0_61 = arith.constant 0 : index
    %212 = vector.load %arg7[%c0_60, %c0_61] : memref<1x32xf32, #tpu.memory_space<vmem>>, vector<1x32xf32>
    %c0_62 = arith.constant 0 : index
    %c0_63 = arith.constant 0 : index
    %213 = vector.load %arg8[%c0_62, %c0_63] : memref<1x32xf32, #tpu.memory_space<vmem>>, vector<1x32xf32>
    %cst_64 = arith.constant dense<0.000000e+00> : vector<16xf32>
    %214 = vector.multi_reduction <add>, %211, %cst_64 [1] : vector<16x32xf32> to vector<16xf32>
    %215 = vector.shape_cast %214 : vector<16xf32> to vector<16x1xf32>
    %cst_65 = arith.constant 3.200000e+01 : f32
    %216 = vector.broadcast %cst_65 : f32 to vector<16x1xf32>
    %217 = arith.divf %215, %216 : vector<16x1xf32>
    %218 = vector.broadcast %217 : vector<16x1xf32> to vector<16x32xf32>
    %219 = arith.subf %211, %218 : vector<16x32xf32>
    %220 = arith.mulf %219, %219 : vector<16x32xf32>
    %cst_66 = arith.constant dense<0.000000e+00> : vector<16xf32>
    %221 = vector.multi_reduction <add>, %220, %cst_66 [1] : vector<16x32xf32> to vector<16xf32>
    %222 = vector.shape_cast %221 : vector<16xf32> to vector<16x1xf32>
    %cst_67 = arith.constant 3.200000e+01 : f32
    %223 = vector.broadcast %cst_67 : f32 to vector<16x1xf32>
    %224 = arith.divf %222, %223 : vector<16x1xf32>
    %225 = vector.broadcast %217 : vector<16x1xf32> to vector<16x32xf32>
    %226 = arith.subf %211, %225 : vector<16x32xf32>
    %cst_68 = arith.constant 9.99999997E-7 : f32
    %227 = vector.broadcast %cst_68 : f32 to vector<16x1xf32>
    %228 = arith.addf %224, %227 : vector<16x1xf32>
    %229 = math.rsqrt %228 : vector<16x1xf32>
    %230 = vector.broadcast %229 : vector<16x1xf32> to vector<16x32xf32>
    %231 = arith.mulf %226, %230 : vector<16x32xf32>
    %232 = vector.broadcast %212 : vector<1x32xf32> to vector<16x32xf32>
    %233 = arith.mulf %231, %232 : vector<16x32xf32>
    %234 = vector.broadcast %213 : vector<1x32xf32> to vector<16x32xf32>
    %235 = arith.addf %233, %234 : vector<16x32xf32>
    %c0_69 = arith.constant 0 : index
    %c0_70 = arith.constant 0 : index
    %236 = vector.load %arg9[%c0_69, %c0_70] : memref<32x32xf32, #tpu.memory_space<vmem>>, vector<32x32xf32>
    %cst_71 = arith.constant dense<0.000000e+00> : vector<16x32xf32>
    %237 = tpu.matmul %235, %236, %cst_71 {dimension_numbers = #tpu.dot_dimension_numbers<[1], [0], [0], [1], [0, 0, 1, 1], [], []>} : vector<16x32xf32>, vector<32x32xf32>, vector<16x32xf32> -> vector<16x32xf32>
    %c0_72 = arith.constant 0 : index
    %c0_73 = arith.constant 0 : index
    %238 = vector.load %arg10[%c0_72, %c0_73] : memref<32x64xf32, #tpu.memory_space<vmem>>, vector<32x64xf32>
    %cst_74 = arith.constant dense<0.000000e+00> : vector<32x64xf32>
    %239 = tpu.matmul %0, %238, %cst_74 {dimension_numbers = #tpu.dot_dimension_numbers<[1], [0], [0], [1], [0, 0, 1, 1], [], []>} : vector<32x32xf32>, vector<32x64xf32>, vector<32x64xf32> -> vector<32x64xf32>
    %240 = vector.extract_strided_slice %239 {offsets = [0, 0], sizes = [32, 32], strides = [1, 1]} : vector<32x64xf32> to vector<32x32xf32>
    %241 = vector.extract_strided_slice %239 {offsets = [0, 32], sizes = [32, 32], strides = [1, 1]} : vector<32x64xf32> to vector<32x32xf32>
    %242 = vector.extract_strided_slice %237 {offsets = [0, 0], sizes = [8, 32], strides = [1, 1]} : vector<16x32xf32> to vector<8x32xf32>
    %243 = vector.extract_strided_slice %240 {offsets = [0, 0], sizes = [16, 32], strides = [1, 1]} : vector<32x32xf32> to vector<16x32xf32>
    %244 = vector.extract_strided_slice %241 {offsets = [0, 0], sizes = [16, 32], strides = [1, 1]} : vector<32x32xf32> to vector<16x32xf32>
    %245 = vector.extract_strided_slice %242 {offsets = [0, 0], sizes = [8, 8], strides = [1, 1]} : vector<8x32xf32> to vector<8x8xf32>
    %246 = vector.extract_strided_slice %243 {offsets = [0, 0], sizes = [16, 8], strides = [1, 1]} : vector<16x32xf32> to vector<16x8xf32>
    %247 = vector.extract_strided_slice %244 {offsets = [0, 0], sizes = [16, 8], strides = [1, 1]} : vector<16x32xf32> to vector<16x8xf32>
    %248 = tpu.transpose %246, [1, 0] : vector<16x8xf32> -> vector<8x16xf32>
    %cst_75 = arith.constant dense<0.000000e+00> : vector<8x16xf32>
    %249 = tpu.matmul %245, %248, %cst_75 {dimension_numbers = #tpu.dot_dimension_numbers<[1], [0], [0], [1], [0, 0, 1, 1], [], []>} : vector<8x8xf32>, vector<8x16xf32>, vector<8x16xf32> -> vector<8x16xf32>
    %cst_76 = arith.constant 0.353553385 : f32
    %250 = vector.broadcast %cst_76 : f32 to vector<8x16xf32>
    %251 = arith.mulf %249, %250 : vector<8x16xf32>
    %cst_77 = arith.constant dense<0xFF800000> : vector<8xf32>
    %252 = vector.multi_reduction <maximumf>, %251, %cst_77 [1] : vector<8x16xf32> to vector<8xf32>
    %253 = vector.shape_cast %252 : vector<8xf32> to vector<8x1xf32>
    %254 = vector.broadcast %253 : vector<8x1xf32> to vector<8x16xf32>
    %255 = arith.subf %251, %254 : vector<8x16xf32>
    %256 = math.exp %255 : vector<8x16xf32>
    %cst_78 = arith.constant dense<0.000000e+00> : vector<8xf32>
    %257 = vector.multi_reduction <add>, %256, %cst_78 [1] : vector<8x16xf32> to vector<8xf32>
    %258 = vector.shape_cast %257 : vector<8xf32> to vector<8x1xf32>
    %259 = tpu.reciprocal %258 {approx = true} : vector<8x1xf32> -> vector<8x1xf32>
    %260 = vector.broadcast %259 : vector<8x1xf32> to vector<8x16xf32>
    %261 = arith.mulf %256, %260 : vector<8x16xf32>
    %cst_79 = arith.constant dense<0.000000e+00> : vector<8x8xf32>
    %262 = tpu.matmul %261, %247, %cst_79 {dimension_numbers = #tpu.dot_dimension_numbers<[1], [0], [0], [1], [0, 0, 1, 1], [], []>} : vector<8x16xf32>, vector<16x8xf32>, vector<8x8xf32> -> vector<8x8xf32>
    %263 = vector.extract_strided_slice %242 {offsets = [0, 8], sizes = [8, 8], strides = [1, 1]} : vector<8x32xf32> to vector<8x8xf32>
    %264 = vector.extract_strided_slice %243 {offsets = [0, 8], sizes = [16, 8], strides = [1, 1]} : vector<16x32xf32> to vector<16x8xf32>
    %265 = vector.extract_strided_slice %244 {offsets = [0, 8], sizes = [16, 8], strides = [1, 1]} : vector<16x32xf32> to vector<16x8xf32>
    %266 = tpu.transpose %264, [1, 0] : vector<16x8xf32> -> vector<8x16xf32>
    %cst_80 = arith.constant dense<0.000000e+00> : vector<8x16xf32>
    %267 = tpu.matmul %263, %266, %cst_80 {dimension_numbers = #tpu.dot_dimension_numbers<[1], [0], [0], [1], [0, 0, 1, 1], [], []>} : vector<8x8xf32>, vector<8x16xf32>, vector<8x16xf32> -> vector<8x16xf32>
    %cst_81 = arith.constant 0.353553385 : f32
    %268 = vector.broadcast %cst_81 : f32 to vector<8x16xf32>
    %269 = arith.mulf %267, %268 : vector<8x16xf32>
    %cst_82 = arith.constant dense<0xFF800000> : vector<8xf32>
    %270 = vector.multi_reduction <maximumf>, %269, %cst_82 [1] : vector<8x16xf32> to vector<8xf32>
    %271 = vector.shape_cast %270 : vector<8xf32> to vector<8x1xf32>
    %272 = vector.broadcast %271 : vector<8x1xf32> to vector<8x16xf32>
    %273 = arith.subf %269, %272 : vector<8x16xf32>
    %274 = math.exp %273 : vector<8x16xf32>
    %cst_83 = arith.constant dense<0.000000e+00> : vector<8xf32>
    %275 = vector.multi_reduction <add>, %274, %cst_83 [1] : vector<8x16xf32> to vector<8xf32>
    %276 = vector.shape_cast %275 : vector<8xf32> to vector<8x1xf32>
    %277 = tpu.reciprocal %276 {approx = true} : vector<8x1xf32> -> vector<8x1xf32>
    %278 = vector.broadcast %277 : vector<8x1xf32> to vector<8x16xf32>
    %279 = arith.mulf %274, %278 : vector<8x16xf32>
    %cst_84 = arith.constant dense<0.000000e+00> : vector<8x8xf32>
    %280 = tpu.matmul %279, %265, %cst_84 {dimension_numbers = #tpu.dot_dimension_numbers<[1], [0], [0], [1], [0, 0, 1, 1], [], []>} : vector<8x16xf32>, vector<16x8xf32>, vector<8x8xf32> -> vector<8x8xf32>
    %281 = vector.extract_strided_slice %242 {offsets = [0, 16], sizes = [8, 8], strides = [1, 1]} : vector<8x32xf32> to vector<8x8xf32>
    %282 = vector.extract_strided_slice %243 {offsets = [0, 16], sizes = [16, 8], strides = [1, 1]} : vector<16x32xf32> to vector<16x8xf32>
    %283 = vector.extract_strided_slice %244 {offsets = [0, 16], sizes = [16, 8], strides = [1, 1]} : vector<16x32xf32> to vector<16x8xf32>
    %284 = tpu.transpose %282, [1, 0] : vector<16x8xf32> -> vector<8x16xf32>
    %cst_85 = arith.constant dense<0.000000e+00> : vector<8x16xf32>
    %285 = tpu.matmul %281, %284, %cst_85 {dimension_numbers = #tpu.dot_dimension_numbers<[1], [0], [0], [1], [0, 0, 1, 1], [], []>} : vector<8x8xf32>, vector<8x16xf32>, vector<8x16xf32> -> vector<8x16xf32>
    %cst_86 = arith.constant 0.353553385 : f32
    %286 = vector.broadcast %cst_86 : f32 to vector<8x16xf32>
    %287 = arith.mulf %285, %286 : vector<8x16xf32>
    %cst_87 = arith.constant dense<0xFF800000> : vector<8xf32>
    %288 = vector.multi_reduction <maximumf>, %287, %cst_87 [1] : vector<8x16xf32> to vector<8xf32>
    %289 = vector.shape_cast %288 : vector<8xf32> to vector<8x1xf32>
    %290 = vector.broadcast %289 : vector<8x1xf32> to vector<8x16xf32>
    %291 = arith.subf %287, %290 : vector<8x16xf32>
    %292 = math.exp %291 : vector<8x16xf32>
    %cst_88 = arith.constant dense<0.000000e+00> : vector<8xf32>
    %293 = vector.multi_reduction <add>, %292, %cst_88 [1] : vector<8x16xf32> to vector<8xf32>
    %294 = vector.shape_cast %293 : vector<8xf32> to vector<8x1xf32>
    %295 = tpu.reciprocal %294 {approx = true} : vector<8x1xf32> -> vector<8x1xf32>
    %296 = vector.broadcast %295 : vector<8x1xf32> to vector<8x16xf32>
    %297 = arith.mulf %292, %296 : vector<8x16xf32>
    %cst_89 = arith.constant dense<0.000000e+00> : vector<8x8xf32>
    %298 = tpu.matmul %297, %283, %cst_89 {dimension_numbers = #tpu.dot_dimension_numbers<[1], [0], [0], [1], [0, 0, 1, 1], [], []>} : vector<8x16xf32>, vector<16x8xf32>, vector<8x8xf32> -> vector<8x8xf32>
    %299 = vector.extract_strided_slice %242 {offsets = [0, 24], sizes = [8, 8], strides = [1, 1]} : vector<8x32xf32> to vector<8x8xf32>
    %300 = vector.extract_strided_slice %243 {offsets = [0, 24], sizes = [16, 8], strides = [1, 1]} : vector<16x32xf32> to vector<16x8xf32>
    %301 = vector.extract_strided_slice %244 {offsets = [0, 24], sizes = [16, 8], strides = [1, 1]} : vector<16x32xf32> to vector<16x8xf32>
    %302 = tpu.transpose %300, [1, 0] : vector<16x8xf32> -> vector<8x16xf32>
    %cst_90 = arith.constant dense<0.000000e+00> : vector<8x16xf32>
    %303 = tpu.matmul %299, %302, %cst_90 {dimension_numbers = #tpu.dot_dimension_numbers<[1], [0], [0], [1], [0, 0, 1, 1], [], []>} : vector<8x8xf32>, vector<8x16xf32>, vector<8x16xf32> -> vector<8x16xf32>
    %cst_91 = arith.constant 0.353553385 : f32
    %304 = vector.broadcast %cst_91 : f32 to vector<8x16xf32>
    %305 = arith.mulf %303, %304 : vector<8x16xf32>
    %cst_92 = arith.constant dense<0xFF800000> : vector<8xf32>
    %306 = vector.multi_reduction <maximumf>, %305, %cst_92 [1] : vector<8x16xf32> to vector<8xf32>
    %307 = vector.shape_cast %306 : vector<8xf32> to vector<8x1xf32>
    %308 = vector.broadcast %307 : vector<8x1xf32> to vector<8x16xf32>
    %309 = arith.subf %305, %308 : vector<8x16xf32>
    %310 = math.exp %309 : vector<8x16xf32>
    %cst_93 = arith.constant dense<0.000000e+00> : vector<8xf32>
    %311 = vector.multi_reduction <add>, %310, %cst_93 [1] : vector<8x16xf32> to vector<8xf32>
    %312 = vector.shape_cast %311 : vector<8xf32> to vector<8x1xf32>
    %313 = tpu.reciprocal %312 {approx = true} : vector<8x1xf32> -> vector<8x1xf32>
    %314 = vector.broadcast %313 : vector<8x1xf32> to vector<8x16xf32>
    %315 = arith.mulf %310, %314 : vector<8x16xf32>
    %cst_94 = arith.constant dense<0.000000e+00> : vector<8x8xf32>
    %316 = tpu.matmul %315, %301, %cst_94 {dimension_numbers = #tpu.dot_dimension_numbers<[1], [0], [0], [1], [0, 0, 1, 1], [], []>} : vector<8x16xf32>, vector<16x8xf32>, vector<8x8xf32> -> vector<8x8xf32>
    %317 = tpu.concatenate %262, %280, %298, %316 in 1 : vector<8x8xf32>, vector<8x8xf32>, vector<8x8xf32>, vector<8x8xf32> -> vector<8x32xf32>
    %318 = vector.extract_strided_slice %237 {offsets = [8, 0], sizes = [8, 32], strides = [1, 1]} : vector<16x32xf32> to vector<8x32xf32>
    %319 = vector.extract_strided_slice %240 {offsets = [16, 0], sizes = [16, 32], strides = [1, 1]} : vector<32x32xf32> to vector<16x32xf32>
    %320 = vector.extract_strided_slice %241 {offsets = [16, 0], sizes = [16, 32], strides = [1, 1]} : vector<32x32xf32> to vector<16x32xf32>
    %321 = vector.extract_strided_slice %318 {offsets = [0, 0], sizes = [8, 8], strides = [1, 1]} : vector<8x32xf32> to vector<8x8xf32>
    %322 = vector.extract_strided_slice %319 {offsets = [0, 0], sizes = [16, 8], strides = [1, 1]} : vector<16x32xf32> to vector<16x8xf32>
    %323 = vector.extract_strided_slice %320 {offsets = [0, 0], sizes = [16, 8], strides = [1, 1]} : vector<16x32xf32> to vector<16x8xf32>
    %324 = tpu.transpose %322, [1, 0] : vector<16x8xf32> -> vector<8x16xf32>
    %cst_95 = arith.constant dense<0.000000e+00> : vector<8x16xf32>
    %325 = tpu.matmul %321, %324, %cst_95 {dimension_numbers = #tpu.dot_dimension_numbers<[1], [0], [0], [1], [0, 0, 1, 1], [], []>} : vector<8x8xf32>, vector<8x16xf32>, vector<8x16xf32> -> vector<8x16xf32>
    %cst_96 = arith.constant 0.353553385 : f32
    %326 = vector.broadcast %cst_96 : f32 to vector<8x16xf32>
    %327 = arith.mulf %325, %326 : vector<8x16xf32>
    %cst_97 = arith.constant dense<0xFF800000> : vector<8xf32>
    %328 = vector.multi_reduction <maximumf>, %327, %cst_97 [1] : vector<8x16xf32> to vector<8xf32>
    %329 = vector.shape_cast %328 : vector<8xf32> to vector<8x1xf32>
    %330 = vector.broadcast %329 : vector<8x1xf32> to vector<8x16xf32>
    %331 = arith.subf %327, %330 : vector<8x16xf32>
    %332 = math.exp %331 : vector<8x16xf32>
    %cst_98 = arith.constant dense<0.000000e+00> : vector<8xf32>
    %333 = vector.multi_reduction <add>, %332, %cst_98 [1] : vector<8x16xf32> to vector<8xf32>
    %334 = vector.shape_cast %333 : vector<8xf32> to vector<8x1xf32>
    %335 = tpu.reciprocal %334 {approx = true} : vector<8x1xf32> -> vector<8x1xf32>
    %336 = vector.broadcast %335 : vector<8x1xf32> to vector<8x16xf32>
    %337 = arith.mulf %332, %336 : vector<8x16xf32>
    %cst_99 = arith.constant dense<0.000000e+00> : vector<8x8xf32>
    %338 = tpu.matmul %337, %323, %cst_99 {dimension_numbers = #tpu.dot_dimension_numbers<[1], [0], [0], [1], [0, 0, 1, 1], [], []>} : vector<8x16xf32>, vector<16x8xf32>, vector<8x8xf32> -> vector<8x8xf32>
    %339 = vector.extract_strided_slice %318 {offsets = [0, 8], sizes = [8, 8], strides = [1, 1]} : vector<8x32xf32> to vector<8x8xf32>
    %340 = vector.extract_strided_slice %319 {offsets = [0, 8], sizes = [16, 8], strides = [1, 1]} : vector<16x32xf32> to vector<16x8xf32>
    %341 = vector.extract_strided_slice %320 {offsets = [0, 8], sizes = [16, 8], strides = [1, 1]} : vector<16x32xf32> to vector<16x8xf32>
    %342 = tpu.transpose %340, [1, 0] : vector<16x8xf32> -> vector<8x16xf32>
    %cst_100 = arith.constant dense<0.000000e+00> : vector<8x16xf32>
    %343 = tpu.matmul %339, %342, %cst_100 {dimension_numbers = #tpu.dot_dimension_numbers<[1], [0], [0], [1], [0, 0, 1, 1], [], []>} : vector<8x8xf32>, vector<8x16xf32>, vector<8x16xf32> -> vector<8x16xf32>
    %cst_101 = arith.constant 0.353553385 : f32
    %344 = vector.broadcast %cst_101 : f32 to vector<8x16xf32>
    %345 = arith.mulf %343, %344 : vector<8x16xf32>
    %cst_102 = arith.constant dense<0xFF800000> : vector<8xf32>
    %346 = vector.multi_reduction <maximumf>, %345, %cst_102 [1] : vector<8x16xf32> to vector<8xf32>
    %347 = vector.shape_cast %346 : vector<8xf32> to vector<8x1xf32>
    %348 = vector.broadcast %347 : vector<8x1xf32> to vector<8x16xf32>
    %349 = arith.subf %345, %348 : vector<8x16xf32>
    %350 = math.exp %349 : vector<8x16xf32>
    %cst_103 = arith.constant dense<0.000000e+00> : vector<8xf32>
    %351 = vector.multi_reduction <add>, %350, %cst_103 [1] : vector<8x16xf32> to vector<8xf32>
    %352 = vector.shape_cast %351 : vector<8xf32> to vector<8x1xf32>
    %353 = tpu.reciprocal %352 {approx = true} : vector<8x1xf32> -> vector<8x1xf32>
    %354 = vector.broadcast %353 : vector<8x1xf32> to vector<8x16xf32>
    %355 = arith.mulf %350, %354 : vector<8x16xf32>
    %cst_104 = arith.constant dense<0.000000e+00> : vector<8x8xf32>
    %356 = tpu.matmul %355, %341, %cst_104 {dimension_numbers = #tpu.dot_dimension_numbers<[1], [0], [0], [1], [0, 0, 1, 1], [], []>} : vector<8x16xf32>, vector<16x8xf32>, vector<8x8xf32> -> vector<8x8xf32>
    %357 = vector.extract_strided_slice %318 {offsets = [0, 16], sizes = [8, 8], strides = [1, 1]} : vector<8x32xf32> to vector<8x8xf32>
    %358 = vector.extract_strided_slice %319 {offsets = [0, 16], sizes = [16, 8], strides = [1, 1]} : vector<16x32xf32> to vector<16x8xf32>
    %359 = vector.extract_strided_slice %320 {offsets = [0, 16], sizes = [16, 8], strides = [1, 1]} : vector<16x32xf32> to vector<16x8xf32>
    %360 = tpu.transpose %358, [1, 0] : vector<16x8xf32> -> vector<8x16xf32>
    %cst_105 = arith.constant dense<0.000000e+00> : vector<8x16xf32>
    %361 = tpu.matmul %357, %360, %cst_105 {dimension_numbers = #tpu.dot_dimension_numbers<[1], [0], [0], [1], [0, 0, 1, 1], [], []>} : vector<8x8xf32>, vector<8x16xf32>, vector<8x16xf32> -> vector<8x16xf32>
    %cst_106 = arith.constant 0.353553385 : f32
    %362 = vector.broadcast %cst_106 : f32 to vector<8x16xf32>
    %363 = arith.mulf %361, %362 : vector<8x16xf32>
    %cst_107 = arith.constant dense<0xFF800000> : vector<8xf32>
    %364 = vector.multi_reduction <maximumf>, %363, %cst_107 [1] : vector<8x16xf32> to vector<8xf32>
    %365 = vector.shape_cast %364 : vector<8xf32> to vector<8x1xf32>
    %366 = vector.broadcast %365 : vector<8x1xf32> to vector<8x16xf32>
    %367 = arith.subf %363, %366 : vector<8x16xf32>
    %368 = math.exp %367 : vector<8x16xf32>
    %cst_108 = arith.constant dense<0.000000e+00> : vector<8xf32>
    %369 = vector.multi_reduction <add>, %368, %cst_108 [1] : vector<8x16xf32> to vector<8xf32>
    %370 = vector.shape_cast %369 : vector<8xf32> to vector<8x1xf32>
    %371 = tpu.reciprocal %370 {approx = true} : vector<8x1xf32> -> vector<8x1xf32>
    %372 = vector.broadcast %371 : vector<8x1xf32> to vector<8x16xf32>
    %373 = arith.mulf %368, %372 : vector<8x16xf32>
    %cst_109 = arith.constant dense<0.000000e+00> : vector<8x8xf32>
    %374 = tpu.matmul %373, %359, %cst_109 {dimension_numbers = #tpu.dot_dimension_numbers<[1], [0], [0], [1], [0, 0, 1, 1], [], []>} : vector<8x16xf32>, vector<16x8xf32>, vector<8x8xf32> -> vector<8x8xf32>
    %375 = vector.extract_strided_slice %318 {offsets = [0, 24], sizes = [8, 8], strides = [1, 1]} : vector<8x32xf32> to vector<8x8xf32>
    %376 = vector.extract_strided_slice %319 {offsets = [0, 24], sizes = [16, 8], strides = [1, 1]} : vector<16x32xf32> to vector<16x8xf32>
    %377 = vector.extract_strided_slice %320 {offsets = [0, 24], sizes = [16, 8], strides = [1, 1]} : vector<16x32xf32> to vector<16x8xf32>
    %378 = tpu.transpose %376, [1, 0] : vector<16x8xf32> -> vector<8x16xf32>
    %cst_110 = arith.constant dense<0.000000e+00> : vector<8x16xf32>
    %379 = tpu.matmul %375, %378, %cst_110 {dimension_numbers = #tpu.dot_dimension_numbers<[1], [0], [0], [1], [0, 0, 1, 1], [], []>} : vector<8x8xf32>, vector<8x16xf32>, vector<8x16xf32> -> vector<8x16xf32>
    %cst_111 = arith.constant 0.353553385 : f32
    %380 = vector.broadcast %cst_111 : f32 to vector<8x16xf32>
    %381 = arith.mulf %379, %380 : vector<8x16xf32>
    %cst_112 = arith.constant dense<0xFF800000> : vector<8xf32>
    %382 = vector.multi_reduction <maximumf>, %381, %cst_112 [1] : vector<8x16xf32> to vector<8xf32>
    %383 = vector.shape_cast %382 : vector<8xf32> to vector<8x1xf32>
    %384 = vector.broadcast %383 : vector<8x1xf32> to vector<8x16xf32>
    %385 = arith.subf %381, %384 : vector<8x16xf32>
    %386 = math.exp %385 : vector<8x16xf32>
    %cst_113 = arith.constant dense<0.000000e+00> : vector<8xf32>
    %387 = vector.multi_reduction <add>, %386, %cst_113 [1] : vector<8x16xf32> to vector<8xf32>
    %388 = vector.shape_cast %387 : vector<8xf32> to vector<8x1xf32>
    %389 = tpu.reciprocal %388 {approx = true} : vector<8x1xf32> -> vector<8x1xf32>
    %390 = vector.broadcast %389 : vector<8x1xf32> to vector<8x16xf32>
    %391 = arith.mulf %386, %390 : vector<8x16xf32>
    %cst_114 = arith.constant dense<0.000000e+00> : vector<8x8xf32>
    %392 = tpu.matmul %391, %377, %cst_114 {dimension_numbers = #tpu.dot_dimension_numbers<[1], [0], [0], [1], [0, 0, 1, 1], [], []>} : vector<8x16xf32>, vector<16x8xf32>, vector<8x8xf32> -> vector<8x8xf32>
    %393 = tpu.concatenate %338, %356, %374, %392 in 1 : vector<8x8xf32>, vector<8x8xf32>, vector<8x8xf32>, vector<8x8xf32> -> vector<8x32xf32>
    %394 = tpu.concatenate %317, %393 in 0 : vector<8x32xf32>, vector<8x32xf32> -> vector<16x32xf32>
    %c0_115 = arith.constant 0 : index
    %c0_116 = arith.constant 0 : index
    %395 = vector.load %arg11[%c0_115, %c0_116] : memref<32x32xf32, #tpu.memory_space<vmem>>, vector<32x32xf32>
    %cst_117 = arith.constant dense<0.000000e+00> : vector<16x32xf32>
    %396 = tpu.matmul %394, %395, %cst_117 {dimension_numbers = #tpu.dot_dimension_numbers<[1], [0], [0], [1], [0, 0, 1, 1], [], []>} : vector<16x32xf32>, vector<32x32xf32>, vector<16x32xf32> -> vector<16x32xf32>
    %397 = arith.addf %396, %235 : vector<16x32xf32>
    %c0_118 = arith.constant 0 : index
    %c0_119 = arith.constant 0 : index
    %398 = vector.load %arg12[%c0_118, %c0_119] : memref<1x32xf32, #tpu.memory_space<vmem>>, vector<1x32xf32>
    %c0_120 = arith.constant 0 : index
    %c0_121 = arith.constant 0 : index
    %399 = vector.load %arg13[%c0_120, %c0_121] : memref<1x32xf32, #tpu.memory_space<vmem>>, vector<1x32xf32>
    %cst_122 = arith.constant dense<0.000000e+00> : vector<16xf32>
    %400 = vector.multi_reduction <add>, %397, %cst_122 [1] : vector<16x32xf32> to vector<16xf32>
    %401 = vector.shape_cast %400 : vector<16xf32> to vector<16x1xf32>
    %cst_123 = arith.constant 3.200000e+01 : f32
    %402 = vector.broadcast %cst_123 : f32 to vector<16x1xf32>
    %403 = arith.divf %401, %402 : vector<16x1xf32>
    %404 = vector.broadcast %403 : vector<16x1xf32> to vector<16x32xf32>
    %405 = arith.subf %397, %404 : vector<16x32xf32>
    %406 = arith.mulf %405, %405 : vector<16x32xf32>
    %cst_124 = arith.constant dense<0.000000e+00> : vector<16xf32>
    %407 = vector.multi_reduction <add>, %406, %cst_124 [1] : vector<16x32xf32> to vector<16xf32>
    %408 = vector.shape_cast %407 : vector<16xf32> to vector<16x1xf32>
    %cst_125 = arith.constant 3.200000e+01 : f32
    %409 = vector.broadcast %cst_125 : f32 to vector<16x1xf32>
    %410 = arith.divf %408, %409 : vector<16x1xf32>
    %411 = vector.broadcast %403 : vector<16x1xf32> to vector<16x32xf32>
    %412 = arith.subf %397, %411 : vector<16x32xf32>
    %cst_126 = arith.constant 9.99999997E-7 : f32
    %413 = vector.broadcast %cst_126 : f32 to vector<16x1xf32>
    %414 = arith.addf %410, %413 : vector<16x1xf32>
    %415 = math.rsqrt %414 : vector<16x1xf32>
    %416 = vector.broadcast %415 : vector<16x1xf32> to vector<16x32xf32>
    %417 = arith.mulf %412, %416 : vector<16x32xf32>
    %418 = vector.broadcast %398 : vector<1x32xf32> to vector<16x32xf32>
    %419 = arith.mulf %417, %418 : vector<16x32xf32>
    %420 = vector.broadcast %399 : vector<1x32xf32> to vector<16x32xf32>
    %421 = arith.addf %419, %420 : vector<16x32xf32>
    %c0_127 = arith.constant 0 : index
    %c0_128 = arith.constant 0 : index
    %422 = vector.load %arg14[%c0_127, %c0_128] : memref<32x64xf32, #tpu.memory_space<vmem>>, vector<32x64xf32>
    %cst_129 = arith.constant dense<0.000000e+00> : vector<16x64xf32>
    %423 = tpu.matmul %421, %422, %cst_129 {dimension_numbers = #tpu.dot_dimension_numbers<[1], [0], [0], [1], [0, 0, 1, 1], [], []>} : vector<16x32xf32>, vector<32x64xf32>, vector<16x64xf32> -> vector<16x64xf32>
    %c0_130 = arith.constant 0 : index
    %c0_131 = arith.constant 0 : index
    %424 = vector.load %arg15[%c0_130, %c0_131] : memref<1x64xf32, #tpu.memory_space<vmem>>, vector<1x64xf32>
    %425 = vector.broadcast %424 : vector<1x64xf32> to vector<16x64xf32>
    %426 = arith.addf %423, %425 : vector<16x64xf32>
    %cst_132 = arith.constant 0.000000e+00 : f32
    %427 = vector.broadcast %cst_132 : f32 to vector<16x64xf32>
    %428 = arith.maximumf %426, %427 : vector<16x64xf32>
    %c0_133 = arith.constant 0 : index
    %c0_134 = arith.constant 0 : index
    %429 = vector.load %arg16[%c0_133, %c0_134] : memref<64x32xf32, #tpu.memory_space<vmem>>, vector<64x32xf32>
    %cst_135 = arith.constant dense<0.000000e+00> : vector<16x32xf32>
    %430 = tpu.matmul %428, %429, %cst_135 {dimension_numbers = #tpu.dot_dimension_numbers<[1], [0], [0], [1], [0, 0, 1, 1], [], []>} : vector<16x64xf32>, vector<64x32xf32>, vector<16x32xf32> -> vector<16x32xf32>
    %c0_136 = arith.constant 0 : index
    %c0_137 = arith.constant 0 : index
    %431 = vector.load %arg17[%c0_136, %c0_137] : memref<1x32xf32, #tpu.memory_space<vmem>>, vector<1x32xf32>
    %432 = vector.broadcast %431 : vector<1x32xf32> to vector<16x32xf32>
    %433 = arith.addf %430, %432 : vector<16x32xf32>
    %434 = arith.addf %433, %421 : vector<16x32xf32>
    %c0_138 = arith.constant 0 : index
    %c0_139 = arith.constant 0 : index
    %435 = vector.load %arg18[%c0_138, %c0_139] : memref<1x32xf32, #tpu.memory_space<vmem>>, vector<1x32xf32>
    %c0_140 = arith.constant 0 : index
    %c0_141 = arith.constant 0 : index
    %436 = vector.load %arg19[%c0_140, %c0_141] : memref<1x32xf32, #tpu.memory_space<vmem>>, vector<1x32xf32>
    %cst_142 = arith.constant dense<0.000000e+00> : vector<16xf32>
    %437 = vector.multi_reduction <add>, %434, %cst_142 [1] : vector<16x32xf32> to vector<16xf32>
    %438 = vector.shape_cast %437 : vector<16xf32> to vector<16x1xf32>
    %cst_143 = arith.constant 3.200000e+01 : f32
    %439 = vector.broadcast %cst_143 : f32 to vector<16x1xf32>
    %440 = arith.divf %438, %439 : vector<16x1xf32>
    %441 = vector.broadcast %440 : vector<16x1xf32> to vector<16x32xf32>
    %442 = arith.subf %434, %441 : vector<16x32xf32>
    %443 = arith.mulf %442, %442 : vector<16x32xf32>
    %cst_144 = arith.constant dense<0.000000e+00> : vector<16xf32>
    %444 = vector.multi_reduction <add>, %443, %cst_144 [1] : vector<16x32xf32> to vector<16xf32>
    %445 = vector.shape_cast %444 : vector<16xf32> to vector<16x1xf32>
    %cst_145 = arith.constant 3.200000e+01 : f32
    %446 = vector.broadcast %cst_145 : f32 to vector<16x1xf32>
    %447 = arith.divf %445, %446 : vector<16x1xf32>
    %448 = vector.broadcast %440 : vector<16x1xf32> to vector<16x32xf32>
    %449 = arith.subf %434, %448 : vector<16x32xf32>
    %cst_146 = arith.constant 9.99999997E-7 : f32
    %450 = vector.broadcast %cst_146 : f32 to vector<16x1xf32>
    %451 = arith.addf %447, %450 : vector<16x1xf32>
    %452 = math.rsqrt %451 : vector<16x1xf32>
    %453 = vector.broadcast %452 : vector<16x1xf32> to vector<16x32xf32>
    %454 = arith.mulf %449, %453 : vector<16x32xf32>
    %455 = vector.broadcast %435 : vector<1x32xf32> to vector<16x32xf32>
    %456 = arith.mulf %454, %455 : vector<16x32xf32>
    %457 = vector.broadcast %436 : vector<1x32xf32> to vector<16x32xf32>
    %458 = arith.addf %456, %457 : vector<16x32xf32>
    %c0_147 = arith.constant 0 : index
    %c0_148 = arith.constant 0 : index
    %459 = vector.load %arg20[%c0_147, %c0_148] : memref<32x96xf32, #tpu.memory_space<vmem>>, vector<32x96xf32>
    %cst_149 = arith.constant dense<0.000000e+00> : vector<16x96xf32>
    %460 = tpu.matmul %458, %459, %cst_149 {dimension_numbers = #tpu.dot_dimension_numbers<[1], [0], [0], [1], [0, 0, 1, 1], [], []>} : vector<16x32xf32>, vector<32x96xf32>, vector<16x96xf32> -> vector<16x96xf32>
    %461 = vector.extract_strided_slice %460 {offsets = [0, 0], sizes = [16, 32], strides = [1, 1]} : vector<16x96xf32> to vector<16x32xf32>
    %462 = vector.extract_strided_slice %460 {offsets = [0, 32], sizes = [16, 32], strides = [1, 1]} : vector<16x96xf32> to vector<16x32xf32>
    %463 = vector.extract_strided_slice %460 {offsets = [0, 64], sizes = [16, 32], strides = [1, 1]} : vector<16x96xf32> to vector<16x32xf32>
    %464 = vector.extract_strided_slice %461 {offsets = [0, 0], sizes = [8, 32], strides = [1, 1]} : vector<16x32xf32> to vector<8x32xf32>
    %465 = vector.extract_strided_slice %462 {offsets = [0, 0], sizes = [8, 32], strides = [1, 1]} : vector<16x32xf32> to vector<8x32xf32>
    %466 = vector.extract_strided_slice %463 {offsets = [0, 0], sizes = [8, 32], strides = [1, 1]} : vector<16x32xf32> to vector<8x32xf32>
    %467 = vector.extract_strided_slice %464 {offsets = [0, 0], sizes = [8, 8], strides = [1, 1]} : vector<8x32xf32> to vector<8x8xf32>
    %468 = vector.extract_strided_slice %465 {offsets = [0, 0], sizes = [8, 8], strides = [1, 1]} : vector<8x32xf32> to vector<8x8xf32>
    %469 = vector.extract_strided_slice %466 {offsets = [0, 0], sizes = [8, 8], strides = [1, 1]} : vector<8x32xf32> to vector<8x8xf32>
    %470 = tpu.transpose %468, [1, 0] : vector<8x8xf32> -> vector<8x8xf32>
    %cst_150 = arith.constant dense<0.000000e+00> : vector<8x8xf32>
    %471 = tpu.matmul %467, %470, %cst_150 {dimension_numbers = #tpu.dot_dimension_numbers<[1], [0], [0], [1], [0, 0, 1, 1], [], []>} : vector<8x8xf32>, vector<8x8xf32>, vector<8x8xf32> -> vector<8x8xf32>
    %cst_151 = arith.constant 0.353553385 : f32
    %472 = vector.broadcast %cst_151 : f32 to vector<8x8xf32>
    %473 = arith.mulf %471, %472 : vector<8x8xf32>
    %474 = vector.extract_strided_slice %1 {offsets = [0, 0, 0], sizes = [1, 8, 8], strides = [1, 1, 1]} : vector<2x8x8xf32> to vector<1x8x8xf32>
    %475 = vector.shape_cast %474 : vector<1x8x8xf32> to vector<8x8xf32>
    %476 = arith.addf %473, %475 : vector<8x8xf32>
    %cst_152 = arith.constant dense<0xFF800000> : vector<8xf32>
    %477 = vector.multi_reduction <maximumf>, %476, %cst_152 [1] : vector<8x8xf32> to vector<8xf32>
    %478 = vector.shape_cast %477 : vector<8xf32> to vector<8x1xf32>
    %479 = vector.broadcast %478 : vector<8x1xf32> to vector<8x8xf32>
    %480 = arith.subf %476, %479 : vector<8x8xf32>
    %481 = math.exp %480 : vector<8x8xf32>
    %cst_153 = arith.constant dense<0.000000e+00> : vector<8xf32>
    %482 = vector.multi_reduction <add>, %481, %cst_153 [1] : vector<8x8xf32> to vector<8xf32>
    %483 = vector.shape_cast %482 : vector<8xf32> to vector<8x1xf32>
    %484 = tpu.reciprocal %483 {approx = true} : vector<8x1xf32> -> vector<8x1xf32>
    %485 = vector.broadcast %484 : vector<8x1xf32> to vector<8x8xf32>
    %486 = arith.mulf %481, %485 : vector<8x8xf32>
    %cst_154 = arith.constant dense<0.000000e+00> : vector<8x8xf32>
    %487 = tpu.matmul %486, %469, %cst_154 {dimension_numbers = #tpu.dot_dimension_numbers<[1], [0], [0], [1], [0, 0, 1, 1], [], []>} : vector<8x8xf32>, vector<8x8xf32>, vector<8x8xf32> -> vector<8x8xf32>
    %488 = vector.extract_strided_slice %464 {offsets = [0, 8], sizes = [8, 8], strides = [1, 1]} : vector<8x32xf32> to vector<8x8xf32>
    %489 = vector.extract_strided_slice %465 {offsets = [0, 8], sizes = [8, 8], strides = [1, 1]} : vector<8x32xf32> to vector<8x8xf32>
    %490 = vector.extract_strided_slice %466 {offsets = [0, 8], sizes = [8, 8], strides = [1, 1]} : vector<8x32xf32> to vector<8x8xf32>
    %491 = tpu.transpose %489, [1, 0] : vector<8x8xf32> -> vector<8x8xf32>
    %cst_155 = arith.constant dense<0.000000e+00> : vector<8x8xf32>
    %492 = tpu.matmul %488, %491, %cst_155 {dimension_numbers = #tpu.dot_dimension_numbers<[1], [0], [0], [1], [0, 0, 1, 1], [], []>} : vector<8x8xf32>, vector<8x8xf32>, vector<8x8xf32> -> vector<8x8xf32>
    %cst_156 = arith.constant 0.353553385 : f32
    %493 = vector.broadcast %cst_156 : f32 to vector<8x8xf32>
    %494 = arith.mulf %492, %493 : vector<8x8xf32>
    %495 = vector.extract_strided_slice %1 {offsets = [0, 0, 0], sizes = [1, 8, 8], strides = [1, 1, 1]} : vector<2x8x8xf32> to vector<1x8x8xf32>
    %496 = vector.shape_cast %495 : vector<1x8x8xf32> to vector<8x8xf32>
    %497 = arith.addf %494, %496 : vector<8x8xf32>
    %cst_157 = arith.constant dense<0xFF800000> : vector<8xf32>
    %498 = vector.multi_reduction <maximumf>, %497, %cst_157 [1] : vector<8x8xf32> to vector<8xf32>
    %499 = vector.shape_cast %498 : vector<8xf32> to vector<8x1xf32>
    %500 = vector.broadcast %499 : vector<8x1xf32> to vector<8x8xf32>
    %501 = arith.subf %497, %500 : vector<8x8xf32>
    %502 = math.exp %501 : vector<8x8xf32>
    %cst_158 = arith.constant dense<0.000000e+00> : vector<8xf32>
    %503 = vector.multi_reduction <add>, %502, %cst_158 [1] : vector<8x8xf32> to vector<8xf32>
    %504 = vector.shape_cast %503 : vector<8xf32> to vector<8x1xf32>
    %505 = tpu.reciprocal %504 {approx = true} : vector<8x1xf32> -> vector<8x1xf32>
    %506 = vector.broadcast %505 : vector<8x1xf32> to vector<8x8xf32>
    %507 = arith.mulf %502, %506 : vector<8x8xf32>
    %cst_159 = arith.constant dense<0.000000e+00> : vector<8x8xf32>
    %508 = tpu.matmul %507, %490, %cst_159 {dimension_numbers = #tpu.dot_dimension_numbers<[1], [0], [0], [1], [0, 0, 1, 1], [], []>} : vector<8x8xf32>, vector<8x8xf32>, vector<8x8xf32> -> vector<8x8xf32>
    %509 = vector.extract_strided_slice %464 {offsets = [0, 16], sizes = [8, 8], strides = [1, 1]} : vector<8x32xf32> to vector<8x8xf32>
    %510 = vector.extract_strided_slice %465 {offsets = [0, 16], sizes = [8, 8], strides = [1, 1]} : vector<8x32xf32> to vector<8x8xf32>
    %511 = vector.extract_strided_slice %466 {offsets = [0, 16], sizes = [8, 8], strides = [1, 1]} : vector<8x32xf32> to vector<8x8xf32>
    %512 = tpu.transpose %510, [1, 0] : vector<8x8xf32> -> vector<8x8xf32>
    %cst_160 = arith.constant dense<0.000000e+00> : vector<8x8xf32>
    %513 = tpu.matmul %509, %512, %cst_160 {dimension_numbers = #tpu.dot_dimension_numbers<[1], [0], [0], [1], [0, 0, 1, 1], [], []>} : vector<8x8xf32>, vector<8x8xf32>, vector<8x8xf32> -> vector<8x8xf32>
    %cst_161 = arith.constant 0.353553385 : f32
    %514 = vector.broadcast %cst_161 : f32 to vector<8x8xf32>
    %515 = arith.mulf %513, %514 : vector<8x8xf32>
    %516 = vector.extract_strided_slice %1 {offsets = [0, 0, 0], sizes = [1, 8, 8], strides = [1, 1, 1]} : vector<2x8x8xf32> to vector<1x8x8xf32>
    %517 = vector.shape_cast %516 : vector<1x8x8xf32> to vector<8x8xf32>
    %518 = arith.addf %515, %517 : vector<8x8xf32>
    %cst_162 = arith.constant dense<0xFF800000> : vector<8xf32>
    %519 = vector.multi_reduction <maximumf>, %518, %cst_162 [1] : vector<8x8xf32> to vector<8xf32>
    %520 = vector.shape_cast %519 : vector<8xf32> to vector<8x1xf32>
    %521 = vector.broadcast %520 : vector<8x1xf32> to vector<8x8xf32>
    %522 = arith.subf %518, %521 : vector<8x8xf32>
    %523 = math.exp %522 : vector<8x8xf32>
    %cst_163 = arith.constant dense<0.000000e+00> : vector<8xf32>
    %524 = vector.multi_reduction <add>, %523, %cst_163 [1] : vector<8x8xf32> to vector<8xf32>
    %525 = vector.shape_cast %524 : vector<8xf32> to vector<8x1xf32>
    %526 = tpu.reciprocal %525 {approx = true} : vector<8x1xf32> -> vector<8x1xf32>
    %527 = vector.broadcast %526 : vector<8x1xf32> to vector<8x8xf32>
    %528 = arith.mulf %523, %527 : vector<8x8xf32>
    %cst_164 = arith.constant dense<0.000000e+00> : vector<8x8xf32>
    %529 = tpu.matmul %528, %511, %cst_164 {dimension_numbers = #tpu.dot_dimension_numbers<[1], [0], [0], [1], [0, 0, 1, 1], [], []>} : vector<8x8xf32>, vector<8x8xf32>, vector<8x8xf32> -> vector<8x8xf32>
    %530 = vector.extract_strided_slice %464 {offsets = [0, 24], sizes = [8, 8], strides = [1, 1]} : vector<8x32xf32> to vector<8x8xf32>
    %531 = vector.extract_strided_slice %465 {offsets = [0, 24], sizes = [8, 8], strides = [1, 1]} : vector<8x32xf32> to vector<8x8xf32>
    %532 = vector.extract_strided_slice %466 {offsets = [0, 24], sizes = [8, 8], strides = [1, 1]} : vector<8x32xf32> to vector<8x8xf32>
    %533 = tpu.transpose %531, [1, 0] : vector<8x8xf32> -> vector<8x8xf32>
    %cst_165 = arith.constant dense<0.000000e+00> : vector<8x8xf32>
    %534 = tpu.matmul %530, %533, %cst_165 {dimension_numbers = #tpu.dot_dimension_numbers<[1], [0], [0], [1], [0, 0, 1, 1], [], []>} : vector<8x8xf32>, vector<8x8xf32>, vector<8x8xf32> -> vector<8x8xf32>
    %cst_166 = arith.constant 0.353553385 : f32
    %535 = vector.broadcast %cst_166 : f32 to vector<8x8xf32>
    %536 = arith.mulf %534, %535 : vector<8x8xf32>
    %537 = vector.extract_strided_slice %1 {offsets = [0, 0, 0], sizes = [1, 8, 8], strides = [1, 1, 1]} : vector<2x8x8xf32> to vector<1x8x8xf32>
    %538 = vector.shape_cast %537 : vector<1x8x8xf32> to vector<8x8xf32>
    %539 = arith.addf %536, %538 : vector<8x8xf32>
    %cst_167 = arith.constant dense<0xFF800000> : vector<8xf32>
    %540 = vector.multi_reduction <maximumf>, %539, %cst_167 [1] : vector<8x8xf32> to vector<8xf32>
    %541 = vector.shape_cast %540 : vector<8xf32> to vector<8x1xf32>
    %542 = vector.broadcast %541 : vector<8x1xf32> to vector<8x8xf32>
    %543 = arith.subf %539, %542 : vector<8x8xf32>
    %544 = math.exp %543 : vector<8x8xf32>
    %cst_168 = arith.constant dense<0.000000e+00> : vector<8xf32>
    %545 = vector.multi_reduction <add>, %544, %cst_168 [1] : vector<8x8xf32> to vector<8xf32>
    %546 = vector.shape_cast %545 : vector<8xf32> to vector<8x1xf32>
    %547 = tpu.reciprocal %546 {approx = true} : vector<8x1xf32> -> vector<8x1xf32>
    %548 = vector.broadcast %547 : vector<8x1xf32> to vector<8x8xf32>
    %549 = arith.mulf %544, %548 : vector<8x8xf32>
    %cst_169 = arith.constant dense<0.000000e+00> : vector<8x8xf32>
    %550 = tpu.matmul %549, %532, %cst_169 {dimension_numbers = #tpu.dot_dimension_numbers<[1], [0], [0], [1], [0, 0, 1, 1], [], []>} : vector<8x8xf32>, vector<8x8xf32>, vector<8x8xf32> -> vector<8x8xf32>
    %551 = tpu.concatenate %487, %508, %529, %550 in 1 : vector<8x8xf32>, vector<8x8xf32>, vector<8x8xf32>, vector<8x8xf32> -> vector<8x32xf32>
    %552 = vector.extract_strided_slice %461 {offsets = [8, 0], sizes = [8, 32], strides = [1, 1]} : vector<16x32xf32> to vector<8x32xf32>
    %553 = vector.extract_strided_slice %462 {offsets = [8, 0], sizes = [8, 32], strides = [1, 1]} : vector<16x32xf32> to vector<8x32xf32>
    %554 = vector.extract_strided_slice %463 {offsets = [8, 0], sizes = [8, 32], strides = [1, 1]} : vector<16x32xf32> to vector<8x32xf32>
    %555 = vector.extract_strided_slice %552 {offsets = [0, 0], sizes = [8, 8], strides = [1, 1]} : vector<8x32xf32> to vector<8x8xf32>
    %556 = vector.extract_strided_slice %553 {offsets = [0, 0], sizes = [8, 8], strides = [1, 1]} : vector<8x32xf32> to vector<8x8xf32>
    %557 = vector.extract_strided_slice %554 {offsets = [0, 0], sizes = [8, 8], strides = [1, 1]} : vector<8x32xf32> to vector<8x8xf32>
    %558 = tpu.transpose %556, [1, 0] : vector<8x8xf32> -> vector<8x8xf32>
    %cst_170 = arith.constant dense<0.000000e+00> : vector<8x8xf32>
    %559 = tpu.matmul %555, %558, %cst_170 {dimension_numbers = #tpu.dot_dimension_numbers<[1], [0], [0], [1], [0, 0, 1, 1], [], []>} : vector<8x8xf32>, vector<8x8xf32>, vector<8x8xf32> -> vector<8x8xf32>
    %cst_171 = arith.constant 0.353553385 : f32
    %560 = vector.broadcast %cst_171 : f32 to vector<8x8xf32>
    %561 = arith.mulf %559, %560 : vector<8x8xf32>
    %562 = vector.extract_strided_slice %1 {offsets = [1, 0, 0], sizes = [1, 8, 8], strides = [1, 1, 1]} : vector<2x8x8xf32> to vector<1x8x8xf32>
    %563 = vector.shape_cast %562 : vector<1x8x8xf32> to vector<8x8xf32>
    %564 = arith.addf %561, %563 : vector<8x8xf32>
    %cst_172 = arith.constant dense<0xFF800000> : vector<8xf32>
    %565 = vector.multi_reduction <maximumf>, %564, %cst_172 [1] : vector<8x8xf32> to vector<8xf32>
    %566 = vector.shape_cast %565 : vector<8xf32> to vector<8x1xf32>
    %567 = vector.broadcast %566 : vector<8x1xf32> to vector<8x8xf32>
    %568 = arith.subf %564, %567 : vector<8x8xf32>
    %569 = math.exp %568 : vector<8x8xf32>
    %cst_173 = arith.constant dense<0.000000e+00> : vector<8xf32>
    %570 = vector.multi_reduction <add>, %569, %cst_173 [1] : vector<8x8xf32> to vector<8xf32>
    %571 = vector.shape_cast %570 : vector<8xf32> to vector<8x1xf32>
    %572 = tpu.reciprocal %571 {approx = true} : vector<8x1xf32> -> vector<8x1xf32>
    %573 = vector.broadcast %572 : vector<8x1xf32> to vector<8x8xf32>
    %574 = arith.mulf %569, %573 : vector<8x8xf32>
    %cst_174 = arith.constant dense<0.000000e+00> : vector<8x8xf32>
    %575 = tpu.matmul %574, %557, %cst_174 {dimension_numbers = #tpu.dot_dimension_numbers<[1], [0], [0], [1], [0, 0, 1, 1], [], []>} : vector<8x8xf32>, vector<8x8xf32>, vector<8x8xf32> -> vector<8x8xf32>
    %576 = vector.extract_strided_slice %552 {offsets = [0, 8], sizes = [8, 8], strides = [1, 1]} : vector<8x32xf32> to vector<8x8xf32>
    %577 = vector.extract_strided_slice %553 {offsets = [0, 8], sizes = [8, 8], strides = [1, 1]} : vector<8x32xf32> to vector<8x8xf32>
    %578 = vector.extract_strided_slice %554 {offsets = [0, 8], sizes = [8, 8], strides = [1, 1]} : vector<8x32xf32> to vector<8x8xf32>
    %579 = tpu.transpose %577, [1, 0] : vector<8x8xf32> -> vector<8x8xf32>
    %cst_175 = arith.constant dense<0.000000e+00> : vector<8x8xf32>
    %580 = tpu.matmul %576, %579, %cst_175 {dimension_numbers = #tpu.dot_dimension_numbers<[1], [0], [0], [1], [0, 0, 1, 1], [], []>} : vector<8x8xf32>, vector<8x8xf32>, vector<8x8xf32> -> vector<8x8xf32>
    %cst_176 = arith.constant 0.353553385 : f32
    %581 = vector.broadcast %cst_176 : f32 to vector<8x8xf32>
    %582 = arith.mulf %580, %581 : vector<8x8xf32>
    %583 = vector.extract_strided_slice %1 {offsets = [1, 0, 0], sizes = [1, 8, 8], strides = [1, 1, 1]} : vector<2x8x8xf32> to vector<1x8x8xf32>
    %584 = vector.shape_cast %583 : vector<1x8x8xf32> to vector<8x8xf32>
    %585 = arith.addf %582, %584 : vector<8x8xf32>
    %cst_177 = arith.constant dense<0xFF800000> : vector<8xf32>
    %586 = vector.multi_reduction <maximumf>, %585, %cst_177 [1] : vector<8x8xf32> to vector<8xf32>
    %587 = vector.shape_cast %586 : vector<8xf32> to vector<8x1xf32>
    %588 = vector.broadcast %587 : vector<8x1xf32> to vector<8x8xf32>
    %589 = arith.subf %585, %588 : vector<8x8xf32>
    %590 = math.exp %589 : vector<8x8xf32>
    %cst_178 = arith.constant dense<0.000000e+00> : vector<8xf32>
    %591 = vector.multi_reduction <add>, %590, %cst_178 [1] : vector<8x8xf32> to vector<8xf32>
    %592 = vector.shape_cast %591 : vector<8xf32> to vector<8x1xf32>
    %593 = tpu.reciprocal %592 {approx = true} : vector<8x1xf32> -> vector<8x1xf32>
    %594 = vector.broadcast %593 : vector<8x1xf32> to vector<8x8xf32>
    %595 = arith.mulf %590, %594 : vector<8x8xf32>
    %cst_179 = arith.constant dense<0.000000e+00> : vector<8x8xf32>
    %596 = tpu.matmul %595, %578, %cst_179 {dimension_numbers = #tpu.dot_dimension_numbers<[1], [0], [0], [1], [0, 0, 1, 1], [], []>} : vector<8x8xf32>, vector<8x8xf32>, vector<8x8xf32> -> vector<8x8xf32>
    %597 = vector.extract_strided_slice %552 {offsets = [0, 16], sizes = [8, 8], strides = [1, 1]} : vector<8x32xf32> to vector<8x8xf32>
    %598 = vector.extract_strided_slice %553 {offsets = [0, 16], sizes = [8, 8], strides = [1, 1]} : vector<8x32xf32> to vector<8x8xf32>
    %599 = vector.extract_strided_slice %554 {offsets = [0, 16], sizes = [8, 8], strides = [1, 1]} : vector<8x32xf32> to vector<8x8xf32>
    %600 = tpu.transpose %598, [1, 0] : vector<8x8xf32> -> vector<8x8xf32>
    %cst_180 = arith.constant dense<0.000000e+00> : vector<8x8xf32>
    %601 = tpu.matmul %597, %600, %cst_180 {dimension_numbers = #tpu.dot_dimension_numbers<[1], [0], [0], [1], [0, 0, 1, 1], [], []>} : vector<8x8xf32>, vector<8x8xf32>, vector<8x8xf32> -> vector<8x8xf32>
    %cst_181 = arith.constant 0.353553385 : f32
    %602 = vector.broadcast %cst_181 : f32 to vector<8x8xf32>
    %603 = arith.mulf %601, %602 : vector<8x8xf32>
    %604 = vector.extract_strided_slice %1 {offsets = [1, 0, 0], sizes = [1, 8, 8], strides = [1, 1, 1]} : vector<2x8x8xf32> to vector<1x8x8xf32>
    %605 = vector.shape_cast %604 : vector<1x8x8xf32> to vector<8x8xf32>
    %606 = arith.addf %603, %605 : vector<8x8xf32>
    %cst_182 = arith.constant dense<0xFF800000> : vector<8xf32>
    %607 = vector.multi_reduction <maximumf>, %606, %cst_182 [1] : vector<8x8xf32> to vector<8xf32>
    %608 = vector.shape_cast %607 : vector<8xf32> to vector<8x1xf32>
    %609 = vector.broadcast %608 : vector<8x1xf32> to vector<8x8xf32>
    %610 = arith.subf %606, %609 : vector<8x8xf32>
    %611 = math.exp %610 : vector<8x8xf32>
    %cst_183 = arith.constant dense<0.000000e+00> : vector<8xf32>
    %612 = vector.multi_reduction <add>, %611, %cst_183 [1] : vector<8x8xf32> to vector<8xf32>
    %613 = vector.shape_cast %612 : vector<8xf32> to vector<8x1xf32>
    %614 = tpu.reciprocal %613 {approx = true} : vector<8x1xf32> -> vector<8x1xf32>
    %615 = vector.broadcast %614 : vector<8x1xf32> to vector<8x8xf32>
    %616 = arith.mulf %611, %615 : vector<8x8xf32>
    %cst_184 = arith.constant dense<0.000000e+00> : vector<8x8xf32>
    %617 = tpu.matmul %616, %599, %cst_184 {dimension_numbers = #tpu.dot_dimension_numbers<[1], [0], [0], [1], [0, 0, 1, 1], [], []>} : vector<8x8xf32>, vector<8x8xf32>, vector<8x8xf32> -> vector<8x8xf32>
    %618 = vector.extract_strided_slice %552 {offsets = [0, 24], sizes = [8, 8], strides = [1, 1]} : vector<8x32xf32> to vector<8x8xf32>
    %619 = vector.extract_strided_slice %553 {offsets = [0, 24], sizes = [8, 8], strides = [1, 1]} : vector<8x32xf32> to vector<8x8xf32>
    %620 = vector.extract_strided_slice %554 {offsets = [0, 24], sizes = [8, 8], strides = [1, 1]} : vector<8x32xf32> to vector<8x8xf32>
    %621 = tpu.transpose %619, [1, 0] : vector<8x8xf32> -> vector<8x8xf32>
    %cst_185 = arith.constant dense<0.000000e+00> : vector<8x8xf32>
    %622 = tpu.matmul %618, %621, %cst_185 {dimension_numbers = #tpu.dot_dimension_numbers<[1], [0], [0], [1], [0, 0, 1, 1], [], []>} : vector<8x8xf32>, vector<8x8xf32>, vector<8x8xf32> -> vector<8x8xf32>
    %cst_186 = arith.constant 0.353553385 : f32
    %623 = vector.broadcast %cst_186 : f32 to vector<8x8xf32>
    %624 = arith.mulf %622, %623 : vector<8x8xf32>
    %625 = vector.extract_strided_slice %1 {offsets = [1, 0, 0], sizes = [1, 8, 8], strides = [1, 1, 1]} : vector<2x8x8xf32> to vector<1x8x8xf32>
    %626 = vector.shape_cast %625 : vector<1x8x8xf32> to vector<8x8xf32>
    %627 = arith.addf %624, %626 : vector<8x8xf32>
    %cst_187 = arith.constant dense<0xFF800000> : vector<8xf32>
    %628 = vector.multi_reduction <maximumf>, %627, %cst_187 [1] : vector<8x8xf32> to vector<8xf32>
    %629 = vector.shape_cast %628 : vector<8xf32> to vector<8x1xf32>
    %630 = vector.broadcast %629 : vector<8x1xf32> to vector<8x8xf32>
    %631 = arith.subf %627, %630 : vector<8x8xf32>
    %632 = math.exp %631 : vector<8x8xf32>
    %cst_188 = arith.constant dense<0.000000e+00> : vector<8xf32>
    %633 = vector.multi_reduction <add>, %632, %cst_188 [1] : vector<8x8xf32> to vector<8xf32>
    %634 = vector.shape_cast %633 : vector<8xf32> to vector<8x1xf32>
    %635 = tpu.reciprocal %634 {approx = true} : vector<8x1xf32> -> vector<8x1xf32>
    %636 = vector.broadcast %635 : vector<8x1xf32> to vector<8x8xf32>
    %637 = arith.mulf %632, %636 : vector<8x8xf32>
    %cst_189 = arith.constant dense<0.000000e+00> : vector<8x8xf32>
    %638 = tpu.matmul %637, %620, %cst_189 {dimension_numbers = #tpu.dot_dimension_numbers<[1], [0], [0], [1], [0, 0, 1, 1], [], []>} : vector<8x8xf32>, vector<8x8xf32>, vector<8x8xf32> -> vector<8x8xf32>
    %639 = tpu.concatenate %575, %596, %617, %638 in 1 : vector<8x8xf32>, vector<8x8xf32>, vector<8x8xf32>, vector<8x8xf32> -> vector<8x32xf32>
    %640 = tpu.concatenate %551, %639 in 0 : vector<8x32xf32>, vector<8x32xf32> -> vector<16x32xf32>
    %c0_190 = arith.constant 0 : index
    %c0_191 = arith.constant 0 : index
    %641 = vector.load %arg21[%c0_190, %c0_191] : memref<32x32xf32, #tpu.memory_space<vmem>>, vector<32x32xf32>
    %cst_192 = arith.constant dense<0.000000e+00> : vector<16x32xf32>
    %642 = tpu.matmul %640, %641, %cst_192 {dimension_numbers = #tpu.dot_dimension_numbers<[1], [0], [0], [1], [0, 0, 1, 1], [], []>} : vector<16x32xf32>, vector<32x32xf32>, vector<16x32xf32> -> vector<16x32xf32>
    %643 = arith.addf %642, %458 : vector<16x32xf32>
    %c0_193 = arith.constant 0 : index
    %c0_194 = arith.constant 0 : index
    %644 = vector.load %arg22[%c0_193, %c0_194] : memref<1x32xf32, #tpu.memory_space<vmem>>, vector<1x32xf32>
    %c0_195 = arith.constant 0 : index
    %c0_196 = arith.constant 0 : index
    %645 = vector.load %arg23[%c0_195, %c0_196] : memref<1x32xf32, #tpu.memory_space<vmem>>, vector<1x32xf32>
    %cst_197 = arith.constant dense<0.000000e+00> : vector<16xf32>
    %646 = vector.multi_reduction <add>, %643, %cst_197 [1] : vector<16x32xf32> to vector<16xf32>
    %647 = vector.shape_cast %646 : vector<16xf32> to vector<16x1xf32>
    %cst_198 = arith.constant 3.200000e+01 : f32
    %648 = vector.broadcast %cst_198 : f32 to vector<16x1xf32>
    %649 = arith.divf %647, %648 : vector<16x1xf32>
    %650 = vector.broadcast %649 : vector<16x1xf32> to vector<16x32xf32>
    %651 = arith.subf %643, %650 : vector<16x32xf32>
    %652 = arith.mulf %651, %651 : vector<16x32xf32>
    %cst_199 = arith.constant dense<0.000000e+00> : vector<16xf32>
    %653 = vector.multi_reduction <add>, %652, %cst_199 [1] : vector<16x32xf32> to vector<16xf32>
    %654 = vector.shape_cast %653 : vector<16xf32> to vector<16x1xf32>
    %cst_200 = arith.constant 3.200000e+01 : f32
    %655 = vector.broadcast %cst_200 : f32 to vector<16x1xf32>
    %656 = arith.divf %654, %655 : vector<16x1xf32>
    %657 = vector.broadcast %649 : vector<16x1xf32> to vector<16x32xf32>
    %658 = arith.subf %643, %657 : vector<16x32xf32>
    %cst_201 = arith.constant 9.99999997E-7 : f32
    %659 = vector.broadcast %cst_201 : f32 to vector<16x1xf32>
    %660 = arith.addf %656, %659 : vector<16x1xf32>
    %661 = math.rsqrt %660 : vector<16x1xf32>
    %662 = vector.broadcast %661 : vector<16x1xf32> to vector<16x32xf32>
    %663 = arith.mulf %658, %662 : vector<16x32xf32>
    %664 = vector.broadcast %644 : vector<1x32xf32> to vector<16x32xf32>
    %665 = arith.mulf %663, %664 : vector<16x32xf32>
    %666 = vector.broadcast %645 : vector<1x32xf32> to vector<16x32xf32>
    %667 = arith.addf %665, %666 : vector<16x32xf32>
    %c0_202 = arith.constant 0 : index
    %c0_203 = arith.constant 0 : index
    %668 = vector.load %arg24[%c0_202, %c0_203] : memref<32x32xf32, #tpu.memory_space<vmem>>, vector<32x32xf32>
    %cst_204 = arith.constant dense<0.000000e+00> : vector<16x32xf32>
    %669 = tpu.matmul %667, %668, %cst_204 {dimension_numbers = #tpu.dot_dimension_numbers<[1], [0], [0], [1], [0, 0, 1, 1], [], []>} : vector<16x32xf32>, vector<32x32xf32>, vector<16x32xf32> -> vector<16x32xf32>
    %c0_205 = arith.constant 0 : index
    %c0_206 = arith.constant 0 : index
    %670 = vector.load %arg25[%c0_205, %c0_206] : memref<32x64xf32, #tpu.memory_space<vmem>>, vector<32x64xf32>
    %cst_207 = arith.constant dense<0.000000e+00> : vector<32x64xf32>
    %671 = tpu.matmul %0, %670, %cst_207 {dimension_numbers = #tpu.dot_dimension_numbers<[1], [0], [0], [1], [0, 0, 1, 1], [], []>} : vector<32x32xf32>, vector<32x64xf32>, vector<32x64xf32> -> vector<32x64xf32>
    %672 = vector.extract_strided_slice %671 {offsets = [0, 0], sizes = [32, 32], strides = [1, 1]} : vector<32x64xf32> to vector<32x32xf32>
    %673 = vector.extract_strided_slice %671 {offsets = [0, 32], sizes = [32, 32], strides = [1, 1]} : vector<32x64xf32> to vector<32x32xf32>
    %674 = vector.extract_strided_slice %669 {offsets = [0, 0], sizes = [8, 32], strides = [1, 1]} : vector<16x32xf32> to vector<8x32xf32>
    %675 = vector.extract_strided_slice %672 {offsets = [0, 0], sizes = [16, 32], strides = [1, 1]} : vector<32x32xf32> to vector<16x32xf32>
    %676 = vector.extract_strided_slice %673 {offsets = [0, 0], sizes = [16, 32], strides = [1, 1]} : vector<32x32xf32> to vector<16x32xf32>
    %677 = vector.extract_strided_slice %674 {offsets = [0, 0], sizes = [8, 8], strides = [1, 1]} : vector<8x32xf32> to vector<8x8xf32>
    %678 = vector.extract_strided_slice %675 {offsets = [0, 0], sizes = [16, 8], strides = [1, 1]} : vector<16x32xf32> to vector<16x8xf32>
    %679 = vector.extract_strided_slice %676 {offsets = [0, 0], sizes = [16, 8], strides = [1, 1]} : vector<16x32xf32> to vector<16x8xf32>
    %680 = tpu.transpose %678, [1, 0] : vector<16x8xf32> -> vector<8x16xf32>
    %cst_208 = arith.constant dense<0.000000e+00> : vector<8x16xf32>
    %681 = tpu.matmul %677, %680, %cst_208 {dimension_numbers = #tpu.dot_dimension_numbers<[1], [0], [0], [1], [0, 0, 1, 1], [], []>} : vector<8x8xf32>, vector<8x16xf32>, vector<8x16xf32> -> vector<8x16xf32>
    %cst_209 = arith.constant 0.353553385 : f32
    %682 = vector.broadcast %cst_209 : f32 to vector<8x16xf32>
    %683 = arith.mulf %681, %682 : vector<8x16xf32>
    %cst_210 = arith.constant dense<0xFF800000> : vector<8xf32>
    %684 = vector.multi_reduction <maximumf>, %683, %cst_210 [1] : vector<8x16xf32> to vector<8xf32>
    %685 = vector.shape_cast %684 : vector<8xf32> to vector<8x1xf32>
    %686 = vector.broadcast %685 : vector<8x1xf32> to vector<8x16xf32>
    %687 = arith.subf %683, %686 : vector<8x16xf32>
    %688 = math.exp %687 : vector<8x16xf32>
    %cst_211 = arith.constant dense<0.000000e+00> : vector<8xf32>
    %689 = vector.multi_reduction <add>, %688, %cst_211 [1] : vector<8x16xf32> to vector<8xf32>
    %690 = vector.shape_cast %689 : vector<8xf32> to vector<8x1xf32>
    %691 = tpu.reciprocal %690 {approx = true} : vector<8x1xf32> -> vector<8x1xf32>
    %692 = vector.broadcast %691 : vector<8x1xf32> to vector<8x16xf32>
    %693 = arith.mulf %688, %692 : vector<8x16xf32>
    %cst_212 = arith.constant dense<0.000000e+00> : vector<8x8xf32>
    %694 = tpu.matmul %693, %679, %cst_212 {dimension_numbers = #tpu.dot_dimension_numbers<[1], [0], [0], [1], [0, 0, 1, 1], [], []>} : vector<8x16xf32>, vector<16x8xf32>, vector<8x8xf32> -> vector<8x8xf32>
    %695 = vector.extract_strided_slice %674 {offsets = [0, 8], sizes = [8, 8], strides = [1, 1]} : vector<8x32xf32> to vector<8x8xf32>
    %696 = vector.extract_strided_slice %675 {offsets = [0, 8], sizes = [16, 8], strides = [1, 1]} : vector<16x32xf32> to vector<16x8xf32>
    %697 = vector.extract_strided_slice %676 {offsets = [0, 8], sizes = [16, 8], strides = [1, 1]} : vector<16x32xf32> to vector<16x8xf32>
    %698 = tpu.transpose %696, [1, 0] : vector<16x8xf32> -> vector<8x16xf32>
    %cst_213 = arith.constant dense<0.000000e+00> : vector<8x16xf32>
    %699 = tpu.matmul %695, %698, %cst_213 {dimension_numbers = #tpu.dot_dimension_numbers<[1], [0], [0], [1], [0, 0, 1, 1], [], []>} : vector<8x8xf32>, vector<8x16xf32>, vector<8x16xf32> -> vector<8x16xf32>
    %cst_214 = arith.constant 0.353553385 : f32
    %700 = vector.broadcast %cst_214 : f32 to vector<8x16xf32>
    %701 = arith.mulf %699, %700 : vector<8x16xf32>
    %cst_215 = arith.constant dense<0xFF800000> : vector<8xf32>
    %702 = vector.multi_reduction <maximumf>, %701, %cst_215 [1] : vector<8x16xf32> to vector<8xf32>
    %703 = vector.shape_cast %702 : vector<8xf32> to vector<8x1xf32>
    %704 = vector.broadcast %703 : vector<8x1xf32> to vector<8x16xf32>
    %705 = arith.subf %701, %704 : vector<8x16xf32>
    %706 = math.exp %705 : vector<8x16xf32>
    %cst_216 = arith.constant dense<0.000000e+00> : vector<8xf32>
    %707 = vector.multi_reduction <add>, %706, %cst_216 [1] : vector<8x16xf32> to vector<8xf32>
    %708 = vector.shape_cast %707 : vector<8xf32> to vector<8x1xf32>
    %709 = tpu.reciprocal %708 {approx = true} : vector<8x1xf32> -> vector<8x1xf32>
    %710 = vector.broadcast %709 : vector<8x1xf32> to vector<8x16xf32>
    %711 = arith.mulf %706, %710 : vector<8x16xf32>
    %cst_217 = arith.constant dense<0.000000e+00> : vector<8x8xf32>
    %712 = tpu.matmul %711, %697, %cst_217 {dimension_numbers = #tpu.dot_dimension_numbers<[1], [0], [0], [1], [0, 0, 1, 1], [], []>} : vector<8x16xf32>, vector<16x8xf32>, vector<8x8xf32> -> vector<8x8xf32>
    %713 = vector.extract_strided_slice %674 {offsets = [0, 16], sizes = [8, 8], strides = [1, 1]} : vector<8x32xf32> to vector<8x8xf32>
    %714 = vector.extract_strided_slice %675 {offsets = [0, 16], sizes = [16, 8], strides = [1, 1]} : vector<16x32xf32> to vector<16x8xf32>
    %715 = vector.extract_strided_slice %676 {offsets = [0, 16], sizes = [16, 8], strides = [1, 1]} : vector<16x32xf32> to vector<16x8xf32>
    %716 = tpu.transpose %714, [1, 0] : vector<16x8xf32> -> vector<8x16xf32>
    %cst_218 = arith.constant dense<0.000000e+00> : vector<8x16xf32>
    %717 = tpu.matmul %713, %716, %cst_218 {dimension_numbers = #tpu.dot_dimension_numbers<[1], [0], [0], [1], [0, 0, 1, 1], [], []>} : vector<8x8xf32>, vector<8x16xf32>, vector<8x16xf32> -> vector<8x16xf32>
    %cst_219 = arith.constant 0.353553385 : f32
    %718 = vector.broadcast %cst_219 : f32 to vector<8x16xf32>
    %719 = arith.mulf %717, %718 : vector<8x16xf32>
    %cst_220 = arith.constant dense<0xFF800000> : vector<8xf32>
    %720 = vector.multi_reduction <maximumf>, %719, %cst_220 [1] : vector<8x16xf32> to vector<8xf32>
    %721 = vector.shape_cast %720 : vector<8xf32> to vector<8x1xf32>
    %722 = vector.broadcast %721 : vector<8x1xf32> to vector<8x16xf32>
    %723 = arith.subf %719, %722 : vector<8x16xf32>
    %724 = math.exp %723 : vector<8x16xf32>
    %cst_221 = arith.constant dense<0.000000e+00> : vector<8xf32>
    %725 = vector.multi_reduction <add>, %724, %cst_221 [1] : vector<8x16xf32> to vector<8xf32>
    %726 = vector.shape_cast %725 : vector<8xf32> to vector<8x1xf32>
    %727 = tpu.reciprocal %726 {approx = true} : vector<8x1xf32> -> vector<8x1xf32>
    %728 = vector.broadcast %727 : vector<8x1xf32> to vector<8x16xf32>
    %729 = arith.mulf %724, %728 : vector<8x16xf32>
    %cst_222 = arith.constant dense<0.000000e+00> : vector<8x8xf32>
    %730 = tpu.matmul %729, %715, %cst_222 {dimension_numbers = #tpu.dot_dimension_numbers<[1], [0], [0], [1], [0, 0, 1, 1], [], []>} : vector<8x16xf32>, vector<16x8xf32>, vector<8x8xf32> -> vector<8x8xf32>
    %731 = vector.extract_strided_slice %674 {offsets = [0, 24], sizes = [8, 8], strides = [1, 1]} : vector<8x32xf32> to vector<8x8xf32>
    %732 = vector.extract_strided_slice %675 {offsets = [0, 24], sizes = [16, 8], strides = [1, 1]} : vector<16x32xf32> to vector<16x8xf32>
    %733 = vector.extract_strided_slice %676 {offsets = [0, 24], sizes = [16, 8], strides = [1, 1]} : vector<16x32xf32> to vector<16x8xf32>
    %734 = tpu.transpose %732, [1, 0] : vector<16x8xf32> -> vector<8x16xf32>
    %cst_223 = arith.constant dense<0.000000e+00> : vector<8x16xf32>
    %735 = tpu.matmul %731, %734, %cst_223 {dimension_numbers = #tpu.dot_dimension_numbers<[1], [0], [0], [1], [0, 0, 1, 1], [], []>} : vector<8x8xf32>, vector<8x16xf32>, vector<8x16xf32> -> vector<8x16xf32>
    %cst_224 = arith.constant 0.353553385 : f32
    %736 = vector.broadcast %cst_224 : f32 to vector<8x16xf32>
    %737 = arith.mulf %735, %736 : vector<8x16xf32>
    %cst_225 = arith.constant dense<0xFF800000> : vector<8xf32>
    %738 = vector.multi_reduction <maximumf>, %737, %cst_225 [1] : vector<8x16xf32> to vector<8xf32>
    %739 = vector.shape_cast %738 : vector<8xf32> to vector<8x1xf32>
    %740 = vector.broadcast %739 : vector<8x1xf32> to vector<8x16xf32>
    %741 = arith.subf %737, %740 : vector<8x16xf32>
    %742 = math.exp %741 : vector<8x16xf32>
    %cst_226 = arith.constant dense<0.000000e+00> : vector<8xf32>
    %743 = vector.multi_reduction <add>, %742, %cst_226 [1] : vector<8x16xf32> to vector<8xf32>
    %744 = vector.shape_cast %743 : vector<8xf32> to vector<8x1xf32>
    %745 = tpu.reciprocal %744 {approx = true} : vector<8x1xf32> -> vector<8x1xf32>
    %746 = vector.broadcast %745 : vector<8x1xf32> to vector<8x16xf32>
    %747 = arith.mulf %742, %746 : vector<8x16xf32>
    %cst_227 = arith.constant dense<0.000000e+00> : vector<8x8xf32>
    %748 = tpu.matmul %747, %733, %cst_227 {dimension_numbers = #tpu.dot_dimension_numbers<[1], [0], [0], [1], [0, 0, 1, 1], [], []>} : vector<8x16xf32>, vector<16x8xf32>, vector<8x8xf32> -> vector<8x8xf32>
    %749 = tpu.concatenate %694, %712, %730, %748 in 1 : vector<8x8xf32>, vector<8x8xf32>, vector<8x8xf32>, vector<8x8xf32> -> vector<8x32xf32>
    %750 = vector.extract_strided_slice %669 {offsets = [8, 0], sizes = [8, 32], strides = [1, 1]} : vector<16x32xf32> to vector<8x32xf32>
    %751 = vector.extract_strided_slice %672 {offsets = [16, 0], sizes = [16, 32], strides = [1, 1]} : vector<32x32xf32> to vector<16x32xf32>
    %752 = vector.extract_strided_slice %673 {offsets = [16, 0], sizes = [16, 32], strides = [1, 1]} : vector<32x32xf32> to vector<16x32xf32>
    %753 = vector.extract_strided_slice %750 {offsets = [0, 0], sizes = [8, 8], strides = [1, 1]} : vector<8x32xf32> to vector<8x8xf32>
    %754 = vector.extract_strided_slice %751 {offsets = [0, 0], sizes = [16, 8], strides = [1, 1]} : vector<16x32xf32> to vector<16x8xf32>
    %755 = vector.extract_strided_slice %752 {offsets = [0, 0], sizes = [16, 8], strides = [1, 1]} : vector<16x32xf32> to vector<16x8xf32>
    %756 = tpu.transpose %754, [1, 0] : vector<16x8xf32> -> vector<8x16xf32>
    %cst_228 = arith.constant dense<0.000000e+00> : vector<8x16xf32>
    %757 = tpu.matmul %753, %756, %cst_228 {dimension_numbers = #tpu.dot_dimension_numbers<[1], [0], [0], [1], [0, 0, 1, 1], [], []>} : vector<8x8xf32>, vector<8x16xf32>, vector<8x16xf32> -> vector<8x16xf32>
    %cst_229 = arith.constant 0.353553385 : f32
    %758 = vector.broadcast %cst_229 : f32 to vector<8x16xf32>
    %759 = arith.mulf %757, %758 : vector<8x16xf32>
    %cst_230 = arith.constant dense<0xFF800000> : vector<8xf32>
    %760 = vector.multi_reduction <maximumf>, %759, %cst_230 [1] : vector<8x16xf32> to vector<8xf32>
    %761 = vector.shape_cast %760 : vector<8xf32> to vector<8x1xf32>
    %762 = vector.broadcast %761 : vector<8x1xf32> to vector<8x16xf32>
    %763 = arith.subf %759, %762 : vector<8x16xf32>
    %764 = math.exp %763 : vector<8x16xf32>
    %cst_231 = arith.constant dense<0.000000e+00> : vector<8xf32>
    %765 = vector.multi_reduction <add>, %764, %cst_231 [1] : vector<8x16xf32> to vector<8xf32>
    %766 = vector.shape_cast %765 : vector<8xf32> to vector<8x1xf32>
    %767 = tpu.reciprocal %766 {approx = true} : vector<8x1xf32> -> vector<8x1xf32>
    %768 = vector.broadcast %767 : vector<8x1xf32> to vector<8x16xf32>
    %769 = arith.mulf %764, %768 : vector<8x16xf32>
    %cst_232 = arith.constant dense<0.000000e+00> : vector<8x8xf32>
    %770 = tpu.matmul %769, %755, %cst_232 {dimension_numbers = #tpu.dot_dimension_numbers<[1], [0], [0], [1], [0, 0, 1, 1], [], []>} : vector<8x16xf32>, vector<16x8xf32>, vector<8x8xf32> -> vector<8x8xf32>
    %771 = vector.extract_strided_slice %750 {offsets = [0, 8], sizes = [8, 8], strides = [1, 1]} : vector<8x32xf32> to vector<8x8xf32>
    %772 = vector.extract_strided_slice %751 {offsets = [0, 8], sizes = [16, 8], strides = [1, 1]} : vector<16x32xf32> to vector<16x8xf32>
    %773 = vector.extract_strided_slice %752 {offsets = [0, 8], sizes = [16, 8], strides = [1, 1]} : vector<16x32xf32> to vector<16x8xf32>
    %774 = tpu.transpose %772, [1, 0] : vector<16x8xf32> -> vector<8x16xf32>
    %cst_233 = arith.constant dense<0.000000e+00> : vector<8x16xf32>
    %775 = tpu.matmul %771, %774, %cst_233 {dimension_numbers = #tpu.dot_dimension_numbers<[1], [0], [0], [1], [0, 0, 1, 1], [], []>} : vector<8x8xf32>, vector<8x16xf32>, vector<8x16xf32> -> vector<8x16xf32>
    %cst_234 = arith.constant 0.353553385 : f32
    %776 = vector.broadcast %cst_234 : f32 to vector<8x16xf32>
    %777 = arith.mulf %775, %776 : vector<8x16xf32>
    %cst_235 = arith.constant dense<0xFF800000> : vector<8xf32>
    %778 = vector.multi_reduction <maximumf>, %777, %cst_235 [1] : vector<8x16xf32> to vector<8xf32>
    %779 = vector.shape_cast %778 : vector<8xf32> to vector<8x1xf32>
    %780 = vector.broadcast %779 : vector<8x1xf32> to vector<8x16xf32>
    %781 = arith.subf %777, %780 : vector<8x16xf32>
    %782 = math.exp %781 : vector<8x16xf32>
    %cst_236 = arith.constant dense<0.000000e+00> : vector<8xf32>
    %783 = vector.multi_reduction <add>, %782, %cst_236 [1] : vector<8x16xf32> to vector<8xf32>
    %784 = vector.shape_cast %783 : vector<8xf32> to vector<8x1xf32>
    %785 = tpu.reciprocal %784 {approx = true} : vector<8x1xf32> -> vector<8x1xf32>
    %786 = vector.broadcast %785 : vector<8x1xf32> to vector<8x16xf32>
    %787 = arith.mulf %782, %786 : vector<8x16xf32>
    %cst_237 = arith.constant dense<0.000000e+00> : vector<8x8xf32>
    %788 = tpu.matmul %787, %773, %cst_237 {dimension_numbers = #tpu.dot_dimension_numbers<[1], [0], [0], [1], [0, 0, 1, 1], [], []>} : vector<8x16xf32>, vector<16x8xf32>, vector<8x8xf32> -> vector<8x8xf32>
    %789 = vector.extract_strided_slice %750 {offsets = [0, 16], sizes = [8, 8], strides = [1, 1]} : vector<8x32xf32> to vector<8x8xf32>
    %790 = vector.extract_strided_slice %751 {offsets = [0, 16], sizes = [16, 8], strides = [1, 1]} : vector<16x32xf32> to vector<16x8xf32>
    %791 = vector.extract_strided_slice %752 {offsets = [0, 16], sizes = [16, 8], strides = [1, 1]} : vector<16x32xf32> to vector<16x8xf32>
    %792 = tpu.transpose %790, [1, 0] : vector<16x8xf32> -> vector<8x16xf32>
    %cst_238 = arith.constant dense<0.000000e+00> : vector<8x16xf32>
    %793 = tpu.matmul %789, %792, %cst_238 {dimension_numbers = #tpu.dot_dimension_numbers<[1], [0], [0], [1], [0, 0, 1, 1], [], []>} : vector<8x8xf32>, vector<8x16xf32>, vector<8x16xf32> -> vector<8x16xf32>
    %cst_239 = arith.constant 0.353553385 : f32
    %794 = vector.broadcast %cst_239 : f32 to vector<8x16xf32>
    %795 = arith.mulf %793, %794 : vector<8x16xf32>
    %cst_240 = arith.constant dense<0xFF800000> : vector<8xf32>
    %796 = vector.multi_reduction <maximumf>, %795, %cst_240 [1] : vector<8x16xf32> to vector<8xf32>
    %797 = vector.shape_cast %796 : vector<8xf32> to vector<8x1xf32>
    %798 = vector.broadcast %797 : vector<8x1xf32> to vector<8x16xf32>
    %799 = arith.subf %795, %798 : vector<8x16xf32>
    %800 = math.exp %799 : vector<8x16xf32>
    %cst_241 = arith.constant dense<0.000000e+00> : vector<8xf32>
    %801 = vector.multi_reduction <add>, %800, %cst_241 [1] : vector<8x16xf32> to vector<8xf32>
    %802 = vector.shape_cast %801 : vector<8xf32> to vector<8x1xf32>
    %803 = tpu.reciprocal %802 {approx = true} : vector<8x1xf32> -> vector<8x1xf32>
    %804 = vector.broadcast %803 : vector<8x1xf32> to vector<8x16xf32>
    %805 = arith.mulf %800, %804 : vector<8x16xf32>
    %cst_242 = arith.constant dense<0.000000e+00> : vector<8x8xf32>
    %806 = tpu.matmul %805, %791, %cst_242 {dimension_numbers = #tpu.dot_dimension_numbers<[1], [0], [0], [1], [0, 0, 1, 1], [], []>} : vector<8x16xf32>, vector<16x8xf32>, vector<8x8xf32> -> vector<8x8xf32>
    %807 = vector.extract_strided_slice %750 {offsets = [0, 24], sizes = [8, 8], strides = [1, 1]} : vector<8x32xf32> to vector<8x8xf32>
    %808 = vector.extract_strided_slice %751 {offsets = [0, 24], sizes = [16, 8], strides = [1, 1]} : vector<16x32xf32> to vector<16x8xf32>
    %809 = vector.extract_strided_slice %752 {offsets = [0, 24], sizes = [16, 8], strides = [1, 1]} : vector<16x32xf32> to vector<16x8xf32>
    %810 = tpu.transpose %808, [1, 0] : vector<16x8xf32> -> vector<8x16xf32>
    %cst_243 = arith.constant dense<0.000000e+00> : vector<8x16xf32>
    %811 = tpu.matmul %807, %810, %cst_243 {dimension_numbers = #tpu.dot_dimension_numbers<[1], [0], [0], [1], [0, 0, 1, 1], [], []>} : vector<8x8xf32>, vector<8x16xf32>, vector<8x16xf32> -> vector<8x16xf32>
    %cst_244 = arith.constant 0.353553385 : f32
    %812 = vector.broadcast %cst_244 : f32 to vector<8x16xf32>
    %813 = arith.mulf %811, %812 : vector<8x16xf32>
    %cst_245 = arith.constant dense<0xFF800000> : vector<8xf32>
    %814 = vector.multi_reduction <maximumf>, %813, %cst_245 [1] : vector<8x16xf32> to vector<8xf32>
    %815 = vector.shape_cast %814 : vector<8xf32> to vector<8x1xf32>
    %816 = vector.broadcast %815 : vector<8x1xf32> to vector<8x16xf32>
    %817 = arith.subf %813, %816 : vector<8x16xf32>
    %818 = math.exp %817 : vector<8x16xf32>
    %cst_246 = arith.constant dense<0.000000e+00> : vector<8xf32>
    %819 = vector.multi_reduction <add>, %818, %cst_246 [1] : vector<8x16xf32> to vector<8xf32>
    %820 = vector.shape_cast %819 : vector<8xf32> to vector<8x1xf32>
    %821 = tpu.reciprocal %820 {approx = true} : vector<8x1xf32> -> vector<8x1xf32>
    %822 = vector.broadcast %821 : vector<8x1xf32> to vector<8x16xf32>
    %823 = arith.mulf %818, %822 : vector<8x16xf32>
    %cst_247 = arith.constant dense<0.000000e+00> : vector<8x8xf32>
    %824 = tpu.matmul %823, %809, %cst_247 {dimension_numbers = #tpu.dot_dimension_numbers<[1], [0], [0], [1], [0, 0, 1, 1], [], []>} : vector<8x16xf32>, vector<16x8xf32>, vector<8x8xf32> -> vector<8x8xf32>
    %825 = tpu.concatenate %770, %788, %806, %824 in 1 : vector<8x8xf32>, vector<8x8xf32>, vector<8x8xf32>, vector<8x8xf32> -> vector<8x32xf32>
    %826 = tpu.concatenate %749, %825 in 0 : vector<8x32xf32>, vector<8x32xf32> -> vector<16x32xf32>
    %c0_248 = arith.constant 0 : index
    %c0_249 = arith.constant 0 : index
    %827 = vector.load %arg26[%c0_248, %c0_249] : memref<32x32xf32, #tpu.memory_space<vmem>>, vector<32x32xf32>
    %cst_250 = arith.constant dense<0.000000e+00> : vector<16x32xf32>
    %828 = tpu.matmul %826, %827, %cst_250 {dimension_numbers = #tpu.dot_dimension_numbers<[1], [0], [0], [1], [0, 0, 1, 1], [], []>} : vector<16x32xf32>, vector<32x32xf32>, vector<16x32xf32> -> vector<16x32xf32>
    %829 = arith.addf %828, %667 : vector<16x32xf32>
    %c0_251 = arith.constant 0 : index
    %c0_252 = arith.constant 0 : index
    %830 = vector.load %arg27[%c0_251, %c0_252] : memref<1x32xf32, #tpu.memory_space<vmem>>, vector<1x32xf32>
    %c0_253 = arith.constant 0 : index
    %c0_254 = arith.constant 0 : index
    %831 = vector.load %arg28[%c0_253, %c0_254] : memref<1x32xf32, #tpu.memory_space<vmem>>, vector<1x32xf32>
    %cst_255 = arith.constant dense<0.000000e+00> : vector<16xf32>
    %832 = vector.multi_reduction <add>, %829, %cst_255 [1] : vector<16x32xf32> to vector<16xf32>
    %833 = vector.shape_cast %832 : vector<16xf32> to vector<16x1xf32>
    %cst_256 = arith.constant 3.200000e+01 : f32
    %834 = vector.broadcast %cst_256 : f32 to vector<16x1xf32>
    %835 = arith.divf %833, %834 : vector<16x1xf32>
    %836 = vector.broadcast %835 : vector<16x1xf32> to vector<16x32xf32>
    %837 = arith.subf %829, %836 : vector<16x32xf32>
    %838 = arith.mulf %837, %837 : vector<16x32xf32>
    %cst_257 = arith.constant dense<0.000000e+00> : vector<16xf32>
    %839 = vector.multi_reduction <add>, %838, %cst_257 [1] : vector<16x32xf32> to vector<16xf32>
    %840 = vector.shape_cast %839 : vector<16xf32> to vector<16x1xf32>
    %cst_258 = arith.constant 3.200000e+01 : f32
    %841 = vector.broadcast %cst_258 : f32 to vector<16x1xf32>
    %842 = arith.divf %840, %841 : vector<16x1xf32>
    %843 = vector.broadcast %835 : vector<16x1xf32> to vector<16x32xf32>
    %844 = arith.subf %829, %843 : vector<16x32xf32>
    %cst_259 = arith.constant 9.99999997E-7 : f32
    %845 = vector.broadcast %cst_259 : f32 to vector<16x1xf32>
    %846 = arith.addf %842, %845 : vector<16x1xf32>
    %847 = math.rsqrt %846 : vector<16x1xf32>
    %848 = vector.broadcast %847 : vector<16x1xf32> to vector<16x32xf32>
    %849 = arith.mulf %844, %848 : vector<16x32xf32>
    %850 = vector.broadcast %830 : vector<1x32xf32> to vector<16x32xf32>
    %851 = arith.mulf %849, %850 : vector<16x32xf32>
    %852 = vector.broadcast %831 : vector<1x32xf32> to vector<16x32xf32>
    %853 = arith.addf %851, %852 : vector<16x32xf32>
    %c0_260 = arith.constant 0 : index
    %c0_261 = arith.constant 0 : index
    %854 = vector.load %arg29[%c0_260, %c0_261] : memref<32x64xf32, #tpu.memory_space<vmem>>, vector<32x64xf32>
    %cst_262 = arith.constant dense<0.000000e+00> : vector<16x64xf32>
    %855 = tpu.matmul %853, %854, %cst_262 {dimension_numbers = #tpu.dot_dimension_numbers<[1], [0], [0], [1], [0, 0, 1, 1], [], []>} : vector<16x32xf32>, vector<32x64xf32>, vector<16x64xf32> -> vector<16x64xf32>
    %c0_263 = arith.constant 0 : index
    %c0_264 = arith.constant 0 : index
    %856 = vector.load %arg30[%c0_263, %c0_264] : memref<1x64xf32, #tpu.memory_space<vmem>>, vector<1x64xf32>
    %857 = vector.broadcast %856 : vector<1x64xf32> to vector<16x64xf32>
    %858 = arith.addf %855, %857 : vector<16x64xf32>
    %cst_265 = arith.constant 0.000000e+00 : f32
    %859 = vector.broadcast %cst_265 : f32 to vector<16x64xf32>
    %860 = arith.maximumf %858, %859 : vector<16x64xf32>
    %c0_266 = arith.constant 0 : index
    %c0_267 = arith.constant 0 : index
    %861 = vector.load %arg31[%c0_266, %c0_267] : memref<64x32xf32, #tpu.memory_space<vmem>>, vector<64x32xf32>
    %cst_268 = arith.constant dense<0.000000e+00> : vector<16x32xf32>
    %862 = tpu.matmul %860, %861, %cst_268 {dimension_numbers = #tpu.dot_dimension_numbers<[1], [0], [0], [1], [0, 0, 1, 1], [], []>} : vector<16x64xf32>, vector<64x32xf32>, vector<16x32xf32> -> vector<16x32xf32>
    %c0_269 = arith.constant 0 : index
    %c0_270 = arith.constant 0 : index
    %863 = vector.load %arg32[%c0_269, %c0_270] : memref<1x32xf32, #tpu.memory_space<vmem>>, vector<1x32xf32>
    %864 = vector.broadcast %863 : vector<1x32xf32> to vector<16x32xf32>
    %865 = arith.addf %862, %864 : vector<16x32xf32>
    %866 = arith.addf %865, %853 : vector<16x32xf32>
    %c0_271 = arith.constant 0 : index
    %c0_272 = arith.constant 0 : index
    %867 = vector.load %arg33[%c0_271, %c0_272] : memref<1x32xf32, #tpu.memory_space<vmem>>, vector<1x32xf32>
    %c0_273 = arith.constant 0 : index
    %c0_274 = arith.constant 0 : index
    %868 = vector.load %arg34[%c0_273, %c0_274] : memref<1x32xf32, #tpu.memory_space<vmem>>, vector<1x32xf32>
    %cst_275 = arith.constant dense<0.000000e+00> : vector<16xf32>
    %869 = vector.multi_reduction <add>, %866, %cst_275 [1] : vector<16x32xf32> to vector<16xf32>
    %870 = vector.shape_cast %869 : vector<16xf32> to vector<16x1xf32>
    %cst_276 = arith.constant 3.200000e+01 : f32
    %871 = vector.broadcast %cst_276 : f32 to vector<16x1xf32>
    %872 = arith.divf %870, %871 : vector<16x1xf32>
    %873 = vector.broadcast %872 : vector<16x1xf32> to vector<16x32xf32>
    %874 = arith.subf %866, %873 : vector<16x32xf32>
    %875 = arith.mulf %874, %874 : vector<16x32xf32>
    %cst_277 = arith.constant dense<0.000000e+00> : vector<16xf32>
    %876 = vector.multi_reduction <add>, %875, %cst_277 [1] : vector<16x32xf32> to vector<16xf32>
    %877 = vector.shape_cast %876 : vector<16xf32> to vector<16x1xf32>
    %cst_278 = arith.constant 3.200000e+01 : f32
    %878 = vector.broadcast %cst_278 : f32 to vector<16x1xf32>
    %879 = arith.divf %877, %878 : vector<16x1xf32>
    %880 = vector.broadcast %872 : vector<16x1xf32> to vector<16x32xf32>
    %881 = arith.subf %866, %880 : vector<16x32xf32>
    %cst_279 = arith.constant 9.99999997E-7 : f32
    %882 = vector.broadcast %cst_279 : f32 to vector<16x1xf32>
    %883 = arith.addf %879, %882 : vector<16x1xf32>
    %884 = math.rsqrt %883 : vector<16x1xf32>
    %885 = vector.broadcast %884 : vector<16x1xf32> to vector<16x32xf32>
    %886 = arith.mulf %881, %885 : vector<16x32xf32>
    %887 = vector.broadcast %867 : vector<1x32xf32> to vector<16x32xf32>
    %888 = arith.mulf %886, %887 : vector<16x32xf32>
    %889 = vector.broadcast %868 : vector<1x32xf32> to vector<16x32xf32>
    %890 = arith.addf %888, %889 : vector<16x32xf32>
    %c0_280 = arith.constant 0 : index
    %c0_281 = arith.constant 0 : index
    %891 = vector.load %arg35[%c0_280, %c0_281] : memref<16x32xf32, #tpu.memory_space<vmem>>, vector<16x32xf32>
    tpu.vector_store %arg35[%c0_280, %c0_281], %890 {strides = array<i32>} : memref<16x32xf32, #tpu.memory_space<vmem>>, vector<16x32xf32>,
    return
  }
}

</mosaic_0001>

<bundles_post_ra>
// kernel: decoder_forward.1
= control target key start
LH: loop header
LB: loop body
LE: loop exit
PB: predicated region body
PF: predicated region fallthrough
CT: control target
= control target key end

     0   :  { %s8918_s6 = smov 1   ;;  %s8919_s10 = smov 2   ;;  %s10066_s0 = inlined_call_operand.smem [shape: u32[36], index: -1, kind: input, shape index: {}] }
   0x1   :  { %s8980_s5 = sld [smem:[%s10066_s0]]   ;;  %s8920_s14 = smov 3  }
   0x2   :  { %s8985_s9 = sld [smem:[%s10066_s0 + %s8918_s6]]   ;;  %s8921_s18 = smov 4  }
   0x3   :  { %s8990_s13 = sld [smem:[%s10066_s0 + %s8919_s10]]   ;;  %s8922_s22 = smov 5  }
   0x4   :  { %s8995_s17 = sld [smem:[%s10066_s0 + %s8920_s14]]   ;;  %s8923_s26 = smov 6  }
   0x5   :  { %s9000_s21 = sld [smem:[%s10066_s0 + %s8921_s18]]   ;;  %s8924_s30 = smov 7  }
   0x6   :  { %s9005_s25 = sld [smem:[%s10066_s0 + %s8922_s22]]   ;;  %s8925_s4 = smov 8  }
   0x7   :  { %s9010_s29 = sld [smem:[%s10066_s0 + %s8923_s26]]   ;;  %s8926_s10 = smov 9  }
   0x8   :  { %s9015_s3 = sld [smem:[%s10066_s0 + %s8924_s30]]   ;;  %s8927_s15 = smov 10  }
   0x9   :  { %s9020_s8 = sld [smem:[%s10066_s0 + %s8925_s4]]   ;;  %s8928_s20 = smov 11  }
   0xa   :  { %s9025_s14 = sld [smem:[%s10066_s0 + %s8926_s10]]   ;;  %s8929_s26 = smov 12  }
   0xb   :  { %s9030_s19 = sld [smem:[%s10066_s0 + %s8927_s15]]   ;;  %s8930_s1 = smov 13  }
   0xc   :  { %s9035_s24 = sld [smem:[%s10066_s0 + %s8928_s20]]   ;;  %s8931_s7 = smov 14  }
   0xd   :  { %s9040_s30 = sld [smem:[%s10066_s0 + %s8929_s26]]   ;;  %s8932_s15 = smov 15  }
   0xe   :  { %s9045_s6 = sld [smem:[%s10066_s0 + %s8930_s1]]   ;;  %s8933_s22 = smov 16  }
   0xf   :  { %s9050_s12 = sld [smem:[%s10066_s0 + %s8931_s7]]   ;;  %s8934_s28 = smov 17  }
  0x10   :  { %s9055_s20 = sld [smem:[%s10066_s0 + %s8932_s15]]   ;;  %s8935_s7 = smov 18  }
  0x11   :  { %s9060_s27 = sld [smem:[%s10066_s0 + %s8933_s22]]   ;;  %s8936_s15 = smov 19  }
  0x12   :  { %s9065_s4 = sld [smem:[%s10066_s0 + %s8934_s28]]   ;;  %s8937_s22 = smov 20  }
  0x13   :  { %10074 = sst [smem:[#allocation5_spill]] %s9040_s30  ;;  %s8938_s28 = smov 21  }
  0x14   :  { %10075 = sst [smem:[#allocation6_spill]] %s9045_s6 }
  0x15   :  { %s9070_s6 = sld [smem:[%s10066_s0 + %s8935_s7]]   ;;  %s8939_s7 = smov 22  }
  0x16   :  { %10076 = sst [smem:[#allocation7_spill]] %s9055_s20 }
  0x17   :  { %s9075_s20 = sld [smem:[%s10066_s0 + %s8936_s15]]   ;;  %s8940_s15 = smov 23  }
  0x18   :  { %10077 = sst [smem:[#allocation8_spill]] %s9065_s4 }
  0x19   :  { %s9080_s30 = sld [smem:[%s10066_s0 + %s8937_s22]]   ;;  %s8941_s22 = smov 24  }
  0x1a   :  { %s9085_s4 = sld [smem:[%s10066_s0 + %s8938_s28]]   ;;  %s8942_s28 = smov 25  }
  0x1b   :  { %10078 = sst [smem:[#allocation9_spill]] %s9070_s6 }
  0x1c   :  { %s9090_s6 = sld [smem:[%s10066_s0 + %s8939_s7]]   ;;  %s8943_s7 = smov 26  }
  0x1d   :  { %10079 = sst [smem:[#allocation10_spill]] %s9075_s20 }
  0x1e   :  { %s9095_s20 = sld [smem:[%s10066_s0 + %s8940_s15]]   ;;  %s8944_s15 = smov 27  }
  0x1f   :  { %10080 = sst [smem:[#allocation11_spill]] %s9080_s30 }
  0x20   :  { %10081 = sst [smem:[#allocation12_spill]] %s9085_s4 }
  0x21   :  { %s9100_s30 = sld [smem:[%s10066_s0 + %s8941_s22]]   ;;  %s8945_s22 = smov 28  }
  0x22   :  { %10082 = sst [smem:[#allocation13_spill]] %s9090_s6 }
  0x23   :  { %s9105_s4 = sld [smem:[%s10066_s0 + %s8942_s28]]   ;;  %s8946_s28 = smov 29  }
  0x24   :  { %10083 = sst [smem:[#allocation14_spill]] %s9095_s20 }
  0x25   :  { %s9110_s6 = sld [smem:[%s10066_s0 + %s8943_s7]]   ;;  %s8947_s7 = smov 30  }
  0x26   :  { %s9115_s20 = sld [smem:[%s10066_s0 + %s8944_s15]]   ;;  %s8948_s15 = smov 31  }
  0x27   :  { %10084 = sst [smem:[#allocation15_spill]] %s9100_s30 }
  0x28   :  { %s9120_s30 = sld [smem:[%s10066_s0 + %s8945_s22]]   ;;  %s8949_s22 = smov 32  }
  0x29   :  { %10085 = sst [smem:[#allocation16_spill]] %s9105_s4 }
  0x2a   :  { %s9125_s4 = sld [smem:[%s10066_s0 + %s8946_s28]]   ;;  %s8950_s28 = smov 33  }
  0x2b   :  { %10086 = sst [smem:[#allocation17_spill]] %s9110_s6 }
  0x2c   :  { %10087 = sst [smem:[#allocation18_spill]] %s9115_s20 }
  0x2d   :  { %s9130_s6 = sld [smem:[%s10066_s0 + %s8947_s7]]   ;;  %s8951_s7 = smov 34  }
  0x2e   :  { %10088 = sst [smem:[#allocation19_spill]] %s9120_s30 }
  0x2f   :  { %s9135_s20 = sld [smem:[%s10066_s0 + %s8948_s15]]   ;;  %s8952_s15 = smov 35  }
  0x30   :  { %10089 = sst [smem:[#allocation20_spill]] %s9125_s4 }
  0x31   :  { %s9140_s30 = sld [smem:[%s10066_s0 + %s8949_s22]]  }
  0x32   :  { %s9145_s4 = sld [smem:[%s10066_s0 + %s8950_s28]]  }
  0x33   :  { %10090 = sst [smem:[#allocation21_spill]] %s9130_s6 }
  0x34   :  { %s9150_s6 = sld [smem:[%s10066_s0 + %s8951_s7]]  }
  0x35   :  { %10091 = sst [smem:[#allocation22_spill]] %s9135_s20 }
  0x36   :  { %s9155_s20 = sld [smem:[%s10066_s0 + %s8952_s15]]  }
  0x37   :  { %v153_v0 = vld [vmem:[%s8980_s5] sm:$0xff]  ;;  %vm157_vm0 = vcmask 261120   ;;  %v154_v1 = vld [vmem:[%s8980_s5 + $0x8] sm:$0xff] }
  0x38   :  { %76 = vsyncpa [#allocation3], 0  ;;  %v158_v2 = vsel %vm157_vm0, %v153_v0, 0.0  ;;  %v161_v3 = vsel %vm157_vm0, %v154_v1, 0.0  ;;  %v201_v14 = vld [vmem:[%s9005_s25] sm:$0xff]  ;;  %v202_v15 = vld [vmem:[%s9005_s25 + $0x8] sm:$0xff] }
  0x39   :  { %159 = vadd.xlane.f32.xlu0 %v158_v2  ;;  %v203_v16 = vld [vmem:[%s9005_s25 + $0x10] sm:$0xff]  ;;  %v8298_v17 = vpack.c.bf16 %v202_v15, %v201_v14  ;;  %v204_v18 = vld [vmem:[%s9005_s25 + $0x18] sm:$0xff]  ;;  %v7320_v27 = vld [vmem:[%s8995_s17] ss:$0 sm:$0xff]  ;;  %v8953_v36 = vmov 0.0   ;;  %vm8954_vm1 = vmmov 0  }
  0x3a   :  { %v8302_v19 = vpack.c.bf16 %v204_v18, %v203_v16  ;;  %v7321_v29 = vld [vmem:[%s9000_s21] ss:$0 sm:$0xff]  ;;  %7759 = vmatprep.subr.mxu0 %v8953_v36  ;;  %7761 = vmatprep.mubr.msk.f32.mxu0 %vm8954_vm1, %v8953_v36  ;;  %s8955_s0 = smov 88   ;;  %s8956_s5 = smov 96   ;;  %vm289_vm2 = vcmask 64512   ;;  %vm967_vm3 = vcmask 130048  }
  0x3b   :  { %8299 = vmatprep.subr.bf16.mxu1 %v8298_v17  ;;  %s8957_s17 = smov 120   ;;  %s8958_s21 = smov 112   ;;  %v151_v54 = vld [vmem:[%s8990_s13] sm:$0xff]  ;;  %vm969_vm4 = vcmask 195584   ;;  %vm9401_vm5 = vmpackc.low %vm289_vm2, %vm289_vm2  ;;  %vm3614_vm6 = vcmask 523264  }
  0x3c   :  { %8301 = vmatpush3.bf16.msra.mxu1 %v8298_v17  ;;  %s8959_s25 = smov 80   ;;  %s8960_s22 = smov 104  }
  0x3d   :  { %162 = vadd.xlane.f32.xlu0 %v161_v3  ;;  %8303 = vmatprep.subr.bf16.mxu1 %v8302_v19  ;;  %s8961_s23 = smov 72   ;;  %s8962_s26 = smov 64  }
  0x3e   :  { %s8963_s28 = smov 48   ;;  %s8964_s1 = smov 40  }
  0x3f   :  { %s8965_s2 = smov 56   ;;  %s8966_s7 = smov 8  }
  0x40   :  { %8305 = vmatpush3.bf16.msra.mxu1 %v8302_v19  ;;  %s8967_s10 = smov 16   ;;  %s8968_s11 = smov 24  }
  0x41   :  { %7749 = vmatprep.subr.mxu1 %v8953_v36  ;;  %s10103_s15 = sld [smem:[#allocation15_spill]]  ;;  %s10104_s16 = sld [smem:[#allocation13_spill]] }
  0x42   :  { %s10105_s18 = sld [smem:[#allocation14_spill]] }
  0xc6   :  { %v160_v4 = vpop.xlane.xlu0 %159 }
  0xc7   :  { %v165_v5 = vmul.f32 0.03125, %v160_v4 }
  0xc9   :  { %v167_v6 = vsub.f32 %v153_v0, %v165_v5 }
  0xca   :  { %v163_v7 = vpop.xlane.xlu0 %162 }
  0xcb   :  { %v166_v8 = vmul.f32 0.03125, %v163_v7  ;;  %v169_v9 = vmul.f32 %v167_v6, %v167_v6 }
  0xcd   :  { %v168_v10 = vsub.f32 %v154_v1, %v166_v8  ;;  %v171_v11 = vsel %vm157_vm0, %v169_v9, 0.0 }
  0xce   :  { %172 = vadd.xlane.f32.xlu1 %v171_v11 }
  0xcf   :  { %v170_v12 = vmul.f32 %v168_v10, %v168_v10 }
  0xd1   :  { %v174_v13 = vsel %vm157_vm0, %v170_v12, 0.0 }
  0xd2   :  { %175 = vadd.xlane.f32.xlu1 %v174_v13 }
 0x15b   :  { %v173_v20 = vpop.xlane.xlu1 %172 }
 0x15c   :  { %v177_v21 = vmul.f32 0.03125, %v173_v20 }
 0x15e   :  { %v179_v22 = vadd.f32 1e-06, %v177_v21 }
 0x15f   :  { %v176_v23 = vpop.xlane.xlu1 %175 }
 0x160   :  { %8732 = vrsqrt.f32 %v179_v22  ;;  %v178_v24 = vmul.f32 0.03125, %v176_v23 }
 0x162   :  { %v180_v25 = vadd.f32 1e-06, %v178_v24 }
 0x164   :  { %8734 = vrsqrt.f32 %v180_v25 }
 0x16a   :  { %v8733_v26 = vpop.eup %8732 }
 0x16b   :  { %v183_v28 = vmul.f32 %v8733_v26, %v167_v6 }
 0x16d   :  { %v191_v30 = vmul.f32 %v7320_v27, %v183_v28 }
 0x16e   :  { %v8735_v31 = vpop.eup %8734 }
 0x16f   :  { %v184_v32 = vmul.f32 %v8735_v31, %v168_v10  ;;  %v9169_v33 = vadd.f32 %v7321_v29, %v191_v30  ;;  %v152_v10 = vld [vmem:[%s8990_s13 + $0x8] sm:$0xff] }
 0x171   :  { %v192_v34 = vmul.f32 %v7320_v27, %v184_v32  ;;  %7746 = vmatprep.mubr.msk.f32.mxu1 %vm157_vm0, %v9169_v33 }
 0x173   :  { %v9173_v35 = vadd.f32 %v7321_v29, %v192_v34 }
 0x175   :  { %7747 = vmatmul.mubr.msk.f32.vlgmr.msra.gmra.mrb[0].mxu1 %vm157_vm0, %v9173_v35 }
 0x176   :  { %7751 = vmatprep.mubr.msk.f32.mxu1 %vm8954_vm1, %v8953_v36 }
 0x248   :  { %v9183_v37 = vpop.f32.mrb[0].mxu1 }
 0x249   :  { %v9185_v38 = vpop.f32.mrb[1].mxu1 }
 0x24a   :  { %455 = vrot.lane.b32.xlu1 %v9185_v38, %s8955_s0  ;;  %287 = vrot.lane.b32.xlu0 %v9185_v38, %s8956_s5 }
 0x24e   :  { %453 = vrot.lane.b32.xlu1 %v9185_v38, %s8957_s17  ;;  %620 = vrot.lane.b32.xlu0 %v9185_v38, %s8958_s21 }
 0x252   :  { %622 = vrot.lane.b32.xlu1 %v9185_v38, %s8959_s25  ;;  %787 = vrot.lane.b32.xlu0 %v9185_v38, %s8960_s22 }
 0x256   :  { %789 = vrot.lane.b32.xlu1 %v9185_v38, %s8961_s23  ;;  %1139 = vrot.lane.b32.xlu0 %v9183_v37, %s8955_s0 }
 0x25a   :  { %972 = vrot.lane.b32.xlu1 %v9183_v37, %s8956_s5  ;;  %1306 = vrot.lane.b32.xlu0 %v9183_v37, %s8959_s25 }
 0x25e   :  { %1137 = vrot.lane.b32.xlu1 %v9183_v37, %s8957_s17  ;;  %1473 = vrot.lane.b32.xlu0 %v9183_v37, %s8961_s23 }
 0x262   :  { %1304 = vrot.lane.b32.xlu1 %v9183_v37, %s8958_s21 }
 0x266   :  { %1471 = vrot.lane.b32.xlu1 %v9183_v37, %s8960_s22 }
 0x2bc   :  { %v456_v39 = vpop.permute.xlu1 %455  ;;  %v288_v40 = vpop.permute.xlu0 %287 }
 0x2bd   :  { %7750 = vmatpush3.xpose.msk.msra.mxu1 %vm289_vm2, %v288_v40  ;;  %7760 = vmatpush3.xpose.msk.msra.mxu0 %vm289_vm2, %v456_v39 }
 0x2be   :  { %7769 = vmatprep.subr.mxu0 %v8953_v36  ;;  %7754 = vmatprep.subr.mxu1 %v8953_v36 }
 0x2c0   :  { %v454_v41 = vpop.permute.xlu1 %453  ;;  %7752 = vmatmul.mubr.msk.f32.vlgmr.msra.gmra.mrb[2].mxu1 %vm289_vm2, %v9185_v38  ;;  %v621_v42 = vpop.permute.xlu0 %620 }
 0x2c1   :  { %7762 = vmatmul.mubr.msk.f32.vlgmr.msra.gmra.mrb[0].mxu0 %vm289_vm2, %v454_v41  ;;  %7756 = vmatprep.mubr.msk.f32.mxu1 %vm8954_vm1, %v8953_v36 }
 0x2c2   :  { %7771 = vmatprep.mubr.msk.f32.mxu0 %vm8954_vm1, %v8953_v36 }
 0x2c4   :  { %v623_v43 = vpop.permute.xlu1 %622  ;;  %v788_v44 = vpop.permute.xlu0 %787 }
 0x2c5   :  { %7770 = vmatpush3.xpose.msk.msra.mxu0 %vm289_vm2, %v623_v43 }
 0x2c6   :  { %7779 = vmatprep.subr.mxu0 %v8953_v36 }
 0x2c8   :  { %v790_v45 = vpop.permute.xlu1 %789  ;;  %7772 = vmatmul.mubr.msk.f32.vlgmr.msra.gmra.mrb[2].mxu0 %vm289_vm2, %v621_v42  ;;  %v1140_v46 = vpop.permute.xlu0 %1139 }
 0x2c9   :  { %7780 = vmatpush3.xpose.msk.msra.mxu0 %vm289_vm2, %v790_v45  ;;  %7781 = vmatprep.mubr.msk.f32.mxu0 %vm8954_vm1, %v8953_v36 }
 0x2ca   :  { %7789 = vmatprep.subr.mxu0 %v8953_v36 }
 0x2cc   :  { %v973_v47 = vpop.permute.xlu1 %972  ;;  %7782 = vmatmul.mubr.msk.f32.vlgmr.msra.gmra.mrb[4].mxu0 %vm289_vm2, %v788_v44  ;;  %v1307_v49 = vpop.permute.xlu0 %1306 }
 0x2cd   :  { %7790 = vmatpush3.xpose.msk.msra.mxu0 %vm289_vm2, %v973_v47  ;;  %7791 = vmatprep.mubr.msk.f32.mxu0 %vm8954_vm1, %v8953_v36 }
 0x2ce   :  { %7799 = vmatprep.subr.mxu0 %v8953_v36 }
 0x2d0   :  { %v1138_v48 = vpop.permute.xlu1 %1137  ;;  %7792 = vmatmul.mubr.msk.f32.vlgmr.msra.gmra.mrb[6].mxu0 %vm289_vm2, %v9183_v37  ;;  %v1474_v51 = vpop.permute.xlu0 %1473 }
 0x2d1   :  { %7800 = vmatpush3.xpose.msk.msra.mxu0 %vm289_vm2, %v1140_v46  ;;  %7801 = vmatprep.mubr.msk.f32.mxu0 %vm8954_vm1, %v8953_v36 }
 0x2d2   :  { %7809 = vmatprep.subr.mxu0 %v8953_v36 }
 0x2d4   :  { %7802 = vmatmul.mubr.msk.f32.vlgmr.msra.gmra.mrb[8].mxu0 %vm289_vm2, %v1138_v48  ;;  %v1305_v50 = vpop.permute.xlu1 %1304 }
 0x2d5   :  { %7810 = vmatpush3.xpose.msk.msra.mxu0 %vm289_vm2, %v1307_v49  ;;  %7811 = vmatprep.mubr.msk.f32.mxu0 %vm8954_vm1, %v8953_v36 }
 0x2d6   :  { %7819 = vmatprep.subr.mxu0 %v8953_v36 }
 0x2d8   :  { %7812 = vmatmul.mubr.msk.f32.vlgmr.msra.gmra.mrb[10].mxu0 %vm289_vm2, %v1305_v50  ;;  %v1472_v52 = vpop.permute.xlu1 %1471 }
 0x2d9   :  { %7820 = vmatpush3.xpose.msk.msra.mxu0 %vm289_vm2, %v1474_v51  ;;  %7821 = vmatprep.mubr.msk.f32.mxu0 %vm8954_vm1, %v8953_v36 }
 0x2dc   :  { %7822 = vmatmul.mubr.msk.f32.vlgmr.msra.gmra.mrb[12].mxu0 %vm289_vm2, %v1472_v52 }
 0x393   :  { %v360_v53 = vpop.f32.mrb[2].mxu1 }
 0x394   :  { %v364_v55 = vmul.f32 0.35355338, %v360_v53  ;;  %v7753_v56 = vpop.f32.mrb[3].mxu1  ;;  %v527_v57 = vpop.f32.mrb[0].mxu0 }
 0x395   :  { %v531_v58 = vmul.f32 0.35355338, %v527_v57  ;;  %v7763_v59 = vpop.f32.mrb[1].mxu0 }
 0x396   :  { %v365_v60 = vadd.f32 %v364_v55, %v151_v54 }
 0x397   :  { %v532_v61 = vadd.f32 %v531_v58, %v151_v54 }
 0x398   :  { %v366_v62 = vsel %vm289_vm2, %v365_v60, -inf }
 0x399   :  { %367 = vmax.xlane.f32.xlu0 %v366_v62  ;;  %v533_v63 = vsel %vm289_vm2, %v532_v61, -inf }
 0x39a   :  { %534 = vmax.xlane.f32.xlu1 %v533_v63 }
 0x39b   :  { %v694_v0 = vpop.f32.mrb[2].mxu0 }
 0x39c   :  { %v698_v1 = vmul.f32 0.35355338, %v694_v0  ;;  %v7773_v2 = vpop.f32.mrb[3].mxu0 }
 0x39e   :  { %v9257_v3 = vadd.f32 %v698_v1, %v151_v54 }
 0x39f   :  { %v861_v4 = vpop.f32.mrb[4].mxu0 }
 0x3a0   :  { %v865_v5 = vmul.f32 0.35355338, %v861_v4  ;;  %v7783_v6 = vpop.f32.mrb[5].mxu0  ;;  %v700_v7 = vsel %vm289_vm2, %v9257_v3, -inf }
 0x3a1   :  { %701 = vmax.xlane.f32.xlu0 %v700_v7 }
 0x3a2   :  { %v866_v8 = vadd.f32 %v865_v5, %v151_v54 }
 0x3a3   :  { %v1044_v9 = vpop.f32.mrb[6].mxu0 }
 0x3a4   :  { %v1048_v11 = vmul.f32 0.35355338, %v1044_v9  ;;  %v7793_v12 = vpop.f32.mrb[7].mxu0  ;;  %v867_v13 = vsel %vm289_vm2, %v866_v8, -inf }
 0x3a5   :  { %868 = vmax.xlane.f32.xlu0 %v867_v13 }
 0x3a6   :  { %v9263_v14 = vadd.f32 %v1048_v11, %v152_v10 }
 0x3a7   :  { %v1211_v15 = vpop.f32.mrb[8].mxu0 }
 0x3a8   :  { %v1215_v16 = vmul.f32 0.35355338, %v1211_v15  ;;  %v7803_v17 = vpop.f32.mrb[9].mxu0  ;;  %v1050_v18 = vsel %vm289_vm2, %v9263_v14, -inf }
 0x3a9   :  { %1051 = vmax.xlane.f32.xlu0 %v1050_v18 }
 0x3aa   :  { %v1216_v19 = vadd.f32 %v1215_v16, %v152_v10 }
 0x3ab   :  { %v1378_v20 = vpop.f32.mrb[10].mxu0 }
 0x3ac   :  { %v1382_v21 = vmul.f32 0.35355338, %v1378_v20  ;;  %v7813_v22 = vpop.f32.mrb[11].mxu0  ;;  %v1217_v23 = vsel %vm289_vm2, %v1216_v19, -inf }
 0x3ad   :  { %1218 = vmax.xlane.f32.xlu1 %v1217_v23 }
 0x3ae   :  { %v1383_v24 = vadd.f32 %v1382_v21, %v152_v10 }
 0x3af   :  { %v1545_v25 = vpop.f32.mrb[12].mxu0 }
 0x3b0   :  { %v7823_v26 = vpop.f32.mrb[13].mxu0  ;;  %v1384_v27 = vsel %vm289_vm2, %v1383_v24, -inf  ;;  %v1549_v28 = vmul.f32 0.35355338, %v1545_v25 }
 0x3b1   :  { %1385 = vmax.xlane.f32.xlu0 %v1384_v27 }
 0x3b2   :  { %v1550_v29 = vadd.f32 %v1549_v28, %v152_v10 }
 0x3b4   :  { %v1551_v30 = vsel %vm289_vm2, %v1550_v29, -inf }
 0x3be   :  { %377 = vrot.lane.b32.xlu1 %v9185_v38, %s8962_s26 }
 0x3e2   :  { %1552 = vmax.xlane.f32.xlu1 %v1551_v30 }
 0x3f3   :  { %711 = vrot.lane.b32.xlu1 %v9185_v38, %s8963_s28 }
 0x3f7   :  { %878 = vrot.lane.b32.xlu1 %v9185_v38, %s8964_s1 }
 0x3fb   :  { %1061 = vrot.lane.b32.xlu1 %v9183_v37, %s8962_s26 }
 0x426   :  { %v368_v31 = vpop.xlane.xlu0 %367 }
 0x427   :  { %v369_v32 = vsub.f32 %v365_v60, %v368_v31  ;;  %v535_v34 = vpop.xlane.xlu1 %534 }
 0x428   :  { %v536_v39 = vsub.f32 %v532_v61, %v535_v34 }
 0x429   :  { %v370_v40 = vmul.f32 1.442695, %v369_v32 }
 0x42a   :  { %v537_v41 = vmul.f32 1.442695, %v536_v39 }
 0x42b   :  { %8736 = vpow2.f32 %v370_v40 }
 0x42c   :  { %8738 = vpow2.f32 %v537_v41 }
 0x42e   :  { %v702_v42 = vpop.xlane.xlu0 %701 }
 0x42f   :  { %v703_v54 = vsub.f32 %v9257_v3, %v702_v42 }
 0x431   :  { %v704_v56 = vmul.f32 1.442695, %v703_v54 }
 0x432   :  { %v869_v43 = vpop.xlane.xlu0 %868 }
 0x433   :  { %v870_v44 = vsub.f32 %v866_v8, %v869_v43 }
 0x435   :  { %v8737_v45 = vpop.eup %8736  ;;  %v871_v46 = vmul.f32 1.442695, %v870_v44 }
 0x436   :  { %v9278_v47 = vpop.eup %8738  ;;  %v372_v48 = vsel %vm289_vm2, %v8737_v45, 0.0  ;;  %v1052_v55 = vpop.xlane.xlu0 %1051 }
 0x437   :  { %8740 = vpow2.f32 %v871_v46  ;;  %373 = vadd.xlane.f32.xlu0 %v372_v48  ;;  %v539_v49 = vsel %vm289_vm2, %v9278_v47, 0.0  ;;  %v1053_v57 = vsub.f32 %v9263_v14, %v1052_v55 }
 0x438   :  { %540 = vadd.xlane.f32.xlu1 %v539_v49  ;;  %8742 = vpow2.f32 %v704_v56  ;;  %v1655_v56 = vld [vmem:[%s9010_s29 + $0x10] sm:$0xff] }
 0x439   :  { %v1054_v59 = vmul.f32 1.442695, %v1053_v57  ;;  %v1656_v57 = vld [vmem:[%s9010_s29 + $0x18] sm:$0xff] }
 0x43a   :  { %v1219_v50 = vpop.xlane.xlu1 %1218 }
 0x43b   :  { %8744 = vpow2.f32 %v1054_v59  ;;  %v1220_v61 = vsub.f32 %v1216_v19, %v1219_v50  ;;  %v8310_v59 = vpack.c.bf16 %v1656_v57, %v1655_v56  ;;  %v7350_v56 = vld [vmem:[%s9015_s3] ss:$0 sm:$0xff]  ;;  %s10095_s3 = sld [smem:[#allocation6_spill]] }
 0x43d   :  { %v1221_v63 = vmul.f32 1.442695, %v1220_v61 }
 0x43e   :  { %v378_v51 = vpop.permute.xlu1 %377  ;;  %v1386_v58 = vpop.xlane.xlu0 %1385 }
 0x43f   :  { %7755 = vmatpush3.msra.mxu1 %v378_v51  ;;  %v1387_v60 = vsub.f32 %v1383_v24, %v1386_v58  ;;  %v1653_v51 = vld [vmem:[%s9010_s29] sm:$0xff] }
 0x440   :  { %7764 = vmatprep.subr.mxu1 %v8953_v36 }
 0x441   :  { %v9284_v52 = vpop.eup %8740  ;;  %v1388_v62 = vmul.f32 1.442695, %v1387_v60 }
 0x442   :  { %v873_v53 = vsel %vm289_vm2, %v9284_v52, 0.0  ;;  %v8743_v0 = vpop.eup %8742 }
 0x443   :  { %874 = vadd.xlane.f32.xlu1 %v873_v53  ;;  %8746 = vpow2.f32 %v1388_v62 }
 0x444   :  { %8748 = vpow2.f32 %v1221_v63 }
 0x445   :  { %v9295_v1 = vpop.eup %8744 }
 0x446   :  { %v1056_v3 = vsel %vm289_vm2, %v9295_v1, 0.0 }
 0x44d   :  { %544 = vrot.lane.b32.xlu0 %v9185_v38, %s8965_s2  ;;  %v706_v38 = vsel %vm289_vm2, %v8743_v0, 0.0  ;;  %v9299_v4 = vpop.eup %8746 }
 0x44e   :  { %v1390_v7 = vsel %vm289_vm2, %v9299_v4, 0.0  ;;  %v9303_v8 = vpop.eup %8748 }
 0x44f   :  { %v1223_v9 = vsel %vm289_vm2, %v9303_v8, 0.0 }
 0x454   :  { %1228 = vrot.lane.b32.xlu1 %v9183_v37, %s8965_s2 }
 0x46c   :  { %707 = vadd.xlane.f32.xlu0 %v706_v38 }
 0x46f   :  { %v1553_v2 = vpop.xlane.xlu1 %1552 }
 0x470   :  { %v1554_v5 = vsub.f32 %v1550_v29, %v1553_v2  ;;  %1057 = vadd.xlane.f32.xlu0 %v1056_v3 }
 0x472   :  { %v1555_v6 = vmul.f32 1.442695, %v1554_v5 }
 0x473   :  { %v712_v12 = vpop.permute.xlu1 %711 }
 0x474   :  { %8750 = vpow2.f32 %v1555_v6  ;;  %1391 = vadd.xlane.f32.xlu0 %v1390_v7 }
 0x477   :  { %v879_v13 = vpop.permute.xlu1 %878 }
 0x478   :  { %1224 = vadd.xlane.f32.xlu1 %v1223_v9 }
 0x47b   :  { %v1062_v14 = vpop.permute.xlu1 %1061 }
 0x47e   :  { %v9307_v10 = vpop.eup %8750 }
 0x47f   :  { %v1557_v11 = vsel %vm289_vm2, %v9307_v10, 0.0 }
 0x480   :  { %1558 = vadd.xlane.f32.xlu0 %v1557_v11 }
 0x489   :  { %1562 = vrot.lane.b32.xlu1 %v9183_v37, %s8964_s1 }
 0x496   :  { %1395 = vrot.lane.b32.xlu0 %v9183_v37, %s8963_s28 }
 0x4c4   :  { %v374_v15 = vpop.xlane.xlu0 %373 }
 0x4c5   :  { %8752 = vrcp.f32 %v374_v15  ;;  %v541_v16 = vpop.xlane.xlu1 %540 }
 0x4c6   :  { %8754 = vrcp.f32 %v541_v16 }
 0x4c8   :  { %v545_v20 = vpop.permute.xlu0 %544 }
 0x4cf   :  { %v8753_v17 = vpop.eup %8752 }
 0x4d0   :  { %v376_v18 = vmul.f32 %v8753_v17, %v8737_v45  ;;  %v8755_v19 = vpop.eup %8754  ;;  %v875_v21 = vpop.xlane.xlu1 %874 }
 0x4d1   :  { %v543_v37 = vmul.f32 %v8755_v19, %v9278_v47 }
 0x4d2   :  { %7757 = vmatmul.mubr.msk.f32.vlgmr.msra.gmra.mrb[4].mxu1 %vm289_vm2, %v376_v18 }
 0x4d3   :  { %7765 = vmatpush3.msra.mxu1 %v545_v20  ;;  %7766 = vmatprep.mubr.msk.f32.mxu1 %vm8954_vm1, %v8953_v36 }
 0x4d4   :  { %7774 = vmatprep.subr.mxu1 %v8953_v36  ;;  %v1229_v24 = vpop.permute.xlu1 %1228 }
 0x4d6   :  { %7767 = vmatmul.mubr.msk.f32.vlgmr.msra.gmra.mrb[6].mxu1 %vm289_vm2, %v543_v37 }
 0x4d7   :  { %7775 = vmatpush3.msra.mxu1 %v712_v12  ;;  %7776 = vmatprep.mubr.msk.f32.mxu1 %vm8954_vm1, %v8953_v36 }
 0x4d8   :  { %7784 = vmatprep.subr.mxu1 %v8953_v36 }
 0x4f9   :  { %v708_v22 = vpop.xlane.xlu0 %707 }
 0x4fa   :  { %8756 = vrcp.f32 %v708_v22 }
 0x4fb   :  { %8758 = vrcp.f32 %v875_v21 }
 0x4fd   :  { %v1058_v23 = vpop.xlane.xlu0 %1057 }
 0x4fe   :  { %8760 = vrcp.f32 %v1058_v23 }
 0x501   :  { %v1392_v26 = vpop.xlane.xlu0 %1391 }
 0x504   :  { %v8757_v25 = vpop.eup %8756 }
 0x505   :  { %v1225_v27 = vpop.xlane.xlu1 %1224  ;;  %v710_v28 = vmul.f32 %v8757_v25, %v8743_v0  ;;  %v8759_v29 = vpop.eup %8758 }
 0x506   :  { %8762 = vrcp.f32 %v1225_v27  ;;  %v877_v30 = vmul.f32 %v8759_v29, %v9284_v52  ;;  %v1654_v52 = vld [vmem:[%s9010_s29 + $0x8] sm:$0xff]  ;;  %v1867_v29 = vld [vmem:[%s9030_s19] sm:$0xff]  ;;  %s10094_s29 = sld [smem:[#allocation5_spill]] }
 0x507   :  { %7777 = vmatmul.mubr.msk.f32.vlgmr.msra.gmra.mrb[8].mxu1 %vm289_vm2, %v710_v28  ;;  %8764 = vrcp.f32 %v1392_v26  ;;  %v8306_v54 = vpack.c.bf16 %v1654_v52, %v1653_v51 }
 0x508   :  { %7785 = vmatpush3.msra.mxu1 %v879_v13  ;;  %7786 = vmatprep.mubr.msk.f32.mxu1 %vm8954_vm1, %v8953_v36  ;;  %v8761_v31 = vpop.eup %8760 }
 0x509   :  { %7794 = vmatprep.subr.mxu1 %v8953_v36  ;;  %v1060_v34 = vmul.f32 %v8761_v31, %v9295_v1  ;;  %v1563_v44 = vpop.permute.xlu1 %1562  ;;  %8307 = vmatprep.subr.bf16.mxu0 %v8306_v54 }
 0x50a   :  { %8309 = vmatpush3.bf16.msra.mxu0 %v8306_v54 }
 0x50b   :  { %7787 = vmatmul.mubr.msk.f32.vlgmr.msra.gmra.mrb[10].mxu1 %vm289_vm2, %v877_v30  ;;  %8311 = vmatprep.subr.bf16.mxu0 %v8310_v59  ;;  %v1868_v30 = vld [vmem:[%s9030_s19 + $0x8] sm:$0xff] }
 0x50c   :  { %7795 = vmatpush3.msra.mxu1 %v1062_v14  ;;  %7796 = vmatprep.mubr.msk.f32.mxu1 %vm8954_vm1, %v8953_v36  ;;  %v8322_v31 = vpack.c.bf16 %v1868_v30, %v1867_v29 }
 0x50d   :  { %v1559_v32 = vpop.xlane.xlu0 %1558  ;;  %7804 = vmatprep.subr.mxu1 %v8953_v36 }
 0x50e   :  { %8766 = vrcp.f32 %v1559_v32  ;;  %8313 = vmatpush3.bf16.msra.mxu0 %v8310_v59  ;;  %v1869_v32 = vld [vmem:[%s9030_s19 + $0x10] sm:$0xff] }
 0x50f   :  { %7797 = vmatmul.mubr.msk.f32.vlgmr.msra.gmra.mrb[12].mxu1 %vm289_vm2, %v1060_v34  ;;  %8323 = vmatprep.subr.bf16.mxu0 %v8322_v31  ;;  %v1870_v34 = vld [vmem:[%s9030_s19 + $0x18] sm:$0xff]  ;;  %s10098_s19 = sld [smem:[#allocation11_spill]] }
 0x510   :  { %v8763_v39 = vpop.eup %8762  ;;  %7805 = vmatpush3.msra.mxu1 %v1229_v24  ;;  %7806 = vmatprep.mubr.msk.f32.mxu1 %vm8954_vm1, %v8953_v36 }
 0x511   :  { %v1396_v40 = vpop.permute.xlu0 %1395  ;;  %7814 = vmatprep.subr.mxu1 %v8953_v36  ;;  %v1227_v41 = vmul.f32 %v8763_v39, %v9303_v8  ;;  %v8765_v42 = vpop.eup %8764  ;;  %v8326_v39 = vpack.c.bf16 %v1870_v34, %v1869_v32 }
 0x512   :  { %v1394_v43 = vmul.f32 %v8765_v42, %v9299_v4  ;;  %v1783_v42 = vld [vmem:[%s9025_s14 + $0x8] sm:$0xff] }
 0x513   :  { %7807 = vmatmul.mubr.msk.f32.vlgmr.msra.gmra.mrb[14].mxu1 %vm289_vm2, %v1227_v41  ;;  %v1782_v41 = vld [vmem:[%s9025_s14] sm:$0xff] }
 0x514   :  { %7815 = vmatpush3.msra.mxu1 %v1396_v40  ;;  %7816 = vmatprep.mubr.msk.f32.mxu1 %vm8954_vm1, %v8953_v36  ;;  %v147_v40 = vld [vmem:[%s8985_s9] sm:$0xff] }
 0x515   :  { %7824 = vmatprep.subr.mxu1 %v8953_v36 }
 0x517   :  { %7817 = vmatmul.mubr.msk.f32.vlgmr.msra.gmra.mrb[16].mxu1 %vm289_vm2, %v1394_v43  ;;  %v1784_v43 = vld [vmem:[%s9025_s14 + $0x10] sm:$0xff] }
 0x518   :  { %v8767_v45 = vpop.eup %8766  ;;  %7825 = vmatpush3.msra.mxu1 %v1563_v44  ;;  %7826 = vmatprep.mubr.msk.f32.mxu1 %vm8954_vm1, %v8953_v36  ;;  %v1785_v44 = vld [vmem:[%s9025_s14 + $0x18] sm:$0xff]  ;;  %s10097_s14 = sld [smem:[#allocation8_spill]] }
 0x519   :  { %v1561_v46 = vmul.f32 %v8767_v45, %v9307_v10  ;;  %v148_v45 = vld [vmem:[%s8985_s9 + $0x8] sm:$0xff] }
 0x51b   :  { %7827 = vmatmul.mubr.msk.f32.vlgmr.msra.gmra.mrb[18].mxu1 %vm289_vm2, %v1561_v46  ;;  %v8314_v46 = vpack.c.bf16 %v1783_v42, %v1782_v41 }
 0x51d   :  { %8315 = vmatprep.subr.bf16.mxu1 %v8314_v46 }
 0x51e   :  { %8317 = vmatpush3.bf16.msra.mxu1 %v8314_v46 }
 0x5a5   :  { %v449_v47 = vpop.f32.mrb[4].mxu1 }
 0x5a6   :  { %v7758_v48 = vpop.f32.mrb[5].mxu1 }
 0x5a7   :  { %v8969_v48 = vmov 0.0|0.0  }
 0x5a9   :  { %v616_v49 = vpop.f32.mrb[6].mxu1 }
 0x5aa   :  { %955 = vrot.lane.b32.xlu0 %v616_v49, %s8966_s7  ;;  %v7768_v50 = vpop.f32.mrb[7].mxu1 }
 0x5da   :  { %v783_v53 = vpop.f32.mrb[8].mxu1 }
 0x5db   :  { %959 = vrot.lane.b32.xlu1 %v783_v53, %s8967_s10  ;;  %v7778_v55 = vpop.f32.mrb[9].mxu1 }
 0x5de   :  { %v950_v58 = vpop.f32.mrb[10].mxu1 }
 0x5df   :  { %963 = vrot.lane.b32.xlu1 %v950_v58, %s8968_s11  ;;  %v7788_v60 = vpop.f32.mrb[11].mxu1  ;;  %v7351_v58 = vld [vmem:[%s9020_s8] ss:$0 sm:$0xff]  ;;  %s10096_s8 = sld [smem:[#allocation7_spill]] }
 0x5e2   :  { %v1133_v61 = vpop.f32.mrb[12].mxu1 }
 0x5e3   :  { %v7798_v62 = vpop.f32.mrb[13].mxu1 }
 0x5e6   :  { %v1300_v63 = vpop.f32.mrb[14].mxu1 }
 0x5e7   :  { %1639 = vrot.lane.b32.xlu0 %v1300_v63, %s8966_s7  ;;  %v7808_v0 = vpop.f32.mrb[15].mxu1 }
 0x5ea   :  { %v1467_v38 = vpop.f32.mrb[16].mxu1 }
 0x5eb   :  { %1643 = vrot.lane.b32.xlu0 %v1467_v38, %s8967_s10  ;;  %v7818_v1 = vpop.f32.mrb[17].mxu1 }
 0x5ee   :  { %v1634_v2 = vpop.f32.mrb[18].mxu1 }
 0x5ef   :  { %1647 = vrot.lane.b32.xlu1 %v1634_v2, %s8968_s11  ;;  %v7828_v3 = vpop.f32.mrb[19].mxu1 }
 0x61c   :  { %v956_v4 = vpop.permute.xlu0 %955 }
 0x61d   :  { %v966_v6 = vsel %vm289_vm2, %v449_v47, %v956_v4  ;;  %v8318_v47 = vpack.c.bf16 %v1785_v44, %v1784_v43 }
 0x61f   :  { %8319 = vmatprep.subr.bf16.mxu1 %v8318_v47 }
 0x620   :  { %8321 = vmatpush3.bf16.msra.mxu1 %v8318_v47 }
 0x621   :  { %8330 = vmatprep.subr.bf16.mxu1 %v8969_v48 }
 0x64d   :  { %v960_v5 = vpop.permute.xlu1 %959 }
 0x64e   :  { %v968_v7 = vsel %vm967_vm3, %v966_v6, %v960_v5  ;;  %v149_v5 = vld [vmem:[%s8985_s9 + $0x10] sm:$0xff]  ;;  %v150_v6 = vld [vmem:[%s8985_s9 + $0x18] sm:$0xff] }
 0x651   :  { %v964_v8 = vpop.permute.xlu1 %963 }
 0x652   :  { %v970_v9 = vsel %vm969_vm4, %v968_v7, %v964_v8 }
 0x653   :  { %7837 = vmatprep.mubr.msk.f32.mxu0 %vm157_vm0, %v970_v9 }
 0x659   :  { %v1640_v10 = vpop.permute.xlu0 %1639 }
 0x65a   :  { %v1650_v12 = vsel %vm289_vm2, %v1133_v61, %v1640_v10 }
 0x65d   :  { %v1644_v11 = vpop.permute.xlu0 %1643 }
 0x65e   :  { %v1651_v13 = vsel %vm967_vm3, %v1650_v12, %v1644_v11 }
 0x661   :  { %v1648_v14 = vpop.permute.xlu1 %1647 }
 0x662   :  { %v1652_v15 = vsel %vm969_vm4, %v1651_v13, %v1648_v14 }
 0x663   :  { %7838 = vmatmul.mubr.msk.f32.vlgmr.msra.gmra.mrb[14].mxu0 %vm157_vm0, %v1652_v15 }
 0x664   :  { %8325 = vmatpush3.bf16.msra.mxu0 %v8322_v31  ;;  %7859 = vmatprep.mubr.msk.f32.mxu0 %vm157_vm0, %v147_v40 }
 0x665   :  { %8327 = vmatprep.subr.bf16.mxu0 %v8326_v39 }
 0x668   :  { %8329 = vmatpush3.bf16.msra.mxu0 %v8326_v39 }
 0x669   :  { %8337 = vmatprep.subr.bf16.mxu0 %v8969_v48 }
 0x66b   :  { %7860 = vmatmul.mubr.msk.f32.vlgmr.msra.gmra.mrb[16].mxu0 %vm157_vm0, %v148_v45 }
 0x66c   :  { %7862 = vmatprep.mubr.msk.f32.mxu0 %vm157_vm0, %v149_v5 }
 0x66f   :  { %7863 = vmatmul.mubr.msk.f32.gmra.mrb[18].mxu0 %vm157_vm0, %v150_v6 }
 0x670   :  { %7883 = vmatprep.mubr.msk.f32.mxu0 %vm8954_vm1, %v8953_v36 }
 0x736   :  { %v7839_v16 = vpop.f32.mrb[14].mxu0 }
 0x737   :  { %v1735_v17 = vadd.f32 %v7839_v16, %v9173_v35  ;;  %v1729_v18 = vpop.f32.mrb[15].mxu0 }
 0x738   :  { %v1730_v19 = vadd.f32 %v1729_v18, %v9169_v33 }
 0x739   :  { %v1743_v20 = vsel %vm157_vm0, %v1735_v17, 0.0 }
 0x73a   :  { %1744 = vadd.xlane.f32.xlu1 %v1743_v20  ;;  %v1740_v37 = vsel %vm157_vm0, %v1730_v19, 0.0 }
 0x73b   :  { %1741 = vadd.xlane.f32.xlu0 %v1740_v37 }
 0x73e   :  { %v7861_v38 = vpop.f32.mrb[16].mxu0 }
 0x73f   :  { %v1949_v1 = vpop.f32.mrb[17].mxu0 }
 0x740   :  { %v9405_v3 = vpack.i.bf16 %v7861_v38, %v1949_v1  ;;  %v8331_v4 = vpack.c.bf16 %v7861_v38, %v1949_v1 }
 0x742   :  { %v9430_v13 = vpop.f32.mrb[18].mxu0 }
 0x743   :  { %v9432_v14 = vpop.f32.mrb[19].mxu0 }
 0x744   :  { %v9445_v37 = vpack.i.bf16 %v9430_v13, %v9432_v14 }
 0x7c7   :  { %v1745_v21 = vpop.xlane.xlu1 %1744 }
 0x7c8   :  { %v1747_v22 = vmul.f32 0.03125, %v1745_v21  ;;  %v1742_v23 = vpop.xlane.xlu0 %1741  ;;  %v8359_v21 = vpack.c.bf16 %v9430_v13, %v9432_v14 }
 0x7c9   :  { %v1746_v24 = vmul.f32 0.03125, %v1742_v23 }
 0x7ca   :  { %v1749_v25 = vsub.f32 %v1735_v17, %v1747_v22 }
 0x7cb   :  { %v1748_v35 = vsub.f32 %v1730_v19, %v1746_v24 }
 0x7cc   :  { %v1751_v27 = vmul.f32 %v1749_v25, %v1749_v25 }
 0x7cd   :  { %v1750_v26 = vmul.f32 %v1748_v35, %v1748_v35 }
 0x7ce   :  { %v1755_v28 = vsel %vm157_vm0, %v1751_v27, 0.0 }
 0x7cf   :  { %v1752_v33 = vsel %vm157_vm0, %v1750_v26, 0.0 }
 0x7d0   :  { %1753 = vadd.xlane.f32.xlu0 %v1752_v33 }
 0x7d4   :  { %1756 = vadd.xlane.f32.xlu0 %v1755_v28 }
 0x7ea   :  { %8593 = vrot.lane.b32.xlu0 %v9405_v3, %s8957_s17 }
 0x85d   :  { %v1754_v49 = vpop.xlane.xlu0 %1753 }
 0x85e   :  { %v1758_v50 = vmul.f32 0.03125, %v1754_v49 }
 0x860   :  { %v1760_v51 = vadd.f32 1e-06, %v1758_v50 }
 0x861   :  { %v1757_v52 = vpop.xlane.xlu0 %1756 }
 0x862   :  { %8768 = vrsqrt.f32 %v1760_v51  ;;  %v1759_v53 = vmul.f32 0.03125, %v1757_v52 }
 0x864   :  { %v1761_v54 = vadd.f32 1e-06, %v1759_v53 }
 0x865   :  { %v8594_v7 = vpop.permute.xlu0 %8593 }
 0x866   :  { %8770 = vrsqrt.f32 %v1761_v54  ;;  %v8596_v8 = vunpack.i.h.bf16 %v8594_v7  ;;  %v8595_v9 = vunpack.i.l.bf16 %v8594_v7 }
 0x868   :  { %v8338_v10 = vpack.c.bf16 %v8596_v8, %v8595_v9 }
 0x86a   :  { %8340 = vmatpush3.bf16.xpose.msk.msra.mxu0 %vm9401_vm5, %v8338_v10 }
 0x86b   :  { %8344 = vmatprep.subr.bf16.mxu0 %v8969_v48 }
 0x86c   :  { %v8769_v55 = vpop.eup %8768 }
 0x86d   :  { %v1764_v57 = vmul.f32 %v8769_v55, %v1748_v35 }
 0x86f   :  { %v1772_v59 = vmul.f32 %v7350_v56, %v1764_v57 }
 0x870   :  { %v8771_v60 = vpop.eup %8770 }
 0x871   :  { %v1765_v61 = vmul.f32 %v8771_v60, %v1749_v25  ;;  %v9389_v62 = vadd.f32 %v7351_v58, %v1772_v59 }
 0x873   :  { %v1773_v63 = vmul.f32 %v7350_v56, %v1765_v61  ;;  %7848 = vmatprep.mubr.msk.f32.mxu1 %vm157_vm0, %v9389_v62 }
 0x875   :  { %v9393_v0 = vadd.f32 %v7351_v58, %v1773_v63 }
 0x877   :  { %7849 = vmatmul.mubr.msk.f32.vlgmr.msra.gmra.mrb[20].mxu1 %vm157_vm0, %v9393_v0 }
 0x878   :  { %7869 = vmatprep.mubr.msk.f32.mxu1 %vm8954_vm1, %v8953_v36  ;;  %8333 = vmatpush3.bf16.xpose.msk.msra.mxu1 %vm9401_vm5, %v8331_v4 }
 0x879   :  { %8334 = vmatprep.subr.bf16.mxu1 %v8969_v48 }
 0x94a   :  { %v9421_v11 = vpop.f32.mrb[20].mxu1 }
 0x94b   :  { %v1858_v12 = vpop.f32.mrb[21].mxu1 }
 0x94c   :  { %2138 = vrot.lane.b32.xlu1 %v1858_v12, %s8957_s17  ;;  %7870 = vmatmul.mubr.msk.f32.vlgmr.msra.gmra.mrb[22].mxu1 %vm289_vm2, %v1858_v12 }
 0x94d   :  { %7876 = vmatprep.mubr.msk.f32.mxu1 %vm8954_vm1, %v8953_v36 }
 0x950   :  { %8598 = vrot.lane.b32.xlu1 %v9405_v3, %s8958_s21 }
 0x954   :  { %2311 = vrot.lane.b32.xlu1 %v1858_v12, %s8958_s21 }
 0x9be   :  { %v2139_v15 = vpop.permute.xlu1 %2138 }
 0x9bf   :  { %7884 = vmatmul.mubr.msk.f32.vlgmr.msra.gmra.mrb[20].mxu0 %vm289_vm2, %v2139_v15 }
 0x9c0   :  { %7897 = vmatprep.mubr.msk.f32.mxu0 %vm8954_vm1, %v8953_v36 }
 0x9c2   :  { %v8599_v16 = vpop.permute.xlu1 %8598 }
 0x9c3   :  { %v8601_v17 = vunpack.i.h.bf16 %v8599_v16  ;;  %v8600_v18 = vunpack.i.l.bf16 %v8599_v16 }
 0x9c5   :  { %v8345_v19 = vpack.c.bf16 %v8601_v17, %v8600_v18 }
 0x9c6   :  { %v2312_v20 = vpop.permute.xlu1 %2311 }
 0x9c7   :  { %8347 = vmatpush3.bf16.xpose.msk.msra.mxu0 %vm9401_vm5, %v8345_v19 }
 0x9c8   :  { %8355 = vmatprep.subr.bf16.mxu0 %v8969_v48 }
 0x9ce   :  { %7898 = vmatmul.mubr.msk.f32.vlgmr.msra.gmra.mrb[22].mxu0 %vm289_vm2, %v2312_v20 }
 0x9cf   :  { %7918 = vmatprep.mubr.msk.f32.mxu0 %vm8954_vm1, %v8953_v36 }
 0xa1f   :  { %v2043_v22 = vpop.f32.mrb[22].mxu1 }
 0xa20   :  { %v2047_v23 = vmul.f32 0.35355338, %v2043_v22  ;;  %v7871_v24 = vpop.f32.mrb[23].mxu1 }
 0xa22   :  { %v2048_v25 = vsel %vm967_vm3, %v2047_v23, -inf }
 0xa23   :  { %2049 = vmax.xlane.f32.xlu0 %v2048_v25 }
 0xa92   :  { %v2216_v35 = vpop.f32.mrb[20].mxu0 }
 0xa93   :  { %v2220_v26 = vmul.f32 0.35355338, %v2216_v35  ;;  %v7885_v33 = vpop.f32.mrb[21].mxu0 }
 0xa95   :  { %v2221_v27 = vsel %vm967_vm3, %v2220_v26, -inf }
 0xa96   :  { %2222 = vmax.xlane.f32.xlu1 %v2221_v27 }
 0xaa1   :  { %v2389_v28 = vpop.f32.mrb[22].mxu0 }
 0xaa2   :  { %v2393_v29 = vmul.f32 0.35355338, %v2389_v28  ;;  %v7899_v30 = vpop.f32.mrb[23].mxu0 }
 0xaa4   :  { %v2394_v31 = vsel %vm967_vm3, %v2393_v29, -inf }
 0xaa5   :  { %2395 = vmax.xlane.f32.xlu0 %v2394_v31 }
 0xaa7   :  { %8608 = vrot.lane.b32.xlu1 %v9405_v3, %s8955_s0 }
 0xaab   :  { %8613 = vrot.lane.b32.xlu1 %v9405_v3, %s8959_s25 }
 0xab0   :  { %v2050_v32 = vpop.xlane.xlu0 %2049 }
 0xab1   :  { %v2051_v34 = vsub.f32 %v2047_v23, %v2050_v32 }
 0xab3   :  { %v2052_v39 = vmul.f32 1.442695, %v2051_v34 }
 0xab5   :  { %8772 = vpow2.f32 %v2052_v39 }
 0xabf   :  { %v8773_v40 = vpop.eup %8772 }
 0xac0   :  { %v2054_v41 = vsel %vm967_vm3, %v8773_v40, 0.0 }
 0xac1   :  { %2055 = vadd.xlane.f32.xlu0 %v2054_v41 }
 0xb23   :  { %v2223_v42 = vpop.xlane.xlu1 %2222 }
 0xb24   :  { %v2224_v43 = vsub.f32 %v2220_v26, %v2223_v42 }
 0xb26   :  { %v2225_v44 = vmul.f32 1.442695, %v2224_v43 }
 0xb27   :  { %v8609_v55 = vpop.permute.xlu1 %8608 }
 0xb28   :  { %8774 = vpow2.f32 %v2225_v44  ;;  %v8611_v60 = vunpack.i.h.bf16 %v8609_v55  ;;  %v8610_v61 = vunpack.i.l.bf16 %v8609_v55 }
 0xb2a   :  { %v8342_v5 = vpack.c.bf16 %v8611_v60, %v8610_v61 }
 0xb2b   :  { %v8614_v38 = vpop.permute.xlu1 %8613 }
 0xb2c   :  { %v8616_v6 = vunpack.i.h.bf16 %v8614_v38  ;;  %v8615_v7 = vunpack.i.l.bf16 %v8614_v38 }
 0xb2e   :  { %v8349_v9 = vpack.c.bf16 %v8616_v6, %v8615_v7 }
 0xb32   :  { %v8775_v45 = vpop.eup %8774  ;;  %v2396_v46 = vpop.xlane.xlu0 %2395 }
 0xb33   :  { %v2397_v47 = vsub.f32 %v2393_v29, %v2396_v46  ;;  %v2227_v49 = vsel %vm967_vm3, %v8775_v45, 0.0 }
 0xb34   :  { %2228 = vadd.xlane.f32.xlu0 %v2227_v49 }
 0xb35   :  { %v2398_v50 = vmul.f32 1.442695, %v2397_v47 }
 0xb37   :  { %8776 = vpow2.f32 %v2398_v50 }
 0xb41   :  { %v8777_v51 = vpop.eup %8776 }
 0xb42   :  { %v2400_v52 = vsel %vm967_vm3, %v8777_v51, 0.0 }
 0xb43   :  { %2401 = vadd.xlane.f32.xlu1 %v2400_v52 }
 0xb4a   :  { %8603 = vrot.lane.b32.xlu0 %v9405_v3, %s8956_s5 }
 0xb4e   :  { %2484 = vrot.lane.b32.xlu0 %v1858_v12, %s8960_s22  ;;  %v2056_v53 = vpop.xlane.xlu0 %2055 }
 0xb4f   :  { %8778 = vrcp.f32 %v2056_v53 }
 0xb54   :  { %8618 = vrot.lane.b32.xlu1 %v9405_v3, %s8960_s22 }
 0xb59   :  { %v8779_v59 = vpop.eup %8778 }
 0xb5a   :  { %v2058_v1 = vmul.f32 %v8779_v59, %v8773_v40 }
 0xbc1   :  { %v2229_v54 = vpop.xlane.xlu0 %2228 }
 0xbc2   :  { %8780 = vrcp.f32 %v2229_v54 }
 0xbc5   :  { %v8604_v56 = vpop.permute.xlu0 %8603 }
 0xbc6   :  { %v8606_v57 = vunpack.i.h.bf16 %v8604_v56  ;;  %v8605_v58 = vunpack.i.l.bf16 %v8604_v56 }
 0xbc8   :  { %v8335_v63 = vpack.c.bf16 %v8606_v57, %v8605_v58 }
 0xbc9   :  { %v2485_v20 = vpop.permute.xlu0 %2484 }
 0xbca   :  { %8336 = vmatpush3.bf16.msra.mxu1 %v8335_v63 }
 0xbcb   :  { %8341 = vmatprep.subr.bf16.mxu1 %v8969_v48 }
 0xbcc   :  { %v8781_v4 = vpop.eup %8780 }
 0xbcd   :  { %7877 = vmatmul.mubr.msk.f32.vlgmr.msra.gmra.mrb[24].mxu1 %vm967_vm3, %v2058_v1  ;;  %v2231_v8 = vmul.f32 %v8781_v4, %v8775_v45 }
 0xbce   :  { %8343 = vmatpush3.bf16.msra.mxu1 %v8342_v5  ;;  %7890 = vmatprep.mubr.msk.f32.mxu1 %vm8954_vm1, %v8953_v36 }
 0xbcf   :  { %8348 = vmatprep.subr.bf16.mxu1 %v8969_v48 }
 0xbd0   :  { %v2402_v10 = vpop.xlane.xlu1 %2401 }
 0xbd1   :  { %8782 = vrcp.f32 %v2402_v10  ;;  %7891 = vmatmul.mubr.msk.f32.vlgmr.msra.gmra.mrb[26].mxu1 %vm967_vm3, %v2231_v8 }
 0xbd2   :  { %8350 = vmatpush3.bf16.msra.mxu1 %v8349_v9  ;;  %7904 = vmatprep.mubr.msk.f32.mxu1 %vm8954_vm1, %v8953_v36 }
 0xbd3   :  { %8351 = vmatprep.subr.bf16.mxu1 %v8969_v48 }
 0xbd4   :  { %v8619_v12 = vpop.permute.xlu1 %8618 }
 0xbd5   :  { %v8621_v15 = vunpack.i.h.bf16 %v8619_v12  ;;  %v8620_v16 = vunpack.i.l.bf16 %v8619_v12 }
 0xbd7   :  { %v8352_v19 = vpack.c.bf16 %v8621_v15, %v8620_v16 }
 0xbdb   :  { %v8783_v17 = vpop.eup %8782 }
 0xbdc   :  { %v2404_v18 = vmul.f32 %v8783_v17, %v8777_v51 }
 0xbde   :  { %7905 = vmatmul.mubr.msk.f32.vlgmr.msra.gmra.mrb[28].mxu1 %vm967_vm3, %v2404_v18 }
 0xbdf   :  { %8354 = vmatpush3.bf16.xpose.msk.msra.mxu1 %vm9401_vm5, %v8352_v19  ;;  %7911 = vmatprep.mubr.msk.f32.mxu1 %vm8954_vm1, %v8953_v36 }
 0xbe0   :  { %8362 = vmatprep.subr.bf16.mxu1 %v8969_v48 }
 0xbe6   :  { %7912 = vmatmul.mubr.msk.f32.vlgmr.msra.gmra.mrb[30].mxu1 %vm289_vm2, %v2485_v20 }
 0xbe7   :  { %7932 = vmatprep.mubr.msk.f32.mxu1 %vm8954_vm1, %v8953_v36 }
 0xca0   :  { %v9482_v22 = vpop.f32.mrb[24].mxu1 }
 0xca1   :  { %v7878_v23 = vpop.f32.mrb[25].mxu1 }
 0xca4   :  { %v9484_v24 = vpop.f32.mrb[26].mxu1 }
 0xca5   :  { %v7892_v25 = vpop.f32.mrb[27].mxu1 }
 0xcb1   :  { %v9486_v35 = vpop.f32.mrb[28].mxu1 }
 0xcb2   :  { %v7906_v26 = vpop.f32.mrb[29].mxu1 }
 0xcb9   :  { %v2562_v33 = vpop.f32.mrb[30].mxu1 }
 0xcba   :  { %v2566_v27 = vmul.f32 0.35355338, %v2562_v33  ;;  %v7913_v28 = vpop.f32.mrb[31].mxu1 }
 0xcbc   :  { %v2567_v29 = vsel %vm967_vm3, %v2566_v27, -inf }
 0xcbd   :  { %2568 = vmax.xlane.f32.xlu1 %v2567_v29 }
 0xd4a   :  { %v2569_v30 = vpop.xlane.xlu1 %2568 }
 0xd4b   :  { %v2570_v31 = vsub.f32 %v2566_v27, %v2569_v30 }
 0xd4d   :  { %v2571_v32 = vmul.f32 1.442695, %v2570_v31 }
 0xd4f   :  { %8784 = vpow2.f32 %v2571_v32 }
 0xd59   :  { %v8785_v34 = vpop.eup %8784 }
 0xd5a   :  { %v2573_v39 = vsel %vm967_vm3, %v8785_v34, 0.0 }
 0xd5b   :  { %2574 = vadd.xlane.f32.xlu0 %v2573_v39 }
 0xd71   :  { %8623 = vrot.lane.b32.xlu0 %v9405_v3, %s8961_s23 }
 0xd75   :  { %8633 = vrot.lane.b32.xlu0 %v9445_v37, %s8957_s17 }
 0xd79   :  { %2842 = vrot.lane.b32.xlu0 %v9421_v11, %s8957_s17 }
 0xde8   :  { %v2575_v40 = vpop.xlane.xlu0 %2574 }
 0xde9   :  { %8786 = vrcp.f32 %v2575_v40 }
 0xdec   :  { %v8624_v41 = vpop.permute.xlu0 %8623 }
 0xded   :  { %v8626_v42 = vunpack.i.h.bf16 %v8624_v41  ;;  %v8625_v43 = vunpack.i.l.bf16 %v8624_v41 }
 0xdef   :  { %v8356_v44 = vpack.c.bf16 %v8626_v42, %v8625_v43 }
 0xdf0   :  { %v8634_v60 = vpop.permute.xlu0 %8633 }
 0xdf1   :  { %8357 = vmatpush3.bf16.msra.mxu0 %v8356_v44  ;;  %v8636_v63 = vunpack.i.h.bf16 %v8634_v60  ;;  %v8635_v38 = vunpack.i.l.bf16 %v8634_v60 }
 0xdf2   :  { %8358 = vmatprep.subr.bf16.mxu0 %v8969_v48 }
 0xdf3   :  { %v8787_v45 = vpop.eup %8786  ;;  %v8366_v4 = vpack.c.bf16 %v8636_v63, %v8635_v38 }
 0xdf4   :  { %v2577_v46 = vmul.f32 %v8787_v45, %v8785_v34  ;;  %v2843_v5 = vpop.permute.xlu0 %2842 }
 0xdf6   :  { %7919 = vmatmul.mubr.msk.f32.vlgmr.msra.gmra.mrb[24].mxu0 %vm967_vm3, %v2577_v46 }
 0xdf7   :  { %7925 = vmatprep.mubr.msk.f32.mxu0 %vm8954_vm1, %v8953_v36 }
 0xdfa   :  { %8361 = vmatpush3.bf16.xpose.msk.msra.mxu0 %vm9401_vm5, %v8359_v21 }
 0xdfb   :  { %8369 = vmatprep.subr.bf16.mxu0 %v8969_v48 }
 0xe01   :  { %7926 = vmatmul.mubr.msk.f32.vlgmr.msra.gmra.mrb[26].mxu0 %vm289_vm2, %v9421_v11 }
 0xe02   :  { %7946 = vmatprep.mubr.msk.f32.mxu0 %vm8954_vm1, %v8953_v36 }
 0xec9   :  { %v9510_v3 = vpop.f32.mrb[24].mxu0 }
 0xeca   :  { %v7920_v47 = vpop.f32.mrb[25].mxu0 }
 0xed4   :  { %v2747_v49 = vpop.f32.mrb[26].mxu0 }
 0xed5   :  { %v2751_v50 = vmul.f32 0.35355338, %v2747_v49  ;;  %v7927_v51 = vpop.f32.mrb[27].mxu0 }
 0xed7   :  { %v2752_v52 = vsel %vm967_vm3, %v2751_v50, -inf }
 0xed8   :  { %2753 = vmax.xlane.f32.xlu1 %v2752_v52 }
 0xf65   :  { %v2754_v13 = vpop.xlane.xlu1 %2753 }
 0xf66   :  { %v2755_v14 = vsub.f32 %v2751_v50, %v2754_v13 }
 0xf68   :  { %v2756_v21 = vmul.f32 1.442695, %v2755_v14 }
 0xf6a   :  { %8788 = vpow2.f32 %v2756_v21 }
 0xf74   :  { %v8789_v53 = vpop.eup %8788 }
 0xf75   :  { %v2758_v54 = vsel %vm967_vm3, %v8789_v53, 0.0 }
 0xf76   :  { %2759 = vadd.xlane.f32.xlu1 %v2758_v54 }
 0xf87   :  { %8628 = vrot.lane.b32.xlu1 %v9445_v37, %s8956_s5 }
0x1003   :  { %v2760_v55 = vpop.xlane.xlu1 %2759 }
0x1004   :  { %8790 = vrcp.f32 %v2760_v55 }
0x1007   :  { %v8629_v56 = vpop.permute.xlu1 %8628 }
0x1008   :  { %v8631_v57 = vunpack.i.h.bf16 %v8629_v56  ;;  %v8630_v58 = vunpack.i.l.bf16 %v8629_v56 }
0x100a   :  { %v8363_v59 = vpack.c.bf16 %v8631_v57, %v8630_v58 }
0x100c   :  { %8364 = vmatpush3.bf16.msra.mxu1 %v8363_v59 }
0x100d   :  { %8365 = vmatprep.subr.bf16.mxu1 %v8969_v48 }
0x100e   :  { %v8791_v61 = vpop.eup %8790 }
0x100f   :  { %v2762_v1 = vmul.f32 %v8791_v61, %v8789_v53 }
0x1011   :  { %7933 = vmatmul.mubr.msk.f32.vlgmr.msra.gmra.mrb[32].mxu1 %vm967_vm3, %v2762_v1 }
0x1012   :  { %7939 = vmatprep.mubr.msk.f32.mxu1 %vm8954_vm1, %v8953_v36 }
0x1015   :  { %8368 = vmatpush3.bf16.xpose.msk.msra.mxu1 %vm9401_vm5, %v8366_v4 }
0x1016   :  { %8376 = vmatprep.subr.bf16.mxu1 %v8969_v48 }
0x101c   :  { %7940 = vmatmul.mubr.msk.f32.vlgmr.msra.gmra.mrb[34].mxu1 %vm289_vm2, %v2843_v5 }
0x101d   :  { %7960 = vmatprep.mubr.msk.f32.mxu1 %vm8954_vm1, %v8953_v36 }
0x10e4   :  { %v9526_v6 = vpop.f32.mrb[32].mxu1 }
0x10e5   :  { %v7934_v7 = vpop.f32.mrb[33].mxu1 }
0x10ef   :  { %v2920_v8 = vpop.f32.mrb[34].mxu1 }
0x10f0   :  { %v2924_v9 = vmul.f32 0.35355338, %v2920_v8  ;;  %v7941_v10 = vpop.f32.mrb[35].mxu1 }
0x10f2   :  { %v2925_v12 = vsel %vm967_vm3, %v2924_v9, -inf }
0x10f3   :  { %2926 = vmax.xlane.f32.xlu1 %v2925_v12 }
0x1104   :  { %8643 = vrot.lane.b32.xlu1 %v9445_v37, %s8958_s21 }
0x1108   :  { %3015 = vrot.lane.b32.xlu1 %v9421_v11, %s8958_s21 }
0x1180   :  { %v2927_v15 = vpop.xlane.xlu1 %2926 }
0x1181   :  { %v2928_v16 = vsub.f32 %v2924_v9, %v2927_v15 }
0x1183   :  { %v2929_v17 = vmul.f32 1.442695, %v2928_v16 }
0x1184   :  { %v8644_v27 = vpop.permute.xlu1 %8643 }
0x1185   :  { %8792 = vpow2.f32 %v2929_v17  ;;  %v8646_v29 = vunpack.i.h.bf16 %v8644_v27  ;;  %v8645_v30 = vunpack.i.l.bf16 %v8644_v27 }
0x1187   :  { %v8373_v32 = vpack.c.bf16 %v8646_v29, %v8645_v30 }
0x1188   :  { %v3016_v34 = vpop.permute.xlu1 %3015 }
0x118f   :  { %v8793_v18 = vpop.eup %8792 }
0x1190   :  { %v2931_v19 = vsel %vm967_vm3, %v8793_v18, 0.0 }
0x1191   :  { %2932 = vadd.xlane.f32.xlu0 %v2931_v19 }
0x11a7   :  { %8638 = vrot.lane.b32.xlu0 %v9445_v37, %s8955_s0 }
0x121e   :  { %v2933_v20 = vpop.xlane.xlu0 %2932 }
0x121f   :  { %8794 = vrcp.f32 %v2933_v20 }
0x1222   :  { %v8639_v23 = vpop.permute.xlu0 %8638 }
0x1223   :  { %v8641_v25 = vunpack.i.h.bf16 %v8639_v23  ;;  %v8640_v26 = vunpack.i.l.bf16 %v8639_v23 }
0x1225   :  { %v8370_v33 = vpack.c.bf16 %v8641_v25, %v8640_v26  ;;  %v3376_v25 = vld [vmem:[%s9035_s24] sm:$0xff]  ;;  %v3377_v26 = vld [vmem:[%s9035_s24 + $0x8] sm:$0xff] }
0x1226   :  { %v8386_v27 = vpack.c.bf16 %v3377_v26, %v3376_v25  ;;  %v3605_v25 = vld [vmem:[%s9060_s27 + $0x30] sm:$0xff]  ;;  %v3606_v26 = vld [vmem:[%s9060_s27 + $0x38] sm:$0xff] }
0x1227   :  { %8371 = vmatpush3.bf16.msra.mxu0 %v8370_v33  ;;  %v3378_v33 = vld [vmem:[%s9035_s24 + $0x10] sm:$0xff] }
0x1228   :  { %8372 = vmatprep.subr.bf16.mxu0 %v8969_v48 }
0x1229   :  { %v8795_v28 = vpop.eup %8794 }
0x122a   :  { %v2935_v31 = vmul.f32 %v8795_v28, %v8793_v18  ;;  %v3379_v28 = vld [vmem:[%s9035_s24 + $0x18] sm:$0xff]  ;;  %s10099_s24 = sld [smem:[#allocation9_spill]] }
0x122b   :  { %v8390_v29 = vpack.c.bf16 %v3379_v28, %v3378_v33  ;;  %v8414_v33 = vpack.c.bf16 %v3606_v26, %v3605_v25 }
0x122c   :  { %7947 = vmatmul.mubr.msk.f32.vlgmr.msra.gmra.mrb[28].mxu0 %vm967_vm3, %v2935_v31 }
0x122d   :  { %7953 = vmatprep.mubr.msk.f32.mxu0 %vm8954_vm1, %v8953_v36 }
0x1230   :  { %8375 = vmatpush3.bf16.xpose.msk.msra.mxu0 %vm9401_vm5, %v8373_v32 }
0x1231   :  { %8383 = vmatprep.subr.bf16.mxu0 %v8969_v48 }
0x1237   :  { %7954 = vmatmul.mubr.msk.f32.vlgmr.msra.gmra.mrb[30].mxu0 %vm289_vm2, %v3016_v34 }
0x1238   :  { %7974 = vmatprep.mubr.msk.f32.mxu0 %vm8954_vm1, %v8953_v36 }
0x12ff   :  { %v3011_v39 = vpop.f32.mrb[28].mxu0 }
0x1300   :  { %v7948_v40 = vpop.f32.mrb[29].mxu0 }
0x130a   :  { %v3093_v41 = vpop.f32.mrb[30].mxu0 }
0x130b   :  { %v3097_v42 = vmul.f32 0.35355338, %v3093_v41  ;;  %v7955_v43 = vpop.f32.mrb[31].mxu0 }
0x130d   :  { %v3098_v44 = vsel %vm967_vm3, %v3097_v42, -inf }
0x130e   :  { %3099 = vmax.xlane.f32.xlu0 %v3098_v44 }
0x1324   :  { %8648 = vrot.lane.b32.xlu0 %v9445_v37, %s8959_s25 }
0x1328   :  { %3188 = vrot.lane.b32.xlu0 %v9421_v11, %s8960_s22 }
0x139b   :  { %v3100_v45 = vpop.xlane.xlu0 %3099 }
0x139c   :  { %v3101_v46 = vsub.f32 %v3097_v42, %v3100_v45 }
0x139e   :  { %v3102_v47 = vmul.f32 1.442695, %v3101_v46 }
0x139f   :  { %v8649_v49 = vpop.permute.xlu0 %8648 }
0x13a0   :  { %8796 = vpow2.f32 %v3102_v47  ;;  %v8651_v50 = vunpack.i.h.bf16 %v8649_v49  ;;  %v8650_v51 = vunpack.i.l.bf16 %v8649_v49 }
0x13a2   :  { %v8377_v52 = vpack.c.bf16 %v8651_v50, %v8650_v51 }
0x13a3   :  { %v3189_v58 = vpop.permute.xlu0 %3188 }
0x13a4   :  { %8378 = vmatpush3.bf16.msra.mxu1 %v8377_v52 }
0x13a5   :  { %8379 = vmatprep.subr.bf16.mxu1 %v8969_v48 }
0x13aa   :  { %v8797_v13 = vpop.eup %8796 }
0x13ab   :  { %v3104_v14 = vsel %vm967_vm3, %v8797_v13, 0.0 }
0x13ac   :  { %3105 = vadd.xlane.f32.xlu1 %v3104_v14 }
0x13bd   :  { %8653 = vrot.lane.b32.xlu1 %v9445_v37, %s8960_s22 }
0x1439   :  { %v3106_v21 = vpop.xlane.xlu1 %3105 }
0x143a   :  { %8798 = vrcp.f32 %v3106_v21 }
0x143d   :  { %v8654_v11 = vpop.permute.xlu1 %8653 }
0x143e   :  { %v8656_v53 = vunpack.i.h.bf16 %v8654_v11  ;;  %v8655_v54 = vunpack.i.l.bf16 %v8654_v11  ;;  %v3505_v11 = vld [vmem:[%s9050_s12] sm:$0xff] }
0x1440   :  { %v8380_v57 = vpack.c.bf16 %v8656_v53, %v8655_v54  ;;  %v3506_v53 = vld [vmem:[%s9050_s12 + $0x8] sm:$0xff]  ;;  %v3507_v54 = vld [vmem:[%s9050_s12 + $0x10] sm:$0xff] }
0x1444   :  { %v8799_v55 = vpop.eup %8798 }
0x1445   :  { %v3108_v56 = vmul.f32 %v8799_v55, %v8797_v13  ;;  %v8394_v55 = vpack.c.bf16 %v3506_v53, %v3505_v11  ;;  %v3743_v11 = vld [vmem:[%s10098_s19 + $0x8] sm:$0xff]  ;;  %v3744_v53 = vld [vmem:[%s10098_s19 + $0x10] sm:$0xff] }
0x1447   :  { %7961 = vmatmul.mubr.msk.f32.vlgmr.msra.gmra.mrb[36].mxu1 %vm967_vm3, %v3108_v56  ;;  %v3508_v56 = vld [vmem:[%s9050_s12 + $0x18] sm:$0xff]  ;;  %s10100_s12 = sld [smem:[#allocation10_spill]] }
0x1448   :  { %8382 = vmatpush3.bf16.xpose.msk.msra.mxu1 %vm9401_vm5, %v8380_v57  ;;  %7967 = vmatprep.mubr.msk.f32.mxu1 %vm8954_vm1, %v8953_v36  ;;  %v8398_v57 = vpack.c.bf16 %v3508_v56, %v3507_v54 }
0x1449   :  { %8395 = vmatprep.subr.bf16.mxu1 %v8394_v55 }
0x144f   :  { %7968 = vmatmul.mubr.msk.f32.vlgmr.msra.gmra.mrb[38].mxu1 %vm289_vm2, %v3189_v58  ;;  %v3599_v58 = vld [vmem:[%s9060_s27] sm:$0xff] }
0x1450   :  { %8397 = vmatpush3.bf16.msra.mxu1 %v8394_v55  ;;  %v3745_v55 = vld [vmem:[%s10098_s19 + $0x18] sm:$0xff] }
0x1451   :  { %8399 = vmatprep.subr.bf16.mxu1 %v8398_v57  ;;  %v8422_v56 = vpack.c.bf16 %v3745_v55, %v3744_v53 }
0x1454   :  { %8401 = vmatpush3.bf16.msra.mxu1 %v8398_v57 }
0x151a   :  { %v3184_v59 = vpop.f32.mrb[36].mxu1 }
0x151b   :  { %v7962_v60 = vpop.f32.mrb[37].mxu1 }
0x151c   :  { %v3601_v60 = vld [vmem:[%s9060_s27 + $0x10] sm:$0xff] }
0x1522   :  { %v3266_v61 = vpop.f32.mrb[38].mxu1 }
0x1523   :  { %v3270_v63 = vmul.f32 0.35355338, %v3266_v61  ;;  %v7969_v38 = vpop.f32.mrb[39].mxu1 }
0x1525   :  { %v3271_v1 = vsel %vm967_vm3, %v3270_v63, -inf }
0x1526   :  { %3272 = vmax.xlane.f32.xlu1 %v3271_v1  ;;  %v3603_v1 = vld [vmem:[%s9060_s27 + $0x20] sm:$0xff] }
0x1537   :  { %2658 = vrot.lane.b32.xlu1 %v9484_v24, %s8966_s7 }
0x153b   :  { %2662 = vrot.lane.b32.xlu1 %v9486_v35, %s8967_s10 }
0x153f   :  { %2666 = vrot.lane.b32.xlu1 %v9510_v3, %s8968_s11 }
0x15b3   :  { %v3273_v4 = vpop.xlane.xlu1 %3272 }
0x15b4   :  { %v3274_v5 = vsub.f32 %v3270_v63, %v3273_v4  ;;  %v3602_v63 = vld [vmem:[%s9060_s27 + $0x18] sm:$0xff]  ;;  %v3604_v4 = vld [vmem:[%s9060_s27 + $0x28] sm:$0xff] }
0x15b5   :  { %v8406_v38 = vpack.c.bf16 %v3602_v63, %v3601_v60 }
0x15b6   :  { %v3275_v7 = vmul.f32 1.442695, %v3274_v5  ;;  %v8410_v5 = vpack.c.bf16 %v3604_v4, %v3603_v1  ;;  %v7400_v1 = vld [vmem:[%s10099_s24] ss:$0 sm:$0xff] }
0x15b7   :  { %v2659_v24 = vpop.permute.xlu1 %2658 }
0x15b8   :  { %8800 = vpow2.f32 %v3275_v7 }
0x15bb   :  { %v2663_v10 = vpop.permute.xlu1 %2662 }
0x15bf   :  { %v2667_v18 = vpop.permute.xlu1 %2666 }
0x15c2   :  { %v8801_v8 = vpop.eup %8800 }
0x15c3   :  { %v3277_v9 = vsel %vm967_vm3, %v8801_v8, 0.0 }
0x15c4   :  { %3278 = vadd.xlane.f32.xlu0 %v3277_v9 }
0x15da   :  { %8658 = vrot.lane.b32.xlu0 %v9445_v37, %s8961_s23  ;;  %v2669_v37 = vsel %vm289_vm2, %v9482_v22, %v2659_v24 }
0x15db   :  { %v2670_v20 = vsel %vm967_vm3, %v2669_v37, %v2663_v10 }
0x15dc   :  { %v2671_v23 = vsel %vm969_vm4, %v2670_v20, %v2667_v18 }
0x15de   :  { %3362 = vrot.lane.b32.xlu0 %v3011_v39, %s8966_s7 }
0x15e2   :  { %3366 = vrot.lane.b32.xlu0 %v3184_v59, %s8967_s10  ;;  %v3600_v59 = vld [vmem:[%s9060_s27 + $0x8] sm:$0xff]  ;;  %s10102_s27 = sld [smem:[#allocation16_spill]] }
0x15e3   :  { %v8402_v61 = vpack.c.bf16 %v3600_v59, %v3599_v58 }
0x1651   :  { %v3279_v35 = vpop.xlane.xlu0 %3278 }
0x1652   :  { %8802 = vrcp.f32 %v3279_v35 }
0x1655   :  { %v8659_v3 = vpop.permute.xlu0 %8658 }
0x1656   :  { %v8661_v12 = vunpack.i.h.bf16 %v8659_v3  ;;  %v8660_v15 = vunpack.i.l.bf16 %v8659_v3 }
0x1658   :  { %v8384_v16 = vpack.c.bf16 %v8661_v12, %v8660_v15  ;;  %v7392_v12 = vld [vmem:[%s10094_s29] ss:$0 sm:$0xff] }
0x1659   :  { %v3363_v31 = vpop.permute.xlu0 %3362 }
0x165a   :  { %8385 = vmatpush3.bf16.msra.mxu0 %v8384_v16  ;;  %v3373_v34 = vsel %vm289_vm2, %v9526_v6, %v3363_v31  ;;  %v7393_v16 = vld [vmem:[%s10095_s3] ss:$0 sm:$0xff] }
0x165b   :  { %8387 = vmatprep.subr.bf16.mxu0 %v8386_v27 }
0x165c   :  { %v8803_v17 = vpop.eup %8802 }
0x165d   :  { %v3281_v19 = vmul.f32 %v8803_v17, %v8801_v8  ;;  %v3367_v32 = vpop.permute.xlu0 %3366 }
0x165e   :  { %v3374_v39 = vsel %vm967_vm3, %v3373_v34, %v3367_v32  ;;  %v7397_v34 = vld [vmem:[%s10097_s14] ss:$0 sm:$0xff] }
0x165f   :  { %7975 = vmatmul.mubr.msk.f32.vlgmr.msra.gmra.mrb[32].mxu0 %vm967_vm3, %v3281_v19 }
0x1660   :  { %7985 = vmatprep.mubr.msk.f32.mxu0 %vm157_vm0, %v2671_v23  ;;  %8389 = vmatpush3.bf16.msra.mxu0 %v8386_v27  ;;  %v7394_v27 = vld [vmem:[%s10096_s8] ss:$0 sm:$0xff] }
0x1661   :  { %8391 = vmatprep.subr.bf16.mxu0 %v8390_v29 }
0x1664   :  { %8393 = vmatpush3.bf16.msra.mxu0 %v8390_v29 }
0x1665   :  { %8403 = vmatprep.subr.bf16.mxu0 %v8402_v61 }
0x1732   :  { %v3357_v22 = vpop.f32.mrb[32].mxu0 }
0x1733   :  { %3370 = vrot.lane.b32.xlu1 %v3357_v22, %s8968_s11  ;;  %v7976_v30 = vpop.f32.mrb[33].mxu0 }
0x17a5   :  { %v3371_v40 = vpop.permute.xlu1 %3370 }
0x17a6   :  { %v3375_v41 = vsel %vm969_vm4, %v3374_v39, %v3371_v40 }
0x17a7   :  { %7986 = vmatmul.mubr.msk.f32.vlgmr.msra.gmra.mrb[34].mxu0 %vm157_vm0, %v3375_v41 }
0x17a8   :  { %8405 = vmatpush3.bf16.msra.mxu0 %v8402_v61 }
0x17a9   :  { %8407 = vmatprep.subr.bf16.mxu0 %v8406_v38 }
0x17ac   :  { %8409 = vmatpush3.bf16.msra.mxu0 %v8406_v38 }
0x17ad   :  { %8411 = vmatprep.subr.bf16.mxu0 %v8410_v5 }
0x17b0   :  { %8413 = vmatpush3.bf16.msra.mxu0 %v8410_v5 }
0x17b1   :  { %8415 = vmatprep.subr.bf16.mxu0 %v8414_v33 }
0x17b4   :  { %8417 = vmatpush3.bf16.msra.mxu0 %v8414_v33 }
0x17b5   :  { %8039 = vmatprep.subr.mxu0 %v8953_v36 }
0x187a   :  { %v7987_v42 = vpop.f32.mrb[34].mxu0 }
0x187b   :  { %v3458_v43 = vadd.f32 %v7987_v42, %v9393_v0  ;;  %v3452_v44 = vpop.f32.mrb[35].mxu0 }
0x187c   :  { %v3453_v45 = vadd.f32 %v3452_v44, %v9389_v62 }
0x187d   :  { %v3466_v46 = vsel %vm157_vm0, %v3458_v43, 0.0 }
0x187e   :  { %3467 = vadd.xlane.f32.xlu1 %v3466_v46  ;;  %v3463_v6 = vsel %vm157_vm0, %v3453_v45, 0.0 }
0x187f   :  { %3464 = vadd.xlane.f32.xlu0 %v3463_v6 }
0x190b   :  { %v3468_v47 = vpop.xlane.xlu1 %3467 }
0x190c   :  { %v3470_v49 = vmul.f32 0.03125, %v3468_v47  ;;  %v3465_v50 = vpop.xlane.xlu0 %3464 }
0x190d   :  { %v3469_v51 = vmul.f32 0.03125, %v3465_v50 }
0x190e   :  { %v3472_v52 = vsub.f32 %v3458_v43, %v3470_v49 }
0x190f   :  { %v3471_v13 = vsub.f32 %v3453_v45, %v3469_v51 }
0x1910   :  { %v3474_v14 = vmul.f32 %v3472_v52, %v3472_v52 }
0x1911   :  { %v3473_v0 = vmul.f32 %v3471_v13, %v3471_v13 }
0x1912   :  { %v3478_v21 = vsel %vm157_vm0, %v3474_v14, 0.0 }
0x1913   :  { %v3475_v62 = vsel %vm157_vm0, %v3473_v0, 0.0 }
0x1914   :  { %3476 = vadd.xlane.f32.xlu0 %v3475_v62 }
0x1918   :  { %3479 = vadd.xlane.f32.xlu0 %v3478_v21  ;;  %v3742_v21 = vld [vmem:[%s10098_s19] sm:$0xff] }
0x1919   :  { %v8418_v54 = vpack.c.bf16 %v3743_v11, %v3742_v21  ;;  %v8889_v11 = vld [vmem:[%s8990_s13 + $0x8] sm:$0xff] }
0x191b   :  { %8419 = vmatprep.subr.bf16.mxu1 %v8418_v54 }
0x19a1   :  { %v3477_v7 = vpop.xlane.xlu0 %3476 }
0x19a2   :  { %v3481_v8 = vmul.f32 0.03125, %v3477_v7 }
0x19a4   :  { %v3483_v9 = vadd.f32 1e-06, %v3481_v8  ;;  %v7401_v8 = vld [vmem:[%s10100_s12] ss:$0 sm:$0xff] }
0x19a5   :  { %v3480_v24 = vpop.xlane.xlu0 %3479 }
0x19a6   :  { %8804 = vrsqrt.f32 %v3483_v9  ;;  %v3482_v35 = vmul.f32 0.03125, %v3480_v24 }
0x19a8   :  { %v3484_v3 = vadd.f32 1e-06, %v3482_v35 }
0x19aa   :  { %8806 = vrsqrt.f32 %v3484_v3 }
0x19b0   :  { %v8805_v10 = vpop.eup %8804 }
0x19b1   :  { %v3487_v15 = vmul.f32 %v8805_v10, %v3471_v13 }
0x19b3   :  { %v3495_v17 = vmul.f32 %v7392_v12, %v3487_v15 }
0x19b4   :  { %v8807_v18 = vpop.eup %8806 }
0x19b5   :  { %v3488_v37 = vmul.f32 %v8807_v18, %v3472_v52  ;;  %v3503_v19 = vadd.f32 %v7393_v16, %v3495_v17 }
0x19b7   :  { %v3496_v20 = vmul.f32 %v7392_v12, %v3488_v37  ;;  %7996 = vmatprep.mubr.msk.f32.mxu1 %vm157_vm0, %v3503_v19 }
0x19b9   :  { %v3504_v23 = vadd.f32 %v7393_v16, %v3496_v20 }
0x19bb   :  { %7997 = vmatmul.mubr.msk.f32.vlgmr.msra.gmra.mrb[40].mxu1 %vm157_vm0, %v3504_v23 }
0x19bc   :  { %8421 = vmatpush3.bf16.msra.mxu1 %v8418_v54 }
0x19bd   :  { %8423 = vmatprep.subr.bf16.mxu1 %v8422_v56 }
0x19c0   :  { %8425 = vmatpush3.bf16.msra.mxu1 %v8422_v56 }
0x19c1   :  { %8029 = vmatprep.subr.mxu1 %v8953_v36 }
0x1a8e   :  { %v7998_v28 = vpop.f32.mrb[40].mxu1 }
0x1a8f   :  { %v3594_v29 = vadd.f32 %v7998_v28, %v7394_v27  ;;  %v3588_v22 = vpop.f32.mrb[41].mxu1 }
0x1a90   :  { %v3589_v30 = vadd.f32 %v7394_v27, %v3588_v22 }
0x1a91   :  { %v3598_v32 = vmax.f32 %v3594_v29, 0.0 }
0x1a92   :  { %v3597_v31 = vmax.f32 %v3589_v30, 0.0 }
0x1a94   :  { %8015 = vmatprep.mubr.msk.f32.mxu0 %vm3614_vm6, %v3597_v31 }
0x1a95   :  { %8016 = vmatmul.mubr.msk.f32.vlgmr.msra.gmra.mrb[36].mxu0 %vm3614_vm6, %v3598_v32 }
0x1a96   :  { %8041 = vmatprep.mubr.msk.f32.mxu0 %vm8954_vm1, %v8953_v36 }
0x1b68   :  { %v8017_v39 = vpop.f32.mrb[36].mxu0 }
0x1b69   :  { %v3693_v40 = vadd.f32 %v8017_v39, %v7397_v34  ;;  %v3687_v41 = vpop.f32.mrb[37].mxu0 }
0x1b6a   :  { %v3688_v42 = vadd.f32 %v7397_v34, %v3687_v41 }
0x1b6b   :  { %v3697_v43 = vadd.f32 %v3693_v40, %v3504_v23  ;;  %v8888_v40 = vld [vmem:[%s8990_s13] sm:$0xff]  ;;  %s10101_s13 = sld [smem:[#allocation12_spill]] }
0x1b6c   :  { %v3696_v44 = vadd.f32 %v3688_v42, %v3503_v19 }
0x1b6d   :  { %v3703_v45 = vsel %vm157_vm0, %v3697_v43, 0.0 }
0x1b6e   :  { %3704 = vadd.xlane.f32.xlu1 %v3703_v45  ;;  %v3700_v46 = vsel %vm157_vm0, %v3696_v44, 0.0 }
0x1b6f   :  { %3701 = vadd.xlane.f32.xlu0 %v3700_v46 }
0x1bfb   :  { %v3705_v6 = vpop.xlane.xlu1 %3704 }
0x1bfc   :  { %v3707_v47 = vmul.f32 0.03125, %v3705_v6  ;;  %v3702_v49 = vpop.xlane.xlu0 %3701 }
0x1bfd   :  { %v3706_v50 = vmul.f32 0.03125, %v3702_v49 }
0x1bfe   :  { %v3709_v51 = vsub.f32 %v3697_v43, %v3707_v47 }
0x1bff   :  { %v3708_v52 = vsub.f32 %v3696_v44, %v3706_v50 }
0x1c00   :  { %v3711_v13 = vmul.f32 %v3709_v51, %v3709_v51 }
0x1c01   :  { %v3710_v0 = vmul.f32 %v3708_v52, %v3708_v52 }
0x1c02   :  { %v3715_v62 = vsel %vm157_vm0, %v3711_v13, 0.0 }
0x1c03   :  { %3716 = vadd.xlane.f32.xlu1 %v3715_v62  ;;  %v3712_v14 = vsel %vm157_vm0, %v3710_v0, 0.0 }
0x1c04   :  { %3713 = vadd.xlane.f32.xlu0 %v3712_v14 }
0x1c90   :  { %v3717_v57 = vpop.xlane.xlu1 %3716 }
0x1c91   :  { %v3719_v58 = vmul.f32 0.03125, %v3717_v57  ;;  %v3714_v59 = vpop.xlane.xlu0 %3713 }
0x1c92   :  { %v3718_v60 = vmul.f32 0.03125, %v3714_v59 }
0x1c93   :  { %v3721_v61 = vadd.f32 1e-06, %v3719_v58 }
0x1c94   :  { %v3720_v63 = vadd.f32 1e-06, %v3718_v60 }
0x1c95   :  { %8808 = vrsqrt.f32 %v3721_v61 }
0x1c96   :  { %8810 = vrsqrt.f32 %v3720_v63 }
0x1c9f   :  { %v8809_v38 = vpop.eup %8808 }
0x1ca0   :  { %v8811_v4 = vpop.eup %8810  ;;  %v3725_v5 = vmul.f32 %v8809_v38, %v3709_v51 }
0x1ca1   :  { %v3724_v7 = vmul.f32 %v8811_v4, %v3708_v52 }
0x1ca2   :  { %v3733_v9 = vmul.f32 %v7400_v1, %v3725_v5 }
0x1ca3   :  { %v3732_v24 = vmul.f32 %v7400_v1, %v3724_v7 }
0x1ca4   :  { %v9631_v3 = vadd.f32 %v7401_v8, %v3733_v9 }
0x1ca5   :  { %v9629_v35 = vadd.f32 %v7401_v8, %v3732_v24 }
0x1ca7   :  { %8026 = vmatprep.mubr.msk.f32.mxu1 %vm157_vm0, %v9629_v35 }
0x1ca8   :  { %8027 = vmatmul.mubr.msk.f32.vlgmr.msra.gmra.mrb[42].mxu1 %vm157_vm0, %v9631_v3 }
0x1ca9   :  { %8031 = vmatprep.mubr.msk.f32.mxu1 %vm8954_vm1, %v8953_v36 }
0x1d7b   :  { %v9639_v10 = vpop.f32.mrb[42].mxu1 }
0x1d7c   :  { %v9641_v12 = vpop.f32.mrb[43].mxu1 }
0x1d7d   :  { %3995 = vrot.lane.b32.xlu1 %v9641_v12, %s8955_s0  ;;  %3828 = vrot.lane.b32.xlu0 %v9641_v12, %s8956_s5 }
0x1d81   :  { %3993 = vrot.lane.b32.xlu1 %v9641_v12, %s8957_s17  ;;  %4160 = vrot.lane.b32.xlu0 %v9641_v12, %s8958_s21 }
0x1d85   :  { %4162 = vrot.lane.b32.xlu1 %v9641_v12, %s8959_s25  ;;  %4327 = vrot.lane.b32.xlu0 %v9641_v12, %s8960_s22 }
0x1d89   :  { %4329 = vrot.lane.b32.xlu1 %v9641_v12, %s8961_s23  ;;  %4677 = vrot.lane.b32.xlu0 %v9639_v10, %s8955_s0 }
0x1d8d   :  { %4510 = vrot.lane.b32.xlu1 %v9639_v10, %s8956_s5  ;;  %4844 = vrot.lane.b32.xlu0 %v9639_v10, %s8959_s25 }
0x1d91   :  { %4675 = vrot.lane.b32.xlu1 %v9639_v10, %s8957_s17  ;;  %5011 = vrot.lane.b32.xlu0 %v9639_v10, %s8961_s23 }
0x1d95   :  { %4842 = vrot.lane.b32.xlu1 %v9639_v10, %s8958_s21 }
0x1d99   :  { %5009 = vrot.lane.b32.xlu1 %v9639_v10, %s8960_s22 }
0x1def   :  { %v3996_v15 = vpop.permute.xlu1 %3995  ;;  %v3829_v16 = vpop.permute.xlu0 %3828 }
0x1df0   :  { %8030 = vmatpush3.xpose.msk.msra.mxu1 %vm289_vm2, %v3829_v16  ;;  %8040 = vmatpush3.xpose.msk.msra.mxu0 %vm289_vm2, %v3996_v15 }
0x1df1   :  { %8049 = vmatprep.subr.mxu0 %v8953_v36  ;;  %8034 = vmatprep.subr.mxu1 %v8953_v36 }
0x1df3   :  { %v3994_v17 = vpop.permute.xlu1 %3993  ;;  %8032 = vmatmul.mubr.msk.f32.vlgmr.msra.gmra.mrb[44].mxu1 %vm289_vm2, %v9641_v12  ;;  %v4161_v18 = vpop.permute.xlu0 %4160 }
0x1df4   :  { %8042 = vmatmul.mubr.msk.f32.vlgmr.msra.gmra.mrb[38].mxu0 %vm289_vm2, %v3994_v17  ;;  %8036 = vmatprep.mubr.msk.f32.mxu1 %vm8954_vm1, %v8953_v36 }
0x1df5   :  { %8051 = vmatprep.mubr.msk.f32.mxu0 %vm8954_vm1, %v8953_v36 }
0x1df7   :  { %v4163_v37 = vpop.permute.xlu1 %4162  ;;  %v4328_v19 = vpop.permute.xlu0 %4327 }
0x1df8   :  { %8050 = vmatpush3.xpose.msk.msra.mxu0 %vm289_vm2, %v4163_v37 }
0x1df9   :  { %8059 = vmatprep.subr.mxu0 %v8953_v36 }
0x1dfb   :  { %v4330_v20 = vpop.permute.xlu1 %4329  ;;  %8052 = vmatmul.mubr.msk.f32.vlgmr.msra.gmra.mrb[40].mxu0 %vm289_vm2, %v4161_v18  ;;  %v4678_v23 = vpop.permute.xlu0 %4677 }
0x1dfc   :  { %8060 = vmatpush3.xpose.msk.msra.mxu0 %vm289_vm2, %v4330_v20  ;;  %8061 = vmatprep.mubr.msk.f32.mxu0 %vm8954_vm1, %v8953_v36 }
0x1dfd   :  { %8069 = vmatprep.subr.mxu0 %v8953_v36 }
0x1dff   :  { %v4511_v25 = vpop.permute.xlu1 %4510  ;;  %8062 = vmatmul.mubr.msk.f32.vlgmr.msra.gmra.mrb[42].mxu0 %vm289_vm2, %v4328_v19  ;;  %v4845_v33 = vpop.permute.xlu0 %4844 }
0x1e00   :  { %8070 = vmatpush3.xpose.msk.msra.mxu0 %vm289_vm2, %v4511_v25  ;;  %8071 = vmatprep.mubr.msk.f32.mxu0 %vm8954_vm1, %v8953_v36 }
0x1e01   :  { %8079 = vmatprep.subr.mxu0 %v8953_v36 }
0x1e03   :  { %v4676_v26 = vpop.permute.xlu1 %4675  ;;  %8072 = vmatmul.mubr.msk.f32.vlgmr.msra.gmra.mrb[44].mxu0 %vm289_vm2, %v9639_v10  ;;  %v5012_v28 = vpop.permute.xlu0 %5011 }
0x1e04   :  { %8080 = vmatpush3.xpose.msk.msra.mxu0 %vm289_vm2, %v4678_v23  ;;  %8081 = vmatprep.mubr.msk.f32.mxu0 %vm8954_vm1, %v8953_v36 }
0x1e05   :  { %8089 = vmatprep.subr.mxu0 %v8953_v36 }
0x1e07   :  { %8082 = vmatmul.mubr.msk.f32.vlgmr.msra.gmra.mrb[46].mxu0 %vm289_vm2, %v4676_v26  ;;  %v4843_v27 = vpop.permute.xlu1 %4842 }
0x1e08   :  { %8090 = vmatpush3.xpose.msk.msra.mxu0 %vm289_vm2, %v4845_v33  ;;  %8091 = vmatprep.mubr.msk.f32.mxu0 %vm8954_vm1, %v8953_v36 }
0x1e09   :  { %8099 = vmatprep.subr.mxu0 %v8953_v36 }
0x1e0b   :  { %8092 = vmatmul.mubr.msk.f32.vlgmr.msra.gmra.mrb[48].mxu0 %vm289_vm2, %v4843_v27  ;;  %v5010_v29 = vpop.permute.xlu1 %5009 }
0x1e0c   :  { %8100 = vmatpush3.xpose.msk.msra.mxu0 %vm289_vm2, %v5012_v28  ;;  %8101 = vmatprep.mubr.msk.f32.mxu0 %vm8954_vm1, %v8953_v36 }
0x1e0f   :  { %8102 = vmatmul.mubr.msk.f32.vlgmr.msra.gmra.mrb[50].mxu0 %vm289_vm2, %v5010_v29 }
0x1ec6   :  { %v3900_v22 = vpop.f32.mrb[44].mxu1 }
0x1ec7   :  { %v3904_v30 = vmul.f32 0.35355338, %v3900_v22  ;;  %v8033_v31 = vpop.f32.mrb[45].mxu1  ;;  %v4067_v32 = vpop.f32.mrb[38].mxu0 }
0x1ec8   :  { %v4071_v34 = vmul.f32 0.35355338, %v4067_v32  ;;  %v8043_v39 = vpop.f32.mrb[39].mxu0 }
0x1ec9   :  { %v3905_v41 = vadd.f32 %v8888_v40, %v3904_v30 }
0x1eca   :  { %v4072_v42 = vadd.f32 %v8888_v40, %v4071_v34 }
0x1ecb   :  { %v3906_v43 = vsel %vm289_vm2, %v3905_v41, -inf }
0x1ecc   :  { %3907 = vmax.xlane.f32.xlu0 %v3906_v43  ;;  %v4073_v44 = vsel %vm289_vm2, %v4072_v42, -inf }
0x1ecd   :  { %4074 = vmax.xlane.f32.xlu1 %v4073_v44 }
0x1ece   :  { %v4234_v45 = vpop.f32.mrb[40].mxu0 }
0x1ecf   :  { %v4238_v46 = vmul.f32 0.35355338, %v4234_v45  ;;  %v8053_v6 = vpop.f32.mrb[41].mxu0 }
0x1ed1   :  { %v9713_v47 = vadd.f32 %v8888_v40, %v4238_v46 }
0x1ed2   :  { %v4401_v49 = vpop.f32.mrb[42].mxu0 }
0x1ed3   :  { %v4405_v50 = vmul.f32 0.35355338, %v4401_v49  ;;  %v8063_v51 = vpop.f32.mrb[43].mxu0  ;;  %v4240_v52 = vsel %vm289_vm2, %v9713_v47, -inf }
0x1ed4   :  { %4241 = vmax.xlane.f32.xlu0 %v4240_v52 }
0x1ed5   :  { %v4406_v13 = vadd.f32 %v8888_v40, %v4405_v50 }
0x1ed6   :  { %v4582_v0 = vpop.f32.mrb[44].mxu0 }
0x1ed7   :  { %v4586_v62 = vmul.f32 0.35355338, %v4582_v0  ;;  %v8073_v14 = vpop.f32.mrb[45].mxu0  ;;  %v4407_v21 = vsel %vm289_vm2, %v4406_v13, -inf }
0x1ed8   :  { %4408 = vmax.xlane.f32.xlu0 %v4407_v21 }
0x1ed9   :  { %v4587_v53 = vadd.f32 %v8889_v11, %v4586_v62 }
0x1eda   :  { %v4749_v54 = vpop.f32.mrb[46].mxu0 }
0x1edb   :  { %v4753_v55 = vmul.f32 0.35355338, %v4749_v54  ;;  %v8083_v56 = vpop.f32.mrb[47].mxu0  ;;  %v4588_v57 = vsel %vm289_vm2, %v4587_v53, -inf }
0x1edc   :  { %4589 = vmax.xlane.f32.xlu0 %v4588_v57 }
0x1edd   :  { %v4754_v58 = vadd.f32 %v8889_v11, %v4753_v55 }
0x1ede   :  { %v4916_v59 = vpop.f32.mrb[48].mxu0 }
0x1edf   :  { %v4920_v60 = vmul.f32 0.35355338, %v4916_v59  ;;  %v8093_v61 = vpop.f32.mrb[49].mxu0  ;;  %v4755_v63 = vsel %vm289_vm2, %v4754_v58, -inf }
0x1ee0   :  { %4756 = vmax.xlane.f32.xlu1 %v4755_v63 }
0x1ee1   :  { %v4921_v38 = vadd.f32 %v8889_v11, %v4920_v60 }
0x1ee2   :  { %v5083_v1 = vpop.f32.mrb[50].mxu0 }
0x1ee3   :  { %v8103_v4 = vpop.f32.mrb[51].mxu0  ;;  %v4922_v5 = vsel %vm289_vm2, %v4921_v38, -inf  ;;  %v5087_v7 = vmul.f32 0.35355338, %v5083_v1 }
0x1ee4   :  { %4923 = vmax.xlane.f32.xlu0 %v4922_v5 }
0x1ee5   :  { %v5088_v8 = vadd.f32 %v8889_v11, %v5087_v7 }
0x1ee7   :  { %v5089_v9 = vsel %vm289_vm2, %v5088_v8, -inf }
0x1ef1   :  { %3917 = vrot.lane.b32.xlu1 %v9641_v12, %s8962_s26 }
0x1f15   :  { %5090 = vmax.xlane.f32.xlu1 %v5089_v9 }
0x1f26   :  { %4251 = vrot.lane.b32.xlu1 %v9641_v12, %s8963_s28 }
0x1f2a   :  { %4418 = vrot.lane.b32.xlu1 %v9641_v12, %s8964_s1 }
0x1f2e   :  { %4599 = vrot.lane.b32.xlu1 %v9639_v10, %s8962_s26 }
0x1f59   :  { %v3908_v24 = vpop.xlane.xlu0 %3907 }
0x1f5a   :  { %v3909_v15 = vsub.f32 %v3905_v41, %v3908_v24  ;;  %v4075_v16 = vpop.xlane.xlu1 %4074 }
0x1f5b   :  { %v4076_v17 = vsub.f32 %v4072_v42, %v4075_v16 }
0x1f5c   :  { %v3910_v18 = vmul.f32 1.442695, %v3909_v15 }
0x1f5d   :  { %v4077_v37 = vmul.f32 1.442695, %v4076_v17 }
0x1f5e   :  { %8812 = vpow2.f32 %v3910_v18 }
0x1f5f   :  { %8814 = vpow2.f32 %v4077_v37 }
0x1f61   :  { %v4242_v19 = vpop.xlane.xlu0 %4241 }
0x1f62   :  { %v4243_v32 = vsub.f32 %v9713_v47, %v4242_v19 }
0x1f64   :  { %v4244_v39 = vmul.f32 1.442695, %v4243_v32  ;;  %v5192_v32 = vld [vmem:[%s10101_s13 + $0x8] sm:$0xff] }
0x1f65   :  { %v4409_v20 = vpop.xlane.xlu0 %4408 }
0x1f66   :  { %v4410_v23 = vsub.f32 %v4406_v13, %v4409_v20 }
0x1f68   :  { %v8813_v25 = vpop.eup %8812  ;;  %v4411_v26 = vmul.f32 1.442695, %v4410_v23 }
0x1f69   :  { %v9731_v33 = vpop.eup %8814  ;;  %v3912_v27 = vsel %vm289_vm2, %v8813_v25, 0.0  ;;  %v4590_v34 = vpop.xlane.xlu0 %4589 }
0x1f6a   :  { %8816 = vpow2.f32 %v4411_v26  ;;  %3913 = vadd.xlane.f32.xlu0 %v3912_v27  ;;  %v4079_v28 = vsel %vm289_vm2, %v9731_v33, 0.0  ;;  %v4591_v40 = vsub.f32 %v4587_v53, %v4590_v34 }
0x1f6b   :  { %4080 = vadd.xlane.f32.xlu1 %v4079_v28  ;;  %8818 = vpow2.f32 %v4244_v39 }
0x1f6c   :  { %v4592_v42 = vmul.f32 1.442695, %v4591_v40 }
0x1f6d   :  { %v4757_v29 = vpop.xlane.xlu1 %4756 }
0x1f6e   :  { %8820 = vpow2.f32 %v4592_v42  ;;  %v4758_v44 = vsub.f32 %v4754_v58, %v4757_v29  ;;  %v5194_v42 = vld [vmem:[%s10101_s13 + $0x18] sm:$0xff] }
0x1f70   :  { %v4759_v46 = vmul.f32 1.442695, %v4758_v44 }
0x1f71   :  { %v3918_v22 = vpop.permute.xlu1 %3917  ;;  %v4924_v41 = vpop.xlane.xlu0 %4923 }
0x1f72   :  { %8035 = vmatpush3.msra.mxu1 %v3918_v22  ;;  %v4925_v43 = vsub.f32 %v4921_v38, %v4924_v41  ;;  %v5193_v41 = vld [vmem:[%s10101_s13 + $0x10] sm:$0xff] }
0x1f73   :  { %8044 = vmatprep.subr.mxu1 %v8953_v36  ;;  %v8430_v44 = vpack.c.bf16 %v5194_v42, %v5193_v41 }
0x1f74   :  { %v9737_v30 = vpop.eup %8816  ;;  %v4926_v45 = vmul.f32 1.442695, %v4925_v43 }
0x1f75   :  { %v4413_v31 = vsel %vm289_vm2, %v9737_v30, 0.0  ;;  %v8819_v6 = vpop.eup %8818 }
0x1f76   :  { %4414 = vadd.xlane.f32.xlu1 %v4413_v31  ;;  %8822 = vpow2.f32 %v4926_v45  ;;  %v5191_v31 = vld [vmem:[%s10101_s13] sm:$0xff] }
0x1f77   :  { %8824 = vpow2.f32 %v4759_v46  ;;  %v8426_v39 = vpack.c.bf16 %v5192_v32, %v5191_v31 }
0x1f78   :  { %v8821_v49 = vpop.eup %8820 }
0x1f79   :  { %v4594_v47 = vsel %vm289_vm2, %v8821_v49, 0.0  ;;  %8427 = vmatprep.subr.bf16.mxu0 %v8426_v39 }
0x1f7a   :  { %8429 = vmatpush3.bf16.msra.mxu0 %v8426_v39 }
0x1f7b   :  { %8431 = vmatprep.subr.bf16.mxu0 %v8430_v44 }
0x1f7e   :  { %8433 = vmatpush3.bf16.msra.mxu0 %v8430_v44  ;;  %v7430_v44 = vld [vmem:[%s10104_s16] ss:$0 sm:$0xff] }
0x1f80   :  { %4084 = vrot.lane.b32.xlu0 %v9641_v12, %s8965_s2  ;;  %v4246_v12 = vsel %vm289_vm2, %v8819_v6, 0.0  ;;  %v9748_v51 = vpop.eup %8822 }
0x1f81   :  { %v4928_v0 = vsel %vm289_vm2, %v9748_v51, 0.0  ;;  %v8825_v62 = vpop.eup %8824 }
0x1f82   :  { %v4761_v14 = vsel %vm289_vm2, %v8825_v62, 0.0 }
0x1f87   :  { %4766 = vrot.lane.b32.xlu1 %v9639_v10, %s8965_s2 }
0x1f9f   :  { %4247 = vadd.xlane.f32.xlu0 %v4246_v12 }
0x1fa2   :  { %v5091_v50 = vpop.xlane.xlu1 %5090 }
0x1fa3   :  { %v5092_v52 = vsub.f32 %v5088_v8, %v5091_v50  ;;  %4595 = vadd.xlane.f32.xlu0 %v4594_v47 }
0x1fa5   :  { %v5093_v13 = vmul.f32 1.442695, %v5092_v52 }
0x1fa6   :  { %v4252_v53 = vpop.permute.xlu1 %4251 }
0x1fa7   :  { %8826 = vpow2.f32 %v5093_v13  ;;  %4929 = vadd.xlane.f32.xlu0 %v4928_v0 }
0x1faa   :  { %v4419_v54 = vpop.permute.xlu1 %4418 }
0x1fab   :  { %4762 = vadd.xlane.f32.xlu1 %v4761_v14 }
0x1fae   :  { %v4600_v55 = vpop.permute.xlu1 %4599 }
0x1fb1   :  { %v9753_v21 = vpop.eup %8826 }
0x1fb2   :  { %v5095_v11 = vsel %vm289_vm2, %v9753_v21, 0.0 }
0x1fb3   :  { %5096 = vadd.xlane.f32.xlu0 %v5095_v11 }
0x1fbc   :  { %5100 = vrot.lane.b32.xlu1 %v9639_v10, %s8964_s1 }
0x1fc9   :  { %4933 = vrot.lane.b32.xlu0 %v9639_v10, %s8963_s28 }
0x1ff7   :  { %v3914_v56 = vpop.xlane.xlu0 %3913 }
0x1ff8   :  { %8828 = vrcp.f32 %v3914_v56  ;;  %v4081_v57 = vpop.xlane.xlu1 %4080 }
0x1ff9   :  { %8830 = vrcp.f32 %v4081_v57 }
0x1ffb   :  { %v4085_v61 = vpop.permute.xlu0 %4084 }
0x2002   :  { %v8829_v58 = vpop.eup %8828 }
0x2003   :  { %v3916_v59 = vmul.f32 %v8829_v58, %v8813_v25  ;;  %v8831_v60 = vpop.eup %8830  ;;  %v4415_v10 = vpop.xlane.xlu1 %4414 }
0x2004   :  { %v4083_v63 = vmul.f32 %v8831_v60, %v9731_v33 }
0x2005   :  { %8037 = vmatmul.mubr.msk.f32.vlgmr.msra.gmra.mrb[46].mxu1 %vm289_vm2, %v3916_v59  ;;  %v8890_v59 = vld [vmem:[%s8985_s9] sm:$0xff] }
0x2006   :  { %8045 = vmatpush3.msra.mxu1 %v4085_v61  ;;  %8046 = vmatprep.mubr.msk.f32.mxu1 %vm8954_vm1, %v8953_v36 }
0x2007   :  { %8054 = vmatprep.subr.mxu1 %v8953_v36  ;;  %v4767_v4 = vpop.permute.xlu1 %4766 }
0x2009   :  { %8047 = vmatmul.mubr.msk.f32.vlgmr.msra.gmra.mrb[48].mxu1 %vm289_vm2, %v4083_v63 }
0x200a   :  { %8055 = vmatpush3.msra.mxu1 %v4252_v53  ;;  %8056 = vmatprep.mubr.msk.f32.mxu1 %vm8954_vm1, %v8953_v36 }
0x200b   :  { %8064 = vmatprep.subr.mxu1 %v8953_v36 }
0x202c   :  { %v4248_v38 = vpop.xlane.xlu0 %4247 }
0x202d   :  { %8832 = vrcp.f32 %v4248_v38 }
0x202e   :  { %8834 = vrcp.f32 %v4415_v10 }
0x2030   :  { %v4596_v1 = vpop.xlane.xlu0 %4595 }
0x2031   :  { %8836 = vrcp.f32 %v4596_v1 }
0x2034   :  { %v4930_v8 = vpop.xlane.xlu0 %4929 }
0x2037   :  { %v8833_v5 = vpop.eup %8832 }
0x2038   :  { %v4250_v7 = vmul.f32 %v8833_v5, %v8819_v6  ;;  %v4763_v9 = vpop.xlane.xlu1 %4762  ;;  %v8835_v24 = vpop.eup %8834 }
0x2039   :  { %8838 = vrcp.f32 %v4763_v9  ;;  %v4417_v15 = vmul.f32 %v8835_v24, %v9737_v30 }
0x203a   :  { %8057 = vmatmul.mubr.msk.f32.vlgmr.msra.gmra.mrb[50].mxu1 %vm289_vm2, %v4250_v7  ;;  %8840 = vrcp.f32 %v4930_v8 }
0x203b   :  { %8065 = vmatpush3.msra.mxu1 %v4419_v54  ;;  %8066 = vmatprep.mubr.msk.f32.mxu1 %vm8954_vm1, %v8953_v36  ;;  %v8837_v16 = vpop.eup %8836 }
0x203c   :  { %8074 = vmatprep.subr.mxu1 %v8953_v36  ;;  %v4598_v17 = vmul.f32 %v8837_v16, %v8821_v49  ;;  %v5101_v26 = vpop.permute.xlu1 %5100 }
0x203e   :  { %8067 = vmatmul.mubr.msk.f32.vlgmr.msra.gmra.mrb[52].mxu1 %vm289_vm2, %v4417_v15 }
0x203f   :  { %8075 = vmatpush3.msra.mxu1 %v4600_v55  ;;  %8076 = vmatprep.mubr.msk.f32.mxu1 %vm8954_vm1, %v8953_v36 }
0x2040   :  { %v5097_v18 = vpop.xlane.xlu0 %5096  ;;  %8084 = vmatprep.subr.mxu1 %v8953_v36 }
0x2041   :  { %8842 = vrcp.f32 %v5097_v18  ;;  %v5406_v18 = vld [vmem:[%s10102_s27 + $0x8] sm:$0xff] }
0x2042   :  { %8077 = vmatmul.mubr.msk.f32.vlgmr.msra.gmra.mrb[54].mxu1 %vm289_vm2, %v4598_v17  ;;  %v5405_v17 = vld [vmem:[%s10102_s27] sm:$0xff] }
0x2043   :  { %v8839_v37 = vpop.eup %8838  ;;  %8085 = vmatpush3.msra.mxu1 %v4767_v4  ;;  %8086 = vmatprep.mubr.msk.f32.mxu1 %vm8954_vm1, %v8953_v36 }
0x2044   :  { %v4765_v19 = vmul.f32 %v8839_v37, %v8825_v62  ;;  %v4934_v20 = vpop.permute.xlu0 %4933  ;;  %8094 = vmatprep.subr.mxu1 %v8953_v36  ;;  %v8841_v23 = vpop.eup %8840  ;;  %v8442_v37 = vpack.c.bf16 %v5406_v18, %v5405_v17 }
0x2045   :  { %v4932_v25 = vmul.f32 %v8841_v23, %v9748_v51 }
0x2046   :  { %8087 = vmatmul.mubr.msk.f32.vlgmr.msra.gmra.mrb[56].mxu1 %vm289_vm2, %v4765_v19  ;;  %8443 = vmatprep.subr.bf16.mxu0 %v8442_v37  ;;  %v5407_v19 = vld [vmem:[%s10102_s27 + $0x10] sm:$0xff] }
0x2047   :  { %8095 = vmatpush3.msra.mxu1 %v4934_v20  ;;  %8096 = vmatprep.mubr.msk.f32.mxu1 %vm8954_vm1, %v8953_v36  ;;  %v5408_v20 = vld [vmem:[%s10102_s27 + $0x18] sm:$0xff] }
0x2048   :  { %8104 = vmatprep.subr.mxu1 %v8953_v36  ;;  %v8446_v23 = vpack.c.bf16 %v5408_v20, %v5407_v19 }
0x204a   :  { %8097 = vmatmul.mubr.msk.f32.vlgmr.msra.gmra.mrb[58].mxu1 %vm289_vm2, %v4932_v25  ;;  %v8891_v25 = vld [vmem:[%s8985_s9 + $0x8] sm:$0xff] }
0x204b   :  { %v8843_v33 = vpop.eup %8842  ;;  %8105 = vmatpush3.msra.mxu1 %v5101_v26  ;;  %8106 = vmatprep.mubr.msk.f32.mxu1 %vm8954_vm1, %v8953_v36  ;;  %v8892_v26 = vld [vmem:[%s8985_s9 + $0x10] sm:$0xff] }
0x204c   :  { %v5099_v27 = vmul.f32 %v8843_v33, %v9753_v21  ;;  %v5320_v33 = vld [vmem:[%s10103_s15] sm:$0xff] }
0x204e   :  { %8107 = vmatmul.mubr.msk.f32.vlgmr.msra.gmra.mrb[60].mxu1 %vm289_vm2, %v5099_v27  ;;  %v5321_v27 = vld [vmem:[%s10103_s15 + $0x8] sm:$0xff] }
0x20d8   :  { %v3989_v28 = vpop.f32.mrb[46].mxu1 }
0x20d9   :  { %v8038_v29 = vpop.f32.mrb[47].mxu1 }
0x20da   :  { %v8893_v29 = vld [vmem:[%s8985_s9 + $0x18] sm:$0xff]  ;;  %s10106_s9 = sld [smem:[#allocation17_spill]] }
0x20dc   :  { %v4156_v22 = vpop.f32.mrb[48].mxu1 }
0x20dd   :  { %4495 = vrot.lane.b32.xlu0 %v4156_v22, %s8966_s7  ;;  %v8048_v30 = vpop.f32.mrb[49].mxu1  ;;  %v5322_v22 = vld [vmem:[%s10103_s15 + $0x10] sm:$0xff] }
0x20de   :  { %v5323_v30 = vld [vmem:[%s10103_s15 + $0x18] sm:$0xff] }
0x20df   :  { %v8438_v31 = vpack.c.bf16 %v5323_v30, %v5322_v22 }
0x210d   :  { %v4323_v34 = vpop.f32.mrb[50].mxu1 }
0x210e   :  { %4499 = vrot.lane.b32.xlu1 %v4323_v34, %s8967_s10  ;;  %v8058_v40 = vpop.f32.mrb[51].mxu1 }
0x2111   :  { %v4490_v43 = vpop.f32.mrb[52].mxu1 }
0x2112   :  { %4503 = vrot.lane.b32.xlu1 %v4490_v43, %s8968_s11  ;;  %v8068_v45 = vpop.f32.mrb[53].mxu1 }
0x2115   :  { %v4671_v46 = vpop.f32.mrb[54].mxu1 }
0x2116   :  { %v8078_v6 = vpop.f32.mrb[55].mxu1 }
0x2119   :  { %v4838_v12 = vpop.f32.mrb[56].mxu1 }
0x211a   :  { %5177 = vrot.lane.b32.xlu0 %v4838_v12, %s8966_s7  ;;  %v8088_v49 = vpop.f32.mrb[57].mxu1 }
0x211d   :  { %v5005_v50 = vpop.f32.mrb[58].mxu1 }
0x211e   :  { %5181 = vrot.lane.b32.xlu0 %v5005_v50, %s8967_s10  ;;  %v8098_v47 = vpop.f32.mrb[59].mxu1 }
0x2121   :  { %v5172_v51 = vpop.f32.mrb[60].mxu1 }
0x2122   :  { %5185 = vrot.lane.b32.xlu1 %v5172_v51, %s8968_s11  ;;  %v8108_v52 = vpop.f32.mrb[61].mxu1 }
0x214f   :  { %v4496_v13 = vpop.permute.xlu0 %4495 }
0x2150   :  { %v4506_v62 = vsel %vm289_vm2, %v3989_v28, %v4496_v13  ;;  %v8434_v28 = vpack.c.bf16 %v5321_v27, %v5320_v33 }
0x2152   :  { %8435 = vmatprep.subr.bf16.mxu1 %v8434_v28 }
0x2153   :  { %8437 = vmatpush3.bf16.msra.mxu1 %v8434_v28 }
0x2154   :  { %8439 = vmatprep.subr.bf16.mxu1 %v8438_v31 }
0x2157   :  { %8441 = vmatpush3.bf16.msra.mxu1 %v8438_v31 }
0x2158   :  { %8450 = vmatprep.subr.bf16.mxu1 %v8969_v48 }
0x2180   :  { %v4500_v0 = vpop.permute.xlu1 %4499 }
0x2181   :  { %v4507_v14 = vsel %vm967_vm3, %v4506_v62, %v4500_v0 }
0x2184   :  { %v4504_v21 = vpop.permute.xlu1 %4503 }
0x2185   :  { %v4508_v11 = vsel %vm969_vm4, %v4507_v14, %v4504_v21 }
0x2186   :  { %8117 = vmatprep.mubr.msk.f32.mxu0 %vm157_vm0, %v4508_v11 }
0x218c   :  { %v5178_v53 = vpop.permute.xlu0 %5177 }
0x218d   :  { %v5188_v55 = vsel %vm289_vm2, %v4671_v46, %v5178_v53  ;;  %v7431_v46 = vld [vmem:[%s10105_s18] ss:$0 sm:$0xff] }
0x2190   :  { %v5182_v54 = vpop.permute.xlu0 %5181 }
0x2191   :  { %v5189_v56 = vsel %vm967_vm3, %v5188_v55, %v5182_v54 }
0x2194   :  { %v5186_v57 = vpop.permute.xlu1 %5185 }
0x2195   :  { %v5190_v58 = vsel %vm969_vm4, %v5189_v56, %v5186_v57 }
0x2196   :  { %8118 = vmatmul.mubr.msk.f32.vlgmr.msra.gmra.mrb[52].mxu0 %vm157_vm0, %v5190_v58 }
0x2197   :  { %8139 = vmatprep.mubr.msk.f32.mxu0 %vm157_vm0, %v8890_v59  ;;  %8445 = vmatpush3.bf16.msra.mxu0 %v8442_v37 }
0x2198   :  { %8447 = vmatprep.subr.bf16.mxu0 %v8446_v23 }
0x219b   :  { %8449 = vmatpush3.bf16.msra.mxu0 %v8446_v23 }
0x219c   :  { %8457 = vmatprep.subr.bf16.mxu0 %v8969_v48 }
0x219e   :  { %8140 = vmatmul.mubr.msk.f32.vlgmr.msra.gmra.mrb[54].mxu0 %vm157_vm0, %v8891_v25 }
0x219f   :  { %8142 = vmatprep.mubr.msk.f32.mxu0 %vm157_vm0, %v8892_v26 }
0x21a2   :  { %8143 = vmatmul.mubr.msk.f32.gmra.mrb[56].mxu0 %vm157_vm0, %v8893_v29 }
0x21a3   :  { %8163 = vmatprep.mubr.msk.f32.mxu0 %vm8954_vm1, %v8953_v36 }
0x2269   :  { %v8119_v60 = vpop.f32.mrb[52].mxu0 }
0x226a   :  { %v5273_v61 = vadd.f32 %v8119_v60, %v9631_v3  ;;  %v5267_v63 = vpop.f32.mrb[53].mxu0 }
0x226b   :  { %v5268_v10 = vadd.f32 %v5267_v63, %v9629_v35 }
0x226c   :  { %v5281_v38 = vsel %vm157_vm0, %v5273_v61, 0.0 }
0x226d   :  { %5282 = vadd.xlane.f32.xlu1 %v5281_v38  ;;  %v5278_v1 = vsel %vm157_vm0, %v5268_v10, 0.0 }
0x226e   :  { %5279 = vadd.xlane.f32.xlu0 %v5278_v1 }
0x2271   :  { %v8141_v52 = vpop.f32.mrb[54].mxu0 }
0x2272   :  { %v5475_v13 = vpop.f32.mrb[55].mxu0 }
0x2273   :  { %v9849_v0 = vpack.i.bf16 %v8141_v52, %v5475_v13  ;;  %v8451_v62 = vpack.c.bf16 %v8141_v52, %v5475_v13 }
0x2275   :  { %v9868_v56 = vpop.f32.mrb[56].mxu0 }
0x2276   :  { %v9870_v57 = vpop.f32.mrb[57].mxu0 }
0x2277   :  { %v9883_v38 = vpack.i.bf16 %v9868_v56, %v9870_v57  ;;  %v8479_v1 = vpack.c.bf16 %v9868_v56, %v9870_v57 }
0x22fa   :  { %v5283_v4 = vpop.xlane.xlu1 %5282 }
0x22fb   :  { %v5285_v5 = vmul.f32 0.03125, %v5283_v4  ;;  %v5280_v7 = vpop.xlane.xlu0 %5279 }
0x22fc   :  { %v5284_v8 = vmul.f32 0.03125, %v5280_v7 }
0x22fd   :  { %v5287_v9 = vsub.f32 %v5273_v61, %v5285_v5 }
0x22fe   :  { %v5286_v24 = vsub.f32 %v5268_v10, %v5284_v8 }
0x22ff   :  { %v5289_v35 = vmul.f32 %v5287_v9, %v5287_v9 }
0x2300   :  { %v5288_v3 = vmul.f32 %v5286_v24, %v5286_v24 }
0x2301   :  { %v5293_v16 = vsel %vm157_vm0, %v5289_v35, 0.0 }
0x2302   :  { %v5290_v15 = vsel %vm157_vm0, %v5288_v3, 0.0 }
0x2303   :  { %5291 = vadd.xlane.f32.xlu0 %v5290_v15 }
0x2307   :  { %5294 = vadd.xlane.f32.xlu0 %v5293_v16 }
0x231d   :  { %8663 = vrot.lane.b32.xlu0 %v9849_v0, %s8957_s17 }
0x2390   :  { %v5292_v32 = vpop.xlane.xlu0 %5291 }
0x2391   :  { %v5296_v34 = vmul.f32 0.03125, %v5292_v32 }
0x2393   :  { %v5298_v39 = vadd.f32 1e-06, %v5296_v34 }
0x2394   :  { %v5295_v40 = vpop.xlane.xlu0 %5294 }
0x2395   :  { %8844 = vrsqrt.f32 %v5298_v39  ;;  %v5297_v41 = vmul.f32 0.03125, %v5295_v40 }
0x2397   :  { %v5299_v42 = vadd.f32 1e-06, %v5297_v41 }
0x2398   :  { %v8664_v14 = vpop.permute.xlu0 %8663 }
0x2399   :  { %8846 = vrsqrt.f32 %v5299_v42  ;;  %v8666_v21 = vunpack.i.h.bf16 %v8664_v14  ;;  %v8665_v11 = vunpack.i.l.bf16 %v8664_v14 }
0x239b   :  { %v8458_v53 = vpack.c.bf16 %v8666_v21, %v8665_v11 }
0x239d   :  { %8460 = vmatpush3.bf16.xpose.msk.msra.mxu0 %vm9401_vm5, %v8458_v53 }
0x239e   :  { %8464 = vmatprep.subr.bf16.mxu0 %v8969_v48 }
0x239f   :  { %v8845_v43 = vpop.eup %8844 }
0x23a0   :  { %v5302_v45 = vmul.f32 %v8845_v43, %v5286_v24 }
0x23a2   :  { %v5310_v6 = vmul.f32 %v7430_v44, %v5302_v45 }
0x23a3   :  { %v8847_v12 = vpop.eup %8846 }
0x23a4   :  { %v5303_v49 = vmul.f32 %v8847_v12, %v5287_v9  ;;  %v9839_v50 = vadd.f32 %v7431_v46, %v5310_v6 }
0x23a6   :  { %v5311_v47 = vmul.f32 %v7430_v44, %v5303_v49  ;;  %8128 = vmatprep.mubr.msk.f32.mxu1 %vm157_vm0, %v9839_v50 }
0x23a8   :  { %v9843_v51 = vadd.f32 %v7431_v46, %v5311_v47 }
0x23aa   :  { %8129 = vmatmul.mubr.msk.f32.vlgmr.msra.gmra.mrb[62].mxu1 %vm157_vm0, %v9843_v51 }
0x23ab   :  { %8149 = vmatprep.mubr.msk.f32.mxu1 %vm8954_vm1, %v8953_v36  ;;  %8453 = vmatpush3.bf16.xpose.msk.msra.mxu1 %vm9401_vm5, %v8451_v62 }
0x23ac   :  { %8454 = vmatprep.subr.bf16.mxu1 %v8969_v48 }
0x247d   :  { %v9859_v54 = vpop.f32.mrb[62].mxu1 }
0x247e   :  { %v5396_v55 = vpop.f32.mrb[63].mxu1 }
0x247f   :  { %5664 = vrot.lane.b32.xlu1 %v5396_v55, %s8957_s17  ;;  %8150 = vmatmul.mubr.msk.f32.vlgmr.msra.gmra.mrb[64].mxu1 %vm289_vm2, %v5396_v55 }
0x2480   :  { %8156 = vmatprep.mubr.msk.f32.mxu1 %vm8954_vm1, %v8953_v36 }
0x2483   :  { %8668 = vrot.lane.b32.xlu1 %v9849_v0, %s8958_s21 }
0x2487   :  { %5837 = vrot.lane.b32.xlu1 %v5396_v55, %s8958_s21 }
0x24f1   :  { %v5665_v58 = vpop.permute.xlu1 %5664 }
0x24f2   :  { %8164 = vmatmul.mubr.msk.f32.vlgmr.msra.gmra.mrb[58].mxu0 %vm289_vm2, %v5665_v58 }
0x24f3   :  { %8177 = vmatprep.mubr.msk.f32.mxu0 %vm8954_vm1, %v8953_v36 }
0x24f5   :  { %v8669_v59 = vpop.permute.xlu1 %8668 }
0x24f6   :  { %v8671_v60 = vunpack.i.h.bf16 %v8669_v59  ;;  %v8670_v61 = vunpack.i.l.bf16 %v8669_v59 }
0x24f8   :  { %v8465_v63 = vpack.c.bf16 %v8671_v60, %v8670_v61 }
0x24f9   :  { %v5838_v10 = vpop.permute.xlu1 %5837 }
0x24fa   :  { %8467 = vmatpush3.bf16.xpose.msk.msra.mxu0 %vm9401_vm5, %v8465_v63 }
0x24fb   :  { %8475 = vmatprep.subr.bf16.mxu0 %v8969_v48 }
0x2501   :  { %8178 = vmatmul.mubr.msk.f32.vlgmr.msra.gmra.mrb[60].mxu0 %vm289_vm2, %v5838_v10 }
0x2502   :  { %8198 = vmatprep.mubr.msk.f32.mxu0 %vm8954_vm1, %v8953_v36 }
0x2552   :  { %v5569_v4 = vpop.f32.mrb[64].mxu1 }
0x2553   :  { %v5573_v5 = vmul.f32 0.35355338, %v5569_v4  ;;  %v8151_v7 = vpop.f32.mrb[65].mxu1 }
0x2555   :  { %v5574_v8 = vsel %vm967_vm3, %v5573_v5, -inf }
0x2556   :  { %5575 = vmax.xlane.f32.xlu0 %v5574_v8 }
0x25c5   :  { %v5742_v9 = vpop.f32.mrb[58].mxu0 }
0x25c6   :  { %v5746_v24 = vmul.f32 0.35355338, %v5742_v9  ;;  %v8165_v3 = vpop.f32.mrb[59].mxu0 }
0x25c8   :  { %v5747_v15 = vsel %vm967_vm3, %v5746_v24, -inf }
0x25c9   :  { %5748 = vmax.xlane.f32.xlu1 %v5747_v15 }
0x25d4   :  { %v5915_v35 = vpop.f32.mrb[60].mxu0 }
0x25d5   :  { %v5919_v16 = vmul.f32 0.35355338, %v5915_v35  ;;  %v8179_v17 = vpop.f32.mrb[61].mxu0 }
0x25d7   :  { %v5920_v18 = vsel %vm967_vm3, %v5919_v16, -inf }
0x25d8   :  { %5921 = vmax.xlane.f32.xlu0 %v5920_v18 }
0x25da   :  { %8678 = vrot.lane.b32.xlu1 %v9849_v0, %s8955_s0 }
0x25de   :  { %8683 = vrot.lane.b32.xlu1 %v9849_v0, %s8959_s25 }
0x25e3   :  { %v5576_v37 = vpop.xlane.xlu0 %5575 }
0x25e4   :  { %v5577_v19 = vsub.f32 %v5573_v5, %v5576_v37 }
0x25e6   :  { %v5578_v20 = vmul.f32 1.442695, %v5577_v19 }
0x25e8   :  { %8848 = vpow2.f32 %v5578_v20 }
0x25f2   :  { %v8849_v23 = vpop.eup %8848 }
0x25f3   :  { %v5580_v25 = vsel %vm967_vm3, %v8849_v23, 0.0 }
0x25f4   :  { %5581 = vadd.xlane.f32.xlu0 %v5580_v25 }
0x2656   :  { %v5749_v26 = vpop.xlane.xlu1 %5748 }
0x2657   :  { %v5750_v33 = vsub.f32 %v5746_v24, %v5749_v26 }
0x2659   :  { %v5751_v27 = vmul.f32 1.442695, %v5750_v33 }
0x265a   :  { %v8679_v41 = vpop.permute.xlu1 %8678 }
0x265b   :  { %8850 = vpow2.f32 %v5751_v27  ;;  %v8681_v46 = vunpack.i.h.bf16 %v8679_v41  ;;  %v8680_v6 = vunpack.i.l.bf16 %v8679_v41 }
0x265d   :  { %v8462_v13 = vpack.c.bf16 %v8681_v46, %v8680_v6 }
0x265e   :  { %v8684_v49 = vpop.permute.xlu1 %8683 }
0x265f   :  { %v8686_v62 = vunpack.i.h.bf16 %v8684_v49  ;;  %v8685_v14 = vunpack.i.l.bf16 %v8684_v49 }
0x2661   :  { %v8469_v11 = vpack.c.bf16 %v8686_v62, %v8685_v14 }
0x2665   :  { %v8851_v28 = vpop.eup %8850  ;;  %v5922_v29 = vpop.xlane.xlu0 %5921 }
0x2666   :  { %v5923_v22 = vsub.f32 %v5919_v16, %v5922_v29  ;;  %v5753_v30 = vsel %vm967_vm3, %v8851_v28, 0.0 }
0x2667   :  { %5754 = vadd.xlane.f32.xlu0 %v5753_v30 }
0x2668   :  { %v5924_v31 = vmul.f32 1.442695, %v5923_v22 }
0x266a   :  { %8852 = vpow2.f32 %v5924_v31 }
0x2674   :  { %v8853_v32 = vpop.eup %8852 }
0x2675   :  { %v5926_v34 = vsel %vm967_vm3, %v8853_v32, 0.0 }
0x2676   :  { %5927 = vadd.xlane.f32.xlu1 %v5926_v34 }
0x267d   :  { %8673 = vrot.lane.b32.xlu0 %v9849_v0, %s8956_s5 }
0x2681   :  { %6010 = vrot.lane.b32.xlu0 %v5396_v55, %s8960_s22  ;;  %v5582_v39 = vpop.xlane.xlu0 %5581 }
0x2682   :  { %8854 = vrcp.f32 %v5582_v39 }
0x2687   :  { %8688 = vrot.lane.b32.xlu1 %v9849_v0, %s8960_s22 }
0x268c   :  { %v8855_v45 = vpop.eup %8854 }
0x268d   :  { %v5584_v47 = vmul.f32 %v8855_v45, %v8849_v23 }
0x26f4   :  { %v5755_v40 = vpop.xlane.xlu0 %5754 }
0x26f5   :  { %8856 = vrcp.f32 %v5755_v40 }
0x26f8   :  { %v8674_v42 = vpop.permute.xlu0 %8673 }
0x26f9   :  { %v8676_v43 = vunpack.i.h.bf16 %v8674_v42  ;;  %v8675_v44 = vunpack.i.l.bf16 %v8674_v42 }
0x26fb   :  { %v8455_v12 = vpack.c.bf16 %v8676_v43, %v8675_v44 }
0x26fc   :  { %v6011_v10 = vpop.permute.xlu0 %6010 }
0x26fd   :  { %8456 = vmatpush3.bf16.msra.mxu1 %v8455_v12 }
0x26fe   :  { %8461 = vmatprep.subr.bf16.mxu1 %v8969_v48 }
0x26ff   :  { %v8857_v52 = vpop.eup %8856 }
0x2700   :  { %8157 = vmatmul.mubr.msk.f32.vlgmr.msra.gmra.mrb[66].mxu1 %vm967_vm3, %v5584_v47  ;;  %v5757_v21 = vmul.f32 %v8857_v52, %v8851_v28 }
0x2701   :  { %8463 = vmatpush3.bf16.msra.mxu1 %v8462_v13  ;;  %8170 = vmatprep.mubr.msk.f32.mxu1 %vm8954_vm1, %v8953_v36 }
0x2702   :  { %8468 = vmatprep.subr.bf16.mxu1 %v8969_v48 }
0x2703   :  { %v5928_v53 = vpop.xlane.xlu1 %5927 }
0x2704   :  { %8858 = vrcp.f32 %v5928_v53  ;;  %8171 = vmatmul.mubr.msk.f32.vlgmr.msra.gmra.mrb[68].mxu1 %vm967_vm3, %v5757_v21 }
0x2705   :  { %8470 = vmatpush3.bf16.msra.mxu1 %v8469_v11  ;;  %8184 = vmatprep.mubr.msk.f32.mxu1 %vm8954_vm1, %v8953_v36 }
0x2706   :  { %8471 = vmatprep.subr.bf16.mxu1 %v8969_v48 }
0x2707   :  { %v8689_v55 = vpop.permute.xlu1 %8688 }
0x2708   :  { %v8691_v58 = vunpack.i.h.bf16 %v8689_v55  ;;  %v8690_v59 = vunpack.i.l.bf16 %v8689_v55 }
0x270a   :  { %v8472_v63 = vpack.c.bf16 %v8691_v58, %v8690_v59 }
0x270e   :  { %v8859_v60 = vpop.eup %8858 }
0x270f   :  { %v5930_v61 = vmul.f32 %v8859_v60, %v8853_v32 }
0x2711   :  { %8185 = vmatmul.mubr.msk.f32.vlgmr.msra.gmra.mrb[70].mxu1 %vm967_vm3, %v5930_v61 }
0x2712   :  { %8474 = vmatpush3.bf16.xpose.msk.msra.mxu1 %vm9401_vm5, %v8472_v63  ;;  %8191 = vmatprep.mubr.msk.f32.mxu1 %vm8954_vm1, %v8953_v36 }
0x2713   :  { %8482 = vmatprep.subr.bf16.mxu1 %v8969_v48 }
0x2719   :  { %8192 = vmatmul.mubr.msk.f32.vlgmr.msra.gmra.mrb[72].mxu1 %vm289_vm2, %v6011_v10 }
0x271a   :  { %8212 = vmatprep.mubr.msk.f32.mxu1 %vm8954_vm1, %v8953_v36 }
0x27d3   :  { %v9920_v4 = vpop.f32.mrb[66].mxu1 }
0x27d4   :  { %v8158_v5 = vpop.f32.mrb[67].mxu1 }
0x27d7   :  { %v9922_v7 = vpop.f32.mrb[68].mxu1 }
0x27d8   :  { %v8172_v8 = vpop.f32.mrb[69].mxu1 }
0x27e4   :  { %v9924_v9 = vpop.f32.mrb[70].mxu1 }
0x27e5   :  { %v8186_v24 = vpop.f32.mrb[71].mxu1 }
0x27ec   :  { %v6088_v3 = vpop.f32.mrb[72].mxu1 }
0x27ed   :  { %v6092_v15 = vmul.f32 0.35355338, %v6088_v3  ;;  %v8193_v35 = vpop.f32.mrb[73].mxu1 }
0x27ef   :  { %v6093_v16 = vsel %vm967_vm3, %v6092_v15, -inf }
0x27f0   :  { %6094 = vmax.xlane.f32.xlu1 %v6093_v16 }
0x287d   :  { %v6095_v17 = vpop.xlane.xlu1 %6094 }
0x287e   :  { %v6096_v18 = vsub.f32 %v6092_v15, %v6095_v17 }
0x2880   :  { %v6097_v37 = vmul.f32 1.442695, %v6096_v18 }
0x2882   :  { %8860 = vpow2.f32 %v6097_v37 }
0x288c   :  { %v8861_v19 = vpop.eup %8860 }
0x288d   :  { %v6099_v20 = vsel %vm967_vm3, %v8861_v19, 0.0 }
0x288e   :  { %6100 = vadd.xlane.f32.xlu0 %v6099_v20 }
0x28a4   :  { %8693 = vrot.lane.b32.xlu0 %v9849_v0, %s8961_s23 }
0x28a8   :  { %8703 = vrot.lane.b32.xlu0 %v9883_v38, %s8957_s17 }
0x28ac   :  { %6368 = vrot.lane.b32.xlu0 %v9859_v54, %s8957_s17  ;;  %s10109_s17 = sld [smem:[#allocation18_spill]] }
0x291b   :  { %v6101_v23 = vpop.xlane.xlu0 %6100 }
0x291c   :  { %8862 = vrcp.f32 %v6101_v23 }
0x291f   :  { %v8694_v25 = vpop.permute.xlu0 %8693 }
0x2920   :  { %v8696_v26 = vunpack.i.h.bf16 %v8694_v25  ;;  %v8695_v33 = vunpack.i.l.bf16 %v8694_v25 }
0x2922   :  { %v8476_v27 = vpack.c.bf16 %v8696_v26, %v8695_v33 }
0x2923   :  { %v8704_v46 = vpop.permute.xlu0 %8703 }
0x2924   :  { %8477 = vmatpush3.bf16.msra.mxu0 %v8476_v27  ;;  %v8706_v12 = vunpack.i.h.bf16 %v8704_v46  ;;  %v8705_v49 = vunpack.i.l.bf16 %v8704_v46 }
0x2925   :  { %8478 = vmatprep.subr.bf16.mxu0 %v8969_v48 }
0x2926   :  { %v8863_v28 = vpop.eup %8862  ;;  %v8486_v52 = vpack.c.bf16 %v8706_v12, %v8705_v49 }
0x2927   :  { %v6103_v29 = vmul.f32 %v8863_v28, %v8861_v19  ;;  %v6369_v13 = vpop.permute.xlu0 %6368 }
0x2929   :  { %8199 = vmatmul.mubr.msk.f32.vlgmr.msra.gmra.mrb[62].mxu0 %vm967_vm3, %v6103_v29 }
0x292a   :  { %8205 = vmatprep.mubr.msk.f32.mxu0 %vm8954_vm1, %v8953_v36 }
0x292d   :  { %8481 = vmatpush3.bf16.xpose.msk.msra.mxu0 %vm9401_vm5, %v8479_v1 }
0x292e   :  { %8489 = vmatprep.subr.bf16.mxu0 %v8969_v48 }
0x2934   :  { %8206 = vmatmul.mubr.msk.f32.vlgmr.msra.gmra.mrb[64].mxu0 %vm289_vm2, %v9859_v54 }
0x2935   :  { %8226 = vmatprep.mubr.msk.f32.mxu0 %vm8954_vm1, %v8953_v36 }
0x29fc   :  { %v9948_v0 = vpop.f32.mrb[62].mxu0 }
0x29fd   :  { %v8200_v22 = vpop.f32.mrb[63].mxu0 }
0x2a07   :  { %v6273_v30 = vpop.f32.mrb[64].mxu0 }
0x2a08   :  { %v6277_v31 = vmul.f32 0.35355338, %v6273_v30  ;;  %v8207_v32 = vpop.f32.mrb[65].mxu0 }
0x2a0a   :  { %v6278_v34 = vsel %vm967_vm3, %v6277_v31, -inf }
0x2a0b   :  { %6279 = vmax.xlane.f32.xlu1 %v6278_v34 }
0x2a98   :  { %v6280_v56 = vpop.xlane.xlu1 %6279 }
0x2a99   :  { %v6281_v57 = vsub.f32 %v6277_v31, %v6280_v56 }
0x2a9b   :  { %v6282_v1 = vmul.f32 1.442695, %v6281_v57 }
0x2a9d   :  { %8864 = vpow2.f32 %v6282_v1 }
0x2aa7   :  { %v8865_v39 = vpop.eup %8864 }
0x2aa8   :  { %v6284_v40 = vsel %vm967_vm3, %v8865_v39, 0.0 }
0x2aa9   :  { %6285 = vadd.xlane.f32.xlu1 %v6284_v40 }
0x2aba   :  { %8698 = vrot.lane.b32.xlu1 %v9883_v38, %s8956_s5  ;;  %s10108_s5 = sld [smem:[#allocation22_spill]] }
0x2b36   :  { %v6286_v41 = vpop.xlane.xlu1 %6285 }
0x2b37   :  { %8866 = vrcp.f32 %v6286_v41 }
0x2b3a   :  { %v8699_v42 = vpop.permute.xlu1 %8698 }
0x2b3b   :  { %v8701_v43 = vunpack.i.h.bf16 %v8699_v42  ;;  %v8700_v44 = vunpack.i.l.bf16 %v8699_v42 }
0x2b3d   :  { %v8483_v45 = vpack.c.bf16 %v8701_v43, %v8700_v44 }
0x2b3f   :  { %8484 = vmatpush3.bf16.msra.mxu1 %v8483_v45 }
0x2b40   :  { %8485 = vmatprep.subr.bf16.mxu1 %v8969_v48 }
0x2b41   :  { %v8867_v6 = vpop.eup %8866 }
0x2b42   :  { %v6288_v47 = vmul.f32 %v8867_v6, %v8865_v39 }
0x2b44   :  { %8213 = vmatmul.mubr.msk.f32.vlgmr.msra.gmra.mrb[74].mxu1 %vm967_vm3, %v6288_v47 }
0x2b45   :  { %8219 = vmatprep.mubr.msk.f32.mxu1 %vm8954_vm1, %v8953_v36 }
0x2b48   :  { %8488 = vmatpush3.bf16.xpose.msk.msra.mxu1 %vm9401_vm5, %v8486_v52 }
0x2b49   :  { %8496 = vmatprep.subr.bf16.mxu1 %v8969_v48 }
0x2b4f   :  { %8220 = vmatmul.mubr.msk.f32.vlgmr.msra.gmra.mrb[76].mxu1 %vm289_vm2, %v6369_v13 }
0x2b50   :  { %8240 = vmatprep.mubr.msk.f32.mxu1 %vm8954_vm1, %v8953_v36 }
0x2c17   :  { %v9964_v62 = vpop.f32.mrb[74].mxu1 }
0x2c18   :  { %v8214_v14 = vpop.f32.mrb[75].mxu1 }
0x2c22   :  { %v6446_v21 = vpop.f32.mrb[76].mxu1 }
0x2c23   :  { %v6450_v11 = vmul.f32 0.35355338, %v6446_v21  ;;  %v8221_v53 = vpop.f32.mrb[77].mxu1 }
0x2c25   :  { %v6451_v55 = vsel %vm967_vm3, %v6450_v11, -inf }
0x2c26   :  { %6452 = vmax.xlane.f32.xlu1 %v6451_v55 }
0x2c37   :  { %8713 = vrot.lane.b32.xlu1 %v9883_v38, %s8958_s21 }
0x2c3b   :  { %6541 = vrot.lane.b32.xlu1 %v9859_v54, %s8958_s21  ;;  %s10110_s21 = sld [smem:[#allocation19_spill]] }
0x2cb3   :  { %v6453_v58 = vpop.xlane.xlu1 %6452 }
0x2cb4   :  { %v6454_v59 = vsub.f32 %v6450_v11, %v6453_v58 }
0x2cb6   :  { %v6455_v60 = vmul.f32 1.442695, %v6454_v59 }
0x2cb7   :  { %v8714_v15 = vpop.permute.xlu1 %8713 }
0x2cb8   :  { %8868 = vpow2.f32 %v6455_v60  ;;  %v8716_v16 = vunpack.i.h.bf16 %v8714_v15  ;;  %v8715_v17 = vunpack.i.l.bf16 %v8714_v15 }
0x2cba   :  { %v8493_v37 = vpack.c.bf16 %v8716_v16, %v8715_v17 }
0x2cbb   :  { %v6542_v19 = vpop.permute.xlu1 %6541 }
0x2cc2   :  { %v8869_v61 = vpop.eup %8868 }
0x2cc3   :  { %v6457_v63 = vsel %vm967_vm3, %v8869_v61, 0.0 }
0x2cc4   :  { %6458 = vadd.xlane.f32.xlu0 %v6457_v63  ;;  %v6902_v63 = vld [vmem:[%s10106_s9] sm:$0xff] }
0x2cda   :  { %8708 = vrot.lane.b32.xlu0 %v9883_v38, %s8955_s0  ;;  %s10107_s0 = sld [smem:[#allocation20_spill]] }
0x2d51   :  { %v6459_v10 = vpop.xlane.xlu0 %6458 }
0x2d52   :  { %8870 = vrcp.f32 %v6459_v10  ;;  %v6903_v10 = vld [vmem:[%s10106_s9 + $0x8] sm:$0xff] }
0x2d55   :  { %v8709_v5 = vpop.permute.xlu0 %8708 }
0x2d56   :  { %v8711_v8 = vunpack.i.h.bf16 %v8709_v5  ;;  %v8710_v24 = vunpack.i.l.bf16 %v8709_v5  ;;  %v6904_v5 = vld [vmem:[%s10106_s9 + $0x10] sm:$0xff] }
0x2d58   :  { %v8490_v3 = vpack.c.bf16 %v8711_v8, %v8710_v24  ;;  %v8506_v8 = vpack.c.bf16 %v6903_v10, %v6902_v63  ;;  %v6905_v24 = vld [vmem:[%s10106_s9 + $0x18] sm:$0xff] }
0x2d5a   :  { %8491 = vmatpush3.bf16.msra.mxu0 %v8490_v3  ;;  %v8510_v3 = vpack.c.bf16 %v6905_v24, %v6904_v5 }
0x2d5b   :  { %8492 = vmatprep.subr.bf16.mxu0 %v8969_v48 }
0x2d5c   :  { %v8871_v35 = vpop.eup %8870 }
0x2d5d   :  { %v6461_v18 = vmul.f32 %v8871_v35, %v8869_v61 }
0x2d5f   :  { %8227 = vmatmul.mubr.msk.f32.vlgmr.msra.gmra.mrb[66].mxu0 %vm967_vm3, %v6461_v18 }
0x2d60   :  { %8233 = vmatprep.mubr.msk.f32.mxu0 %vm8954_vm1, %v8953_v36 }
0x2d63   :  { %8495 = vmatpush3.bf16.xpose.msk.msra.mxu0 %vm9401_vm5, %v8493_v37 }
0x2d64   :  { %8503 = vmatprep.subr.bf16.mxu0 %v8969_v48 }
0x2d6a   :  { %8234 = vmatmul.mubr.msk.f32.vlgmr.msra.gmra.mrb[68].mxu0 %vm289_vm2, %v6542_v19 }
0x2d6b   :  { %8254 = vmatprep.mubr.msk.f32.mxu0 %vm8954_vm1, %v8953_v36 }
0x2e32   :  { %v6537_v20 = vpop.f32.mrb[66].mxu0 }
0x2e33   :  { %v8228_v23 = vpop.f32.mrb[67].mxu0 }
0x2e3d   :  { %v6619_v25 = vpop.f32.mrb[68].mxu0 }
0x2e3e   :  { %v6623_v26 = vmul.f32 0.35355338, %v6619_v25  ;;  %v8235_v33 = vpop.f32.mrb[69].mxu0 }
0x2e40   :  { %v6624_v27 = vsel %vm967_vm3, %v6623_v26, -inf }
0x2e41   :  { %6625 = vmax.xlane.f32.xlu0 %v6624_v27 }
0x2e57   :  { %8718 = vrot.lane.b32.xlu0 %v9883_v38, %s8959_s25  ;;  %s10111_s25 = sld [smem:[#allocation21_spill]] }
0x2e5b   :  { %6714 = vrot.lane.b32.xlu0 %v9859_v54, %s8960_s22 }
0x2e5d   :  { %v7474_v63 = vld [vmem:[%s10111_s25] ss:$0 sm:$0xff] }
0x2ece   :  { %v6626_v28 = vpop.xlane.xlu0 %6625 }
0x2ecf   :  { %v6627_v29 = vsub.f32 %v6623_v26, %v6626_v28 }
0x2ed1   :  { %v6628_v22 = vmul.f32 1.442695, %v6627_v29 }
0x2ed2   :  { %v8719_v30 = vpop.permute.xlu0 %8718 }
0x2ed3   :  { %8872 = vpow2.f32 %v6628_v22  ;;  %v8721_v31 = vunpack.i.h.bf16 %v8719_v30  ;;  %v8720_v32 = vunpack.i.l.bf16 %v8719_v30 }
0x2ed5   :  { %v8497_v34 = vpack.c.bf16 %v8721_v31, %v8720_v32 }
0x2ed7   :  { %8498 = vmatpush3.bf16.msra.mxu1 %v8497_v34 }
0x2ed8   :  { %8499 = vmatprep.subr.bf16.mxu1 %v8969_v48  ;;  %v6715_v48 = vpop.permute.xlu0 %6714 }
0x2edd   :  { %v8873_v56 = vpop.eup %8872 }
0x2ede   :  { %v6630_v57 = vsel %vm967_vm3, %v8873_v56, 0.0 }
0x2edf   :  { %6631 = vadd.xlane.f32.xlu1 %v6630_v57  ;;  %v7032_v57 = vld [vmem:[%s10107_s0 + $0x8] sm:$0xff] }
0x2ef0   :  { %8723 = vrot.lane.b32.xlu1 %v9883_v38, %s8960_s22 }
0x2f6c   :  { %v6632_v1 = vpop.xlane.xlu1 %6631 }
0x2f6d   :  { %8874 = vrcp.f32 %v6632_v1 }
0x2f70   :  { %v8724_v54 = vpop.permute.xlu1 %8723 }
0x2f71   :  { %v8726_v39 = vunpack.i.h.bf16 %v8724_v54  ;;  %v8725_v40 = vunpack.i.l.bf16 %v8724_v54  ;;  %v7033_v54 = vld [vmem:[%s10107_s0 + $0x10] sm:$0xff] }
0x2f73   :  { %v8500_v43 = vpack.c.bf16 %v8726_v39, %v8725_v40  ;;  %v7034_v39 = vld [vmem:[%s10107_s0 + $0x18] sm:$0xff] }
0x2f74   :  { %v8518_v40 = vpack.c.bf16 %v7034_v39, %v7033_v54  ;;  %v7480_v54 = vld [vmem:[%s9145_s4] ss:$0 sm:$0xff] }
0x2f77   :  { %v8875_v41 = vpop.eup %8874 }
0x2f78   :  { %v6634_v42 = vmul.f32 %v8875_v41, %v8873_v56  ;;  %v7031_v56 = vld [vmem:[%s10107_s0] sm:$0xff] }
0x2f79   :  { %v8514_v1 = vpack.c.bf16 %v7032_v57, %v7031_v56  ;;  %v7125_v41 = vld [vmem:[%s10108_s5] sm:$0xff] }
0x2f7a   :  { %8241 = vmatmul.mubr.msk.f32.vlgmr.msra.gmra.mrb[78].mxu1 %vm967_vm3, %v6634_v42  ;;  %v7126_v42 = vld [vmem:[%s10108_s5 + $0x8] sm:$0xff] }
0x2f7b   :  { %8502 = vmatpush3.bf16.xpose.msk.msra.mxu1 %vm9401_vm5, %v8500_v43  ;;  %8247 = vmatprep.mubr.msk.f32.mxu1 %vm8954_vm1, %v8953_v36  ;;  %v7127_v43 = vld [vmem:[%s10108_s5 + $0x10] sm:$0xff] }
0x2f7c   :  { %8515 = vmatprep.subr.bf16.mxu1 %v8514_v1 }
0x2f82   :  { %8248 = vmatmul.mubr.msk.f32.vlgmr.msra.gmra.mrb[80].mxu1 %vm289_vm2, %v6715_v48  ;;  %v8522_v48 = vpack.c.bf16 %v7126_v42, %v7125_v41  ;;  %v7481_v42 = vld [vmem:[%s9150_s6] ss:$0 sm:$0xff] }
0x2f83   :  { %8517 = vmatpush3.bf16.msra.mxu1 %v8514_v1 }
0x2f84   :  { %8519 = vmatprep.subr.bf16.mxu1 %v8518_v40 }
0x2f87   :  { %8521 = vmatpush3.bf16.msra.mxu1 %v8518_v40 }
0x304d   :  { %v6710_v44 = vpop.f32.mrb[78].mxu1 }
0x304e   :  { %v8242_v45 = vpop.f32.mrb[79].mxu1 }
0x3055   :  { %v6792_v46 = vpop.f32.mrb[80].mxu1 }
0x3056   :  { %v6796_v6 = vmul.f32 0.35355338, %v6792_v46  ;;  %v8249_v12 = vpop.f32.mrb[81].mxu1  ;;  %v7129_v46 = vld [vmem:[%s10108_s5 + $0x20] sm:$0xff] }
0x3058   :  { %v6797_v49 = vsel %vm967_vm3, %v6796_v6, -inf }
0x3059   :  { %6798 = vmax.xlane.f32.xlu1 %v6797_v49 }
0x306a   :  { %6184 = vrot.lane.b32.xlu1 %v9922_v7, %s8966_s7 }
0x306e   :  { %6188 = vrot.lane.b32.xlu1 %v9924_v9, %s8967_s10 }
0x3072   :  { %6192 = vrot.lane.b32.xlu1 %v9948_v0, %s8968_s11 }
0x30e6   :  { %v6799_v36 = vpop.xlane.xlu1 %6798 }
0x30e7   :  { %v6800_v2 = vsub.f32 %v6796_v6, %v6799_v36  ;;  %v7130_v6 = vld [vmem:[%s10108_s5 + $0x28] sm:$0xff] }
0x30e8   :  { %v8530_v12 = vpack.c.bf16 %v7130_v6, %v7129_v46 }
0x30e9   :  { %v6801_v47 = vmul.f32 1.442695, %v6800_v2 }
0x30ea   :  { %v6185_v7 = vpop.permute.xlu1 %6184 }
0x30eb   :  { %8876 = vpow2.f32 %v6801_v47 }
0x30ee   :  { %v6189_v14 = vpop.permute.xlu1 %6188 }
0x30f2   :  { %v6193_v58 = vpop.permute.xlu1 %6192 }
0x30f5   :  { %v8877_v52 = vpop.eup %8876 }
0x30f6   :  { %v6803_v13 = vsel %vm967_vm3, %v8877_v52, 0.0 }
0x30f7   :  { %6804 = vadd.xlane.f32.xlu0 %v6803_v13 }
0x310d   :  { %8728 = vrot.lane.b32.xlu0 %v9883_v38, %s8961_s23  ;;  %v6195_v38 = vsel %vm289_vm2, %v9920_v4, %v6185_v7 }
0x310e   :  { %v6196_v60 = vsel %vm967_vm3, %v6195_v38, %v6189_v14  ;;  %v7473_v14 = vld [vmem:[%s10110_s21] ss:$0 sm:$0xff] }
0x310f   :  { %v6197_v61 = vsel %vm969_vm4, %v6196_v60, %v6193_v58  ;;  %v7132_v60 = vld [vmem:[%s10108_s5 + $0x38] sm:$0xff] }
0x3111   :  { %6888 = vrot.lane.b32.xlu0 %v6537_v20, %s8966_s7 }
0x3115   :  { %6892 = vrot.lane.b32.xlu0 %v6710_v44, %s8967_s10  ;;  %v7128_v44 = vld [vmem:[%s10108_s5 + $0x18] sm:$0xff] }
0x3116   :  { %v8526_v45 = vpack.c.bf16 %v7128_v44, %v7127_v43 }
0x3184   :  { %v6805_v9 = vpop.xlane.xlu0 %6804 }
0x3185   :  { %8878 = vrcp.f32 %v6805_v9  ;;  %v7472_v9 = vld [vmem:[%s10109_s17] ss:$0 sm:$0xff] }
0x3188   :  { %v8729_v0 = vpop.permute.xlu0 %8728 }
0x3189   :  { %v8731_v21 = vunpack.i.h.bf16 %v8729_v0  ;;  %v8730_v11 = vunpack.i.l.bf16 %v8729_v0 }
0x318b   :  { %v8504_v53 = vpack.c.bf16 %v8731_v21, %v8730_v11 }
0x318c   :  { %v6889_v35 = vpop.permute.xlu0 %6888 }
0x318d   :  { %8505 = vmatpush3.bf16.msra.mxu0 %v8504_v53  ;;  %v6899_v17 = vsel %vm289_vm2, %v9964_v62, %v6889_v35 }
0x318e   :  { %8507 = vmatprep.subr.bf16.mxu0 %v8506_v8 }
0x318f   :  { %v8879_v55 = vpop.eup %8878 }
0x3190   :  { %v6807_v59 = vmul.f32 %v8879_v55, %v8877_v52  ;;  %v6893_v16 = vpop.permute.xlu0 %6892 }
0x3191   :  { %v6900_v18 = vsel %vm967_vm3, %v6899_v17, %v6893_v16 }
0x3192   :  { %8255 = vmatmul.mubr.msk.f32.vlgmr.msra.gmra.mrb[70].mxu0 %vm967_vm3, %v6807_v59  ;;  %v7131_v59 = vld [vmem:[%s10108_s5 + $0x30] sm:$0xff] }
0x3193   :  { %8265 = vmatprep.mubr.msk.f32.mxu0 %vm157_vm0, %v6197_v61  ;;  %8509 = vmatpush3.bf16.msra.mxu0 %v8506_v8  ;;  %v8534_v61 = vpack.c.bf16 %v7132_v60, %v7131_v59 }
0x3194   :  { %8511 = vmatprep.subr.bf16.mxu0 %v8510_v3 }
0x3197   :  { %8513 = vmatpush3.bf16.msra.mxu0 %v8510_v3 }
0x3198   :  { %8523 = vmatprep.subr.bf16.mxu0 %v8522_v48 }
0x3265   :  { %v6883_v4 = vpop.f32.mrb[70].mxu0 }
0x3266   :  { %6896 = vrot.lane.b32.xlu1 %v6883_v4, %s8968_s11  ;;  %v8256_v15 = vpop.f32.mrb[71].mxu0 }
0x3267   :  { %v7477_v15 = vld [vmem:[%s9140_s30] ss:$0 sm:$0xff]  ;;  %s8970_s30 = smov [#allocation2]  }
0x3268   :  { %s7274_s22 = sshll.u32 %s8970_s30, 4  ;;  %s7275_s22 = int_to_ptr.vmem [resolvable:$true] %s7274_s22 }
0x3269   :  { %s8894_s23 = scalar_lea.vmem %s7275_s22, 256  ;;  %p8899_p1 = scmp.lt.s32.totalorder %s7275_s22, %s7275_s22 }
0x326a   :  { %p8895_p0 = scmp.ne.s32.totalorder %s7275_s22, %s8894_s23  ;;  %p8900_p2 = scmp.lt.s32.totalorder %s8894_s23, %s8894_s23 }
0x326c   :  { %p8901_p3 = por %p8900_p2, %p8899_p1 }
0x326e   :  { %p8902_p4 = pnand %p8901_p3, %p8895_p0 }
0x32d8   :  { %v6897_v37 = vpop.permute.xlu1 %6896 }
0x32d9   :  { %v6901_v19 = vsel %vm969_vm4, %v6900_v18, %v6897_v37 }
0x32da   :  { %8266 = vmatmul.mubr.msk.f32.vlgmr.msra.gmra.mrb[72].mxu0 %vm157_vm0, %v6901_v19 }
0x32db   :  { %8525 = vmatpush3.bf16.msra.mxu0 %v8522_v48 }
0x32dc   :  { %8527 = vmatprep.subr.bf16.mxu0 %v8526_v45 }
0x32df   :  { %8529 = vmatpush3.bf16.msra.mxu0 %v8526_v45 }
0x32e0   :  { %8531 = vmatprep.subr.bf16.mxu0 %v8530_v12 }
0x32e3   :  { %8533 = vmatpush3.bf16.msra.mxu0 %v8530_v12 }
0x32e4   :  { %8535 = vmatprep.subr.bf16.mxu0 %v8534_v61 }
0x32e7   :  { %8537 = vmatpush3.bf16.msra.mxu0 %v8534_v61 }
0x33ad   :  { %v8267_v20 = vpop.f32.mrb[72].mxu0 }
0x33ae   :  { %v6984_v23 = vadd.f32 %v8267_v20, %v9843_v51  ;;  %v6978_v25 = vpop.f32.mrb[73].mxu0 }
0x33af   :  { %v6979_v26 = vadd.f32 %v6978_v25, %v9839_v50 }
0x33b0   :  { %v6992_v33 = vsel %vm157_vm0, %v6984_v23, 0.0 }
0x33b1   :  { %6993 = vadd.xlane.f32.xlu1 %v6992_v33  ;;  %v6989_v62 = vsel %vm157_vm0, %v6979_v26, 0.0 }
0x33b2   :  { %6990 = vadd.xlane.f32.xlu0 %v6989_v62 }
0x343e   :  { %v6994_v27 = vpop.xlane.xlu1 %6993 }
0x343f   :  { %v6996_v28 = vmul.f32 0.03125, %v6994_v27  ;;  %v6991_v29 = vpop.xlane.xlu0 %6990 }
0x3440   :  { %v6995_v22 = vmul.f32 0.03125, %v6991_v29 }
0x3441   :  { %v6998_v30 = vsub.f32 %v6984_v23, %v6996_v28 }
0x3442   :  { %v6997_v31 = vsub.f32 %v6979_v26, %v6995_v22 }
0x3443   :  { %v7000_v32 = vmul.f32 %v6998_v30, %v6998_v30 }
0x3444   :  { %v6999_v51 = vmul.f32 %v6997_v31, %v6997_v31 }
0x3445   :  { %v7004_v34 = vsel %vm157_vm0, %v7000_v32, 0.0 }
0x3446   :  { %v7001_v50 = vsel %vm157_vm0, %v6999_v51, 0.0 }
0x3447   :  { %7002 = vadd.xlane.f32.xlu0 %v7001_v50 }
0x344b   :  { %7005 = vadd.xlane.f32.xlu0 %v7004_v34 }
0x34d4   :  { %v7003_v49 = vpop.xlane.xlu0 %7002 }
0x34d5   :  { %v7007_v36 = vmul.f32 0.03125, %v7003_v49 }
0x34d7   :  { %v7009_v2 = vadd.f32 1e-06, %v7007_v36 }
0x34d8   :  { %v7006_v47 = vpop.xlane.xlu0 %7005 }
0x34d9   :  { %8880 = vrsqrt.f32 %v7009_v2  ;;  %v7008_v52 = vmul.f32 0.03125, %v7006_v47 }
0x34db   :  { %v7010_v13 = vadd.f32 1e-06, %v7008_v52 }
0x34dd   :  { %8882 = vrsqrt.f32 %v7010_v13 }
0x34e3   :  { %v8881_v7 = vpop.eup %8880 }
0x34e4   :  { %v7013_v0 = vmul.f32 %v8881_v7, %v6997_v31 }
0x34e6   :  { %v7021_v21 = vmul.f32 %v7472_v9, %v7013_v0 }
0x34e7   :  { %v8883_v11 = vpop.eup %8882 }
0x34e8   :  { %v7014_v53 = vmul.f32 %v8883_v11, %v6998_v30  ;;  %v7029_v55 = vadd.f32 %v7473_v14, %v7021_v21 }
0x34ea   :  { %v7022_v58 = vmul.f32 %v7472_v9, %v7014_v53  ;;  %8276 = vmatprep.mubr.msk.f32.mxu1 %vm157_vm0, %v7029_v55 }
0x34ec   :  { %v7030_v38 = vadd.f32 %v7473_v14, %v7022_v58 }
0x34ee   :  { %8277 = vmatmul.mubr.msk.f32.vlgmr.msra.gmra.mrb[82].mxu1 %vm157_vm0, %v7030_v38 }
0x35c1   :  { %v8278_v10 = vpop.f32.mrb[82].mxu1 }
0x35c2   :  { %v7120_v5 = vadd.f32 %v8278_v10, %v7474_v63  ;;  %v7114_v8 = vpop.f32.mrb[83].mxu1 }
0x35c3   :  { %v7115_v24 = vadd.f32 %v7474_v63, %v7114_v8 }
0x35c4   :  { %v7124_v4 = vmax.f32 %v7120_v5, 0.0 }
0x35c5   :  { %v7123_v3 = vmax.f32 %v7115_v24, 0.0 }
0x35c7   :  { %8295 = vmatprep.mubr.msk.f32.mxu0 %vm3614_vm6, %v7123_v3 }
0x35c8   :  { %8296 = vmatmul.mubr.msk.f32.vlgmr.msra.gmra.mrb[74].mxu0 %vm3614_vm6, %v7124_v4 }
0x369b   :  { %v8297_v35 = vpop.f32.mrb[74].mxu0 }
0x369c   :  { %v7218_v16 = vadd.f32 %v8297_v35, %v7477_v15  ;;  %v7212_v17 = vpop.f32.mrb[75].mxu0 }
0x369d   :  { %v7213_v18 = vadd.f32 %v7477_v15, %v7212_v17 }
0x369e   :  { %v7222_v37 = vadd.f32 %v7218_v16, %v7030_v38 }
0x369f   :  { %v7221_v19 = vadd.f32 %v7213_v18, %v7029_v55 }
0x36a0   :  { %v7228_v20 = vsel %vm157_vm0, %v7222_v37, 0.0 }
0x36a1   :  { %7229 = vadd.xlane.f32.xlu1 %v7228_v20  ;;  %v7225_v23 = vsel %vm157_vm0, %v7221_v19, 0.0 }
0x36a2   :  { %7226 = vadd.xlane.f32.xlu0 %v7225_v23 }
0x372e   :  { %v7230_v25 = vpop.xlane.xlu1 %7229 }
0x372f   :  { %v7232_v26 = vmul.f32 0.03125, %v7230_v25  ;;  %v7227_v33 = vpop.xlane.xlu0 %7226 }
0x3730   :  { %v7231_v62 = vmul.f32 0.03125, %v7227_v33 }
0x3731   :  { %v7234_v27 = vsub.f32 %v7222_v37, %v7232_v26 }
0x3732   :  { %v7233_v28 = vsub.f32 %v7221_v19, %v7231_v62 }
0x3733   :  { %v7236_v29 = vmul.f32 %v7234_v27, %v7234_v27 }
0x3734   :  { %v7235_v22 = vmul.f32 %v7233_v28, %v7233_v28 }
0x3735   :  { %v7240_v30 = vsel %vm157_vm0, %v7236_v29, 0.0 }
0x3736   :  { %7241 = vadd.xlane.f32.xlu1 %v7240_v30  ;;  %v7237_v31 = vsel %vm157_vm0, %v7235_v22, 0.0 }
0x3737   :  { %7238 = vadd.xlane.f32.xlu0 %v7237_v31 }
0x37c3   :  { %v7242_v51 = vpop.xlane.xlu1 %7241 }
0x37c4   :  { %v7244_v50 = vmul.f32 0.03125, %v7242_v51  ;;  %v7239_v32 = vpop.xlane.xlu0 %7238 }
0x37c5   :  { %v7243_v34 = vmul.f32 0.03125, %v7239_v32 }
0x37c6   :  { %v7246_v56 = vadd.f32 1e-06, %v7244_v50 }
0x37c7   :  { %v7245_v57 = vadd.f32 1e-06, %v7243_v34 }
0x37c8   :  { %8884 = vrsqrt.f32 %v7246_v56 }
0x37c9   :  { %8886 = vrsqrt.f32 %v7245_v57 }
0x37d2   :  { %v8885_v1 = vpop.eup %8884 }
0x37d3   :  { %v8887_v39 = vpop.eup %8886  ;;  %v7250_v40 = vmul.f32 %v8885_v1, %v7234_v27 }
0x37d4   :  { %v7249_v41 = vmul.f32 %v8887_v39, %v7233_v28 }
0x37d5   :  { %v7258_v43 = vmul.f32 %v7480_v54, %v7250_v40 }
0x37d6   :  { %v7257_v48 = vmul.f32 %v7480_v54, %v7249_v41 }
0x37d7   :  { %v7266_v44 = vadd.f32 %v7481_v42, %v7258_v43 }
0x37d8   :  { %v7265_v45 = vadd.f32 %v7481_v42, %v7257_v48 }
0x37d9   :  { %7268 = vst.msk [vmem:[#allocation2 + $0x8] sm:$0xff] %vm157_vm0, %v7266_v44 }
0x37da   :  { %7267 = vst.msk [vmem:[#allocation2] sm:$0xff] %vm157_vm0, %v7265_v45 }
0x37db   :  { %8905 = shalt.err (!%p8902_p4)
}
0x37dc   :  { %s8906_s6 = scalar_lea.hbm %s9155_s20, 256 }
0x37dd   :  { %p8907_p5 = scmp.ne.s32.totalorder %s9155_s20, %s8906_s6  ;;  %p8910_p6 = scmp.lt.u32.totalorder %s8906_s6, %s9155_s20 }
0x37df   :  { %p8912_p7 = pnand %p8910_p6, %p8907_p5 }
0x37e1   :  { %8915 = shalt.err (!%p8912_p7)
}
0x37e2   :  { %s8971_s4 = smov 128  }
0x37e3   :  { %7280 = dma.vmem_to_hbm [thread:$0]  %s7275_s22, 256, %s9155_s20, [#allocation3], %s8971_s4, %s8971_s4, %s8966_s7  }
0x37e4   :  { %8916 = dma.done.wait [#allocation3], 256  }
0x37e5   :  { %8917 = vsyncadd [#allocation3], 4294967040 }
0x37e6   :  { %7284 = vsyncpa [#allocation3], 1 }

</bundles_post_ra>
